<compile_context>
chip_gen: v7x
topology: tpu7x:2x2x1
jax: 0.10.0
libtpu: 0.0.40
codegen_flags: <defaults>
</compile_context>

<pallas_src>
import functools

import jax
import jax.numpy as jnp
from jax.experimental import pallas as pl
from jax.experimental.pallas import tpu as pltpu

PROPERTORSION_TERMS = 4
OUT_LANES = 128          # lane-dense output slab width, shared by a group's terms

# name -> (num_nodes_in_post_input, out_channels, topo_term)
PARAM_SHAPES = {
    "Sigma":             (1, 1, "Atom"),
    "Epsilon":           (1, 1, "Atom"),
    "Charge":            (1, 1, "Atom"),
    "Bond_k":            (2, 1, "Bond"),
    "Bond_length":       (2, 1, "Bond"),
    "Angle_k":           (3, 1, "Angle"),
    "Angle_theta":       (3, 1, "Angle"),
    "ProperTorsion_k":   (4, PROPERTORSION_TERMS, "ProperTorsion"),
    "ImproperTorsion_k": (2, 1, "ImproperTorsion"),
}

# Synthetic, deterministic stand-in for ParamData.std_mean[term] = (std, mean).
STD_MEAN = {
    "Sigma": (0.5, 3.0), "Epsilon": (0.2, 0.1), "Charge": (0.8, 0.0),
    "Bond_k": (100.0, 500.0), "Bond_length": (0.2, 1.4),
    "Angle_k": (50.0, 100.0), "Angle_theta": (0.3, 2.0),
    "ProperTorsion_k": (2.0, 0.0), "ImproperTorsion_k": (5.0, 2.0),
}

# ParamTerms fused into one pallas_call (they share topology / MLP shapes).
GROUPS = [
    ("Atom",            ["Sigma", "Epsilon", "Charge"]),
    ("Bond",            ["Bond_k", "Bond_length"]),
    ("Angle",           ["Angle_k", "Angle_theta"]),
    ("ProperTorsion",   ["ProperTorsion_k"]),
    ("ImproperTorsion", ["ImproperTorsion_k"]),
]

NUM_PERMS = {"Atom": 1, "Bond": 2, "Angle": 2,
             "ProperTorsion": 2, "ImproperTorsion": 3}


# ----------------------------- kernel math ---------------------------------

def _erf(x, exact_recip=False):
    # float32 rational approximation of erf (|err| ~ 1e-7 with exact division).
    # Polynomials stay on the VPU; the divide goes to the (otherwise idle) EUP
    # inside the kernel; the pure-JAX reference uses exact division.
    x = jnp.clip(x, -4.0, 4.0)
    x2 = x * x
    alpha = (0.00022905065861350646, 0.0034082910107109506,
             0.050955695062380861, 0.18520832239976145, 1.128379143519084)
    beta = (-1.1791602954361697e-7, 0.000023547966471313185,
            0.0010179625278914885, 0.014070470171167667,
            0.11098505178285362, 0.49746925110067538, 1.0)
    p = alpha[0]
    for c in alpha[1:]:
        p = p * x2 + c
    q = beta[0]
    for c in beta[1:]:
        q = q * x2 + c
    if exact_recip:
        return (x * p) / q
    # q >= 1 on the clipped range, so the approximate reciprocal is safe.
    return (x * p) * pl.reciprocal(q, approx=True)


def _gelu(x, exact_recip=False):
    # erf-based GELU (matches torch.nn.GELU() default up to the approx recip).
    return 0.5 * x * (1.0 + _erf(x * 0.7071067811865476, exact_recip))


def _make_group_kernel(has_post, use_tanh):
    """Fused forward for all ParamTerms of one topology group.

    x tile: (tile_n, Kin). All weights are the group-fused matrices built in
    prepare_group(); terms/perms live in the lane dimension, so every layer
    is a single wide MXU matmul.
    """

    def kernel(*refs):
        if has_post:
            x_ref, w1, b1, w2, b2, w3, b3, *rest = refs
        else:
            x_ref, *rest = refs
        if use_tanh:
            v1, c1, v2, c2, v3, c3, sc, mn, o_ref = rest
        else:
            v1, c1, v2, c2, v3, c3, o_ref = rest

        h = x_ref[...]                                            # (tile_n, Kin)
        if has_post:
            # post_mlp: each (term, perm) block occupies its own lane segment
            h = _gelu(jnp.dot(h, w1[...],
                              preferred_element_type=jnp.float32) + b1[...])
            h = _gelu(jnp.dot(h, w2[...],
                              preferred_element_type=jnp.float32) + b2[...])
            h = jnp.dot(h, w3[...],
                        preferred_element_type=jnp.float32) + b3[...]
        # out_mlp; v1 also performs the symmetry-preserving perm sum
        g = _gelu(jnp.dot(h, v1[...],
                          preferred_element_type=jnp.float32) + c1[...])
        g = _gelu(jnp.dot(g, v2[...],
                          preferred_element_type=jnp.float32) + c2[...])
        y = jnp.dot(g, v3[...],
                    preferred_element_type=jnp.float32) + c3[...]
        if use_tanh:
            # tanh on the EUP; sc = tanh_output*std, mn = mean (0 on pad lanes)
            y = jnp.tanh(y) * sc[...] + mn[...]
        o_ref[...] = y.astype(o_ref.dtype)

    return kernel


# ----------------------------- weight fusion --------------------------------

def _perm_post_w1(w1, topo, node_dim):
    """Row-permuted copies of the first post-MLP weight, one per symmetric
    permutation: post(perm_p(x_cat)) layer-1 == x_cat @ W1_perm[p], so the
    reversed / duplicated activation copies are never materialized."""
    hidden = w1.shape[-1]
    if topo == "ImproperTorsion":
        # perm_j input = concat(node0, node_j), j = 1..3;  x_cat = concat(node0..3)
        a, b = w1[:node_dim], w1[node_dim:]
        zeros = jnp.zeros_like(b)
        perms = []
        for j in range(1, 4):
            blocks = [a, zeros, zeros, zeros]
            blocks[j] = b
            perms.append(jnp.concatenate(blocks, axis=0))
        return perms                                       # 3 x (4*D, H)
    num_nodes = w1.shape[0] // node_dim
    w_rev = w1.reshape(num_nodes, node_dim, hidden)[::-1].reshape(w1.shape)
    return [w1, w_rev]                                     # identity, node-reversed


def _block_diag(blocks):
    rows = sum(b.shape[0] for b in blocks)
    cols = sum(b.shape[1] for b in blocks)
    out = jnp.zeros((rows, cols), blocks[0].dtype)
    r = c = 0
    for b in blocks:
        out = out.at[r:r + b.shape[0], c:c + b.shape[1]].set(b)
        r += b.shape[0]
        c += b.shape[1]
    return out


def prepare_group(topo, names, params_cfg, tanh_output, node_dim):
    """Build the group-fused weight matrices ONCE (outside jit / kernel)."""
    term_params = [params_cfg[nm] for nm in names]
    num_perm = NUM_PERMS[topo]
    has_post = topo != "Atom"
    use_tanh = tanh_output > 0.0

    fused = {}
    if has_post:
        w1_c, b1_c, w2_b, b2_c, w3_b, b3_c = [], [], [], [], [], []
        for tp in term_params:
            (w1, b1), (w2, b2), (w3, b3) = tp["post"]
            for wp in _perm_post_w1(w1, topo, node_dim):
                w1_c.append(wp); b1_c.append(b1)
                w2_b.append(w2); b2_c.append(b2)
                w3_b.append(w3); b3_c.append(b3)
        fused["w1"] = jnp.concatenate(w1_c, axis=1)        # (Kin, T*P*H1)
        fused["b1"] = jnp.concatenate(b1_c, axis=1)
        fused["w2"] = _block_diag(w2_b)                    # (T*P*H1, T*P*H2)
        fused["b2"] = jnp.concatenate(b2_c, axis=1)
        fused["w3"] = _block_diag(w3_b)                    # (T*P*H2, T*P*H3)
        fused["b3"] = jnp.concatenate(b3_c, axis=1)
        # perm-sum folded into out layer 1:
        #   sum_p h_p @ V1 == [h_0|h_1|...] @ [V1; V1; ...]
        fused["v1"] = _block_diag(
            [jnp.concatenate([tp["out"][0][0]] * num_perm, axis=0)
             for tp in term_params])                        # (T*P*H3, T*G1)
    else:
        # Atom: out_mlp consumes the node features directly; terms share x
        fused["v1"] = jnp.concatenate(
            [tp["out"][0][0] for tp in term_params], axis=1)   # (D, T*G1)
    fused["c1"] = jnp.concatenate([tp["out"][0][1] for tp in term_params], axis=1)
    fused["v2"] = _block_diag([tp["out"][1][0] for tp in term_params])
    fused["c2"] = jnp.concatenate([tp["out"][1][1] for tp in term_params], axis=1)

    # Final layer: each term's real channels land in disjoint lanes of ONE
    # shared 128-lane slab (lane-dense unmasked stores, one slab per group).
    out_dims = [tp["out_dim"] for tp in term_params]
    lane_offs = [0]
    for od in out_dims[:-1]:
        lane_offs.append(lane_offs[-1] + od)
    g2_tot = sum(tp["out"][2][0].shape[0] for tp in term_params)
    v3 = jnp.zeros((g2_tot, OUT_LANES), jnp.float32)
    c3 = jnp.zeros((1, OUT_LANES), jnp.float32)
    sc = jnp.zeros((1, OUT_LANES), jnp.float32)
    mn = jnp.zeros((1, OUT_LANES), jnp.float32)
    r = 0
    for tp, off in zip(term_params, lane_offs):
        w, b = tp["out"][2]
        g2, od = w.shape
        v3 = v3.at[r:r + g2, off:off + od].set(w)
        c3 = c3.at[:, off:off + od].set(b)
        sc = sc.at[:, off:off + od].set(
            (tanh_output if use_tanh else 1.0) * tp["std"])
        mn = mn.at[:, off:off + od].set(tp["mean"])
        r += g2
    if use_tanh:
        fused["v3"], fused["c3"], fused["sc"], fused["mn"] = v3, c3, sc, mn
    else:
        # no tanh: fold y*std+mean into the last layer
        fused["v3"] = v3 * sc
        fused["c3"] = c3 * sc + mn

    meta = dict(names=tuple(names), has_post=has_post, use_tanh=use_tanh,
                out_dims=tuple(out_dims), lane_offs=tuple(lane_offs))
    return fused, meta


# ----------------------------- wrapper glue ---------------------------------

_POST_KEYS = ("w1", "b1", "w2", "b2", "w3", "b3")
_OUT_KEYS = ("v1", "c1", "v2", "c2", "v3", "c3")


def run_group(x_cat, fused, meta, row_tile=1024):
    """One fused pallas_call for all ParamTerms of one topology group."""
    n, kin = x_cat.shape
    has_post, use_tanh = meta["has_post"], meta["use_tanh"]

    n_pad = -(-n // 8) * 8                                  # sublane multiple
    if n_pad > row_tile:
        tile_n = row_tile
        n_pad = -(-n // row_tile) * row_tile
    else:
        tile_n = n_pad
    if n_pad != n:
        x_cat = jnp.pad(x_cat, ((0, n_pad - n), (0, 0)))

    keys = (_POST_KEYS if has_post else ()) + _OUT_KEYS + \
           (("sc", "mn") if use_tanh else ())
    args = [x_cat] + [fused[k] for k in keys]
    in_specs = [pl.BlockSpec((tile_n, kin), lambda r: (r, 0))]
    # weights/biases: full-array blocks with constant index_map -> not
    # re-fetched across row steps.
    in_specs += [pl.BlockSpec(fused[k].shape, lambda r: (0, 0)) for k in keys]

    out = pl.pallas_call(
        _make_group_kernel(has_post, use_tanh),
        grid=(n_pad // tile_n,),
        in_specs=in_specs,
        out_specs=pl.BlockSpec((tile_n, OUT_LANES), lambda r: (r, 0)),
        out_shape=jax.ShapeDtypeStruct((n_pad, OUT_LANES), jnp.float32),
        compiler_params=pltpu.CompilerParams(
            # row axis carries the cross-TC parallelism on v7x when n is large
            dimension_semantics=("parallel",),
            vmem_limit_bytes=32 * 1024 * 1024),
    )(*args)
    # only the sliced views are ever consumed (padded rows/lanes hold garbage)
    return {nm: out[:n, off:off + od]
            for nm, off, od in zip(meta["names"], meta["lane_offs"],
                                   meta["out_dims"])}


def _gather_cat(x_h, topo_index, topo):
    # _prepare_symmetric_input glue: one gather + lane-concat per topo term.
    # Reversed / duplicated permutation copies are never materialized (they
    # live in the row-permuted W1 weights).
    idx = topo_index[topo]                                  # (k, Nt)
    g = x_h[idx]                                            # (k, Nt, D)
    return jnp.transpose(g, (1, 0, 2)).reshape(idx.shape[1], -1)


def make_forward(params_cfg, tanh_output, node_dim):
    """Build fused weights once; return a single jit'd forward callable."""
    fused_all, metas = {}, {}
    for topo, names in GROUPS:
        fused_all[topo], metas[topo] = prepare_group(
            topo, names, params_cfg, tanh_output, node_dim)

    @jax.jit
    def forward(x_h, topo_index, fused_all):
        params_out = {}
        for topo, _ in GROUPS:
            params_out.update(
                run_group(_gather_cat(x_h, topo_index, topo),
                          fused_all[topo], metas[topo]))
        return params_out

    return functools.partial(forward, fused_all=fused_all)


# ----------------------------- reference & init -----------------------------

def reference_forward(x_h, topo_index, params_cfg, tanh_output, node_dim):
    """Pure-JAX translation of the torch OutputLayer forward (exact division
    in the erf rational, per-perm post_mlp + sum + out_mlp per ParamTerm)."""
    def mlp(params, x):
        for i, (w, b) in enumerate(params):
            x = x @ w + b
            if i < len(params) - 1:
                x = _gelu(x, exact_recip=True)
        return x

    def perm_inputs(topo, xs):
        if topo == "ImproperTorsion":
            return [jnp.concatenate([xs[0], xs[j]], axis=-1) for j in (1, 2, 3)]
        cat = jnp.concatenate(list(xs), axis=-1)
        rev = jnp.concatenate(list(xs)[::-1], axis=-1)
        return [cat, rev]

    out = {}
    for name, (_, _od, topo) in PARAM_SHAPES.items():
        cfg = params_cfg[name]
        idx = topo_index[topo]
        xs = [x_h[idx[i]] for i in range(idx.shape[0])]
        if topo == "Atom":
            h = xs[0]
        else:
            h = sum(mlp(cfg["post"], xi) for xi in perm_inputs(topo, xs))
        y = mlp(cfg["out"], h)
        if tanh_output > 0.0:
            y = tanh_output * jnp.tanh(y)
        out[name] = y * cfg["std"] + cfg["mean"]
    return out


def init_mlp(key, in_dim, hidden, out_dim, num_layers):
    """torch_geometric-style MLP: channels = [in] + [hidden]*(L-1) + [out],
    GELU between layers, plain (no-activation) last layer, biases everywhere."""
    dims = [in_dim] + [hidden] * (num_layers - 1) + [out_dim]
    params = []
    for li in range(num_layers):
        kw, kb, key = jax.random.split(key, 3)
        w = (jax.random.normal(kw, (dims[li], dims[li + 1]), jnp.float32)
             / jnp.sqrt(float(dims[li])))
        b = jax.random.normal(kb, (1, dims[li + 1]), jnp.float32) * 0.01
        params.append((w, b))
    return params


if __name__ == "__main__":
    node_dim, edge_dim = 32, 16
    num_atoms = 10
    post_mlp_dims = (32, 32, 3)   # (hidden, out, num_layers)
    out_mlp_dims = (32, 3)        # (hidden, num_layers)
    tanh_output = 15.0

    key = jax.random.PRNGKey(0)
    kx, ke, k1, k2, k3, k4 = jax.random.split(key, 6)
    x_h = jax.random.normal(kx, (num_atoms, node_dim), jnp.float32)
    e_h = jax.random.normal(ke, (9, edge_dim), jnp.float32)  # unused, as in torch

    # graph topology indices: shape (nodes_per_term, num_term_instances)
    topo_index = {
        "Atom":            jnp.arange(num_atoms, dtype=jnp.int32)[None, :],
        "Bond":            jax.random.randint(k1, (2, 9), 0, num_atoms),
        "Angle":           jax.random.randint(k2, (3, 12), 0, num_atoms),
        "ProperTorsion":   jax.random.randint(k3, (4, 10), 0, num_atoms),
        "ImproperTorsion": jax.random.randint(k4, (4, 5), 0, num_atoms),
    }

    # per-ParamTerm MLP parameters (synthetic init, same scheme as torch MLP)
    params_cfg = {}
    for i, (name, (n_nodes, out_dim, topo)) in enumerate(PARAM_SHAPES.items()):
        pkey = jax.random.fold_in(jax.random.PRNGKey(42), i)
        k_post, k_out = jax.random.split(pkey)
        std, mean = STD_MEAN[name]
        if topo == "Atom":
            post_p, out_in = None, node_dim   # pmd[1] overridden, as in torch
        else:
            post_p = init_mlp(k_post, n_nodes * node_dim, post_mlp_dims[0],
                              post_mlp_dims[1], post_mlp_dims[2])
            out_in = post_mlp_dims[1]
        out_p = init_mlp(k_out, out_in, out_mlp_dims[0], out_dim,
                         out_mlp_dims[1])
        params_cfg[name] = dict(post=post_p, out=out_p, std=std, mean=mean,
                                out_dim=out_dim)

    # weight fusion happens exactly once, then one jit'd executable per call
    forward = make_forward(params_cfg, tanh_output, node_dim)
    params_out = forward(x_h, topo_index)
    for v in params_out.values():
        jax.block_until_ready(v)

    # shape checks: {ParamTerm: (num_term_instances, out_channels)}
    assert params_out["Charge"].shape == (num_atoms, 1)
    assert params_out["Bond_k"].shape == (9, 1)
    assert params_out["Angle_theta"].shape == (12, 1)
    assert params_out["ProperTorsion_k"].shape == (10, PROPERTORSION_TERMS)
    assert params_out["ImproperTorsion_k"].shape == (5, 1)

    # numeric check vs pure-JAX reference (loose tolerance: the kernel's erf
    # uses pl.reciprocal(approx=True); error normalized by each term's std)
    ref = reference_forward(x_h, topo_index, params_cfg, tanh_output, node_dim)
    max_err = 0.0
    for name in PARAM_SHAPES:
        err = float(jnp.max(jnp.abs(params_out[name] - ref[name])))
        max_err = max(max_err, err / STD_MEAN[name][0])
    assert max_err < 0.2, f"normalized max-abs error too large: {max_err}"

    print("KERNEL_OK")
</pallas_src>

<mosaic_0001>
module attributes {stable_mosaic.version = 11 : i64} {
  func.func @kernel(%arg0: i32, %arg1: memref<16x32xf32, #tpu.memory_space<vmem>>, %arg2: memref<32x96xf32, #tpu.memory_space<vmem>>, %arg3: memref<1x96xf32, #tpu.memory_space<vmem>>, %arg4: memref<96x96xf32, #tpu.memory_space<vmem>>, %arg5: memref<1x96xf32, #tpu.memory_space<vmem>>, %arg6: memref<96x128xf32, #tpu.memory_space<vmem>>, %arg7: memref<1x128xf32, #tpu.memory_space<vmem>>, %arg8: memref<1x128xf32, #tpu.memory_space<vmem>>, %arg9: memref<1x128xf32, #tpu.memory_space<vmem>>, %arg10: memref<16x128xf32, #tpu.memory_space<vmem>>) attributes {dimension_semantics = [#tpu.dimension_semantics<parallel>], iteration_bounds = array<i64: 1>, scalar_prefetch = 0 : i64, scratch_operands = 0 : i64, tpu.core_type = #tpu.core_type<tc>, window_params = [{transform_indices = @transform_0, window_bounds = array<i64: 16, 32>}, {pipeline_mode = #tpu.pipeline_mode<synchronous>, transform_indices = @transform_1, window_bounds = array<i64: 32, 96>}, {pipeline_mode = #tpu.pipeline_mode<synchronous>, transform_indices = @transform_2, window_bounds = array<i64: 1, 96>}, {pipeline_mode = #tpu.pipeline_mode<synchronous>, transform_indices = @transform_3, window_bounds = array<i64: 96, 96>}, {pipeline_mode = #tpu.pipeline_mode<synchronous>, transform_indices = @transform_4, window_bounds = array<i64: 1, 96>}, {pipeline_mode = #tpu.pipeline_mode<synchronous>, transform_indices = @transform_5, window_bounds = array<i64: 96, 128>}, {pipeline_mode = #tpu.pipeline_mode<synchronous>, transform_indices = @transform_6, window_bounds = array<i64: 1, 128>}, {pipeline_mode = #tpu.pipeline_mode<synchronous>, transform_indices = @transform_7, window_bounds = array<i64: 1, 128>}, {pipeline_mode = #tpu.pipeline_mode<synchronous>, transform_indices = @transform_8, window_bounds = array<i64: 1, 128>}, {transform_indices = @transform_9, window_bounds = array<i64: 16, 128>}]} {
    %c0 = arith.constant 0 : index
    %c0_0 = arith.constant 0 : index
    %0 = vector.load %arg1[%c0, %c0_0] : memref<16x32xf32, #tpu.memory_space<vmem>>, vector<16x32xf32>
    %c0_1 = arith.constant 0 : index
    %c0_2 = arith.constant 0 : index
    %1 = vector.load %arg2[%c0_1, %c0_2] : memref<32x96xf32, #tpu.memory_space<vmem>>, vector<32x96xf32>
    %cst = arith.constant dense<0.000000e+00> : vector<16x96xf32>
    %2 = tpu.matmul %0, %1, %cst {dimension_numbers = #tpu.dot_dimension_numbers<[1], [0], [0], [1], [0, 0, 1, 1], [], []>} : vector<16x32xf32>, vector<32x96xf32>, vector<16x96xf32> -> vector<16x96xf32>
    %c0_3 = arith.constant 0 : index
    %c0_4 = arith.constant 0 : index
    %3 = vector.load %arg3[%c0_3, %c0_4] : memref<1x96xf32, #tpu.memory_space<vmem>>, vector<1x96xf32>
    %4 = vector.broadcast %3 : vector<1x96xf32> to vector<16x96xf32>
    %5 = arith.addf %2, %4 : vector<16x96xf32>
    %cst_5 = arith.constant 5.000000e-01 : f32
    %6 = vector.broadcast %cst_5 : f32 to vector<16x96xf32>
    %7 = arith.mulf %6, %5 : vector<16x96xf32>
    %cst_6 = arith.constant 0.707106769 : f32
    %8 = vector.broadcast %cst_6 : f32 to vector<16x96xf32>
    %9 = arith.mulf %5, %8 : vector<16x96xf32>
    %cst_7 = arith.constant -4.000000e+00 : f32
    %cst_8 = arith.constant 4.000000e+00 : f32
    %10 = vector.broadcast %cst_7 : f32 to vector<16x96xf32>
    %11 = arith.maximumf %10, %9 : vector<16x96xf32>
    %12 = vector.broadcast %cst_8 : f32 to vector<16x96xf32>
    %13 = arith.minimumf %12, %11 : vector<16x96xf32>
    %14 = arith.mulf %13, %13 : vector<16x96xf32>
    %cst_9 = arith.constant 2.29050653E-4 : f32
    %15 = vector.broadcast %cst_9 : f32 to vector<16x96xf32>
    %16 = arith.mulf %15, %14 : vector<16x96xf32>
    %cst_10 = arith.constant 0.00340829091 : f32
    %17 = vector.broadcast %cst_10 : f32 to vector<16x96xf32>
    %18 = arith.addf %16, %17 : vector<16x96xf32>
    %19 = arith.mulf %18, %14 : vector<16x96xf32>
    %cst_11 = arith.constant 0.0509556942 : f32
    %20 = vector.broadcast %cst_11 : f32 to vector<16x96xf32>
    %21 = arith.addf %19, %20 : vector<16x96xf32>
    %22 = arith.mulf %21, %14 : vector<16x96xf32>
    %cst_12 = arith.constant 0.185208321 : f32
    %23 = vector.broadcast %cst_12 : f32 to vector<16x96xf32>
    %24 = arith.addf %22, %23 : vector<16x96xf32>
    %25 = arith.mulf %24, %14 : vector<16x96xf32>
    %cst_13 = arith.constant 1.12837911 : f32
    %26 = vector.broadcast %cst_13 : f32 to vector<16x96xf32>
    %27 = arith.addf %25, %26 : vector<16x96xf32>
    %cst_14 = arith.constant -1.17916031E-7 : f32
    %28 = vector.broadcast %cst_14 : f32 to vector<16x96xf32>
    %29 = arith.mulf %28, %14 : vector<16x96xf32>
    %cst_15 = arith.constant 2.35479656E-5 : f32
    %30 = vector.broadcast %cst_15 : f32 to vector<16x96xf32>
    %31 = arith.addf %29, %30 : vector<16x96xf32>
    %32 = arith.mulf %31, %14 : vector<16x96xf32>
    %cst_16 = arith.constant 0.00101796258 : f32
    %33 = vector.broadcast %cst_16 : f32 to vector<16x96xf32>
    %34 = arith.addf %32, %33 : vector<16x96xf32>
    %35 = arith.mulf %34, %14 : vector<16x96xf32>
    %cst_17 = arith.constant 0.0140704699 : f32
    %36 = vector.broadcast %cst_17 : f32 to vector<16x96xf32>
    %37 = arith.addf %35, %36 : vector<16x96xf32>
    %38 = arith.mulf %37, %14 : vector<16x96xf32>
    %cst_18 = arith.constant 0.110985048 : f32
    %39 = vector.broadcast %cst_18 : f32 to vector<16x96xf32>
    %40 = arith.addf %38, %39 : vector<16x96xf32>
    %41 = arith.mulf %40, %14 : vector<16x96xf32>
    %cst_19 = arith.constant 0.497469246 : f32
    %42 = vector.broadcast %cst_19 : f32 to vector<16x96xf32>
    %43 = arith.addf %41, %42 : vector<16x96xf32>
    %44 = arith.mulf %43, %14 : vector<16x96xf32>
    %cst_20 = arith.constant 1.000000e+00 : f32
    %45 = vector.broadcast %cst_20 : f32 to vector<16x96xf32>
    %46 = arith.addf %44, %45 : vector<16x96xf32>
    %47 = arith.mulf %13, %27 : vector<16x96xf32>
    %48 = tpu.reciprocal %46 {approx = true} : vector<16x96xf32> -> vector<16x96xf32>
    %49 = arith.mulf %47, %48 : vector<16x96xf32>
    %cst_21 = arith.constant 1.000000e+00 : f32
    %50 = vector.broadcast %cst_21 : f32 to vector<16x96xf32>
    %51 = arith.addf %50, %49 : vector<16x96xf32>
    %52 = arith.mulf %7, %51 : vector<16x96xf32>
    %c0_22 = arith.constant 0 : index
    %c0_23 = arith.constant 0 : index
    %53 = vector.load %arg4[%c0_22, %c0_23] : memref<96x96xf32, #tpu.memory_space<vmem>>, vector<96x96xf32>
    %cst_24 = arith.constant dense<0.000000e+00> : vector<16x96xf32>
    %54 = tpu.matmul %52, %53, %cst_24 {dimension_numbers = #tpu.dot_dimension_numbers<[1], [0], [0], [1], [0, 0, 1, 1], [], []>} : vector<16x96xf32>, vector<96x96xf32>, vector<16x96xf32> -> vector<16x96xf32>
    %c0_25 = arith.constant 0 : index
    %c0_26 = arith.constant 0 : index
    %55 = vector.load %arg5[%c0_25, %c0_26] : memref<1x96xf32, #tpu.memory_space<vmem>>, vector<1x96xf32>
    %56 = vector.broadcast %55 : vector<1x96xf32> to vector<16x96xf32>
    %57 = arith.addf %54, %56 : vector<16x96xf32>
    %cst_27 = arith.constant 5.000000e-01 : f32
    %58 = vector.broadcast %cst_27 : f32 to vector<16x96xf32>
    %59 = arith.mulf %58, %57 : vector<16x96xf32>
    %cst_28 = arith.constant 0.707106769 : f32
    %60 = vector.broadcast %cst_28 : f32 to vector<16x96xf32>
    %61 = arith.mulf %57, %60 : vector<16x96xf32>
    %cst_29 = arith.constant -4.000000e+00 : f32
    %cst_30 = arith.constant 4.000000e+00 : f32
    %62 = vector.broadcast %cst_29 : f32 to vector<16x96xf32>
    %63 = arith.maximumf %62, %61 : vector<16x96xf32>
    %64 = vector.broadcast %cst_30 : f32 to vector<16x96xf32>
    %65 = arith.minimumf %64, %63 : vector<16x96xf32>
    %66 = arith.mulf %65, %65 : vector<16x96xf32>
    %cst_31 = arith.constant 2.29050653E-4 : f32
    %67 = vector.broadcast %cst_31 : f32 to vector<16x96xf32>
    %68 = arith.mulf %67, %66 : vector<16x96xf32>
    %cst_32 = arith.constant 0.00340829091 : f32
    %69 = vector.broadcast %cst_32 : f32 to vector<16x96xf32>
    %70 = arith.addf %68, %69 : vector<16x96xf32>
    %71 = arith.mulf %70, %66 : vector<16x96xf32>
    %cst_33 = arith.constant 0.0509556942 : f32
    %72 = vector.broadcast %cst_33 : f32 to vector<16x96xf32>
    %73 = arith.addf %71, %72 : vector<16x96xf32>
    %74 = arith.mulf %73, %66 : vector<16x96xf32>
    %cst_34 = arith.constant 0.185208321 : f32
    %75 = vector.broadcast %cst_34 : f32 to vector<16x96xf32>
    %76 = arith.addf %74, %75 : vector<16x96xf32>
    %77 = arith.mulf %76, %66 : vector<16x96xf32>
    %cst_35 = arith.constant 1.12837911 : f32
    %78 = vector.broadcast %cst_35 : f32 to vector<16x96xf32>
    %79 = arith.addf %77, %78 : vector<16x96xf32>
    %cst_36 = arith.constant -1.17916031E-7 : f32
    %80 = vector.broadcast %cst_36 : f32 to vector<16x96xf32>
    %81 = arith.mulf %80, %66 : vector<16x96xf32>
    %cst_37 = arith.constant 2.35479656E-5 : f32
    %82 = vector.broadcast %cst_37 : f32 to vector<16x96xf32>
    %83 = arith.addf %81, %82 : vector<16x96xf32>
    %84 = arith.mulf %83, %66 : vector<16x96xf32>
    %cst_38 = arith.constant 0.00101796258 : f32
    %85 = vector.broadcast %cst_38 : f32 to vector<16x96xf32>
    %86 = arith.addf %84, %85 : vector<16x96xf32>
    %87 = arith.mulf %86, %66 : vector<16x96xf32>
    %cst_39 = arith.constant 0.0140704699 : f32
    %88 = vector.broadcast %cst_39 : f32 to vector<16x96xf32>
    %89 = arith.addf %87, %88 : vector<16x96xf32>
    %90 = arith.mulf %89, %66 : vector<16x96xf32>
    %cst_40 = arith.constant 0.110985048 : f32
    %91 = vector.broadcast %cst_40 : f32 to vector<16x96xf32>
    %92 = arith.addf %90, %91 : vector<16x96xf32>
    %93 = arith.mulf %92, %66 : vector<16x96xf32>
    %cst_41 = arith.constant 0.497469246 : f32
    %94 = vector.broadcast %cst_41 : f32 to vector<16x96xf32>
    %95 = arith.addf %93, %94 : vector<16x96xf32>
    %96 = arith.mulf %95, %66 : vector<16x96xf32>
    %cst_42 = arith.constant 1.000000e+00 : f32
    %97 = vector.broadcast %cst_42 : f32 to vector<16x96xf32>
    %98 = arith.addf %96, %97 : vector<16x96xf32>
    %99 = arith.mulf %65, %79 : vector<16x96xf32>
    %100 = tpu.reciprocal %98 {approx = true} : vector<16x96xf32> -> vector<16x96xf32>
    %101 = arith.mulf %99, %100 : vector<16x96xf32>
    %cst_43 = arith.constant 1.000000e+00 : f32
    %102 = vector.broadcast %cst_43 : f32 to vector<16x96xf32>
    %103 = arith.addf %102, %101 : vector<16x96xf32>
    %104 = arith.mulf %59, %103 : vector<16x96xf32>
    %c0_44 = arith.constant 0 : index
    %c0_45 = arith.constant 0 : index
    %105 = vector.load %arg6[%c0_44, %c0_45] : memref<96x128xf32, #tpu.memory_space<vmem>>, vector<96x128xf32>
    %cst_46 = arith.constant dense<0.000000e+00> : vector<16x128xf32>
    %106 = tpu.matmul %104, %105, %cst_46 {dimension_numbers = #tpu.dot_dimension_numbers<[1], [0], [0], [1], [0, 0, 1, 1], [], []>} : vector<16x96xf32>, vector<96x128xf32>, vector<16x128xf32> -> vector<16x128xf32>
    %c0_47 = arith.constant 0 : index
    %c0_48 = arith.constant 0 : index
    %107 = vector.load %arg7[%c0_47, %c0_48] : memref<1x128xf32, #tpu.memory_space<vmem>>, vector<1x128xf32>
    %108 = vector.broadcast %107 : vector<1x128xf32> to vector<16x128xf32>
    %109 = arith.addf %106, %108 : vector<16x128xf32>
    %110 = math.tanh %109 : vector<16x128xf32>
    %c0_49 = arith.constant 0 : index
    %c0_50 = arith.constant 0 : index
    %111 = vector.load %arg8[%c0_49, %c0_50] : memref<1x128xf32, #tpu.memory_space<vmem>>, vector<1x128xf32>
    %112 = vector.broadcast %111 : vector<1x128xf32> to vector<16x128xf32>
    %113 = arith.mulf %110, %112 : vector<16x128xf32>
    %c0_51 = arith.constant 0 : index
    %c0_52 = arith.constant 0 : index
    %114 = vector.load %arg9[%c0_51, %c0_52] : memref<1x128xf32, #tpu.memory_space<vmem>>, vector<1x128xf32>
    %115 = vector.broadcast %114 : vector<1x128xf32> to vector<16x128xf32>
    %116 = arith.addf %113, %115 : vector<16x128xf32>
    %c0_53 = arith.constant 0 : index
    %c0_54 = arith.constant 0 : index
    %117 = vector.load %arg10[%c0_53, %c0_54] : memref<16x128xf32, #tpu.memory_space<vmem>>, vector<16x128xf32>
    tpu.vector_store %arg10[%c0_53, %c0_54], %116 {strides = array<i32>} : memref<16x128xf32, #tpu.memory_space<vmem>>, vector<16x128xf32>,
    return
  }
  func.func @transform_0(%arg0: i32) -> (i32, i32) {
    %c0_i32 = arith.constant 0 : i32
    %c0_i32_0 = arith.constant 0 : i32
    return %arg0, %c0_i32 : i32, i32
  }
  func.func @transform_1(%arg0: i32) -> (i32, i32) {
    %c0_i32 = arith.constant 0 : i32
    %c0_i32_0 = arith.constant 0 : i32
    %c0_i32_1 = arith.constant 0 : i32
    return %c0_i32, %c0_i32_0 : i32, i32
  }
  func.func @transform_2(%arg0: i32) -> (i32, i32) {
    %c0_i32 = arith.constant 0 : i32
    %c0_i32_0 = arith.constant 0 : i32
    %c0_i32_1 = arith.constant 0 : i32
    return %c0_i32, %c0_i32_0 : i32, i32
  }
  func.func @transform_3(%arg0: i32) -> (i32, i32) {
    %c0_i32 = arith.constant 0 : i32
    %c0_i32_0 = arith.constant 0 : i32
    %c0_i32_1 = arith.constant 0 : i32
    return %c0_i32, %c0_i32_0 : i32, i32
  }
  func.func @transform_4(%arg0: i32) -> (i32, i32) {
    %c0_i32 = arith.constant 0 : i32
    %c0_i32_0 = arith.constant 0 : i32
    %c0_i32_1 = arith.constant 0 : i32
    return %c0_i32, %c0_i32_0 : i32, i32
  }
  func.func @transform_5(%arg0: i32) -> (i32, i32) {
    %c0_i32 = arith.constant 0 : i32
    %c0_i32_0 = arith.constant 0 : i32
    %c0_i32_1 = arith.constant 0 : i32
    return %c0_i32, %c0_i32_0 : i32, i32
  }
  func.func @transform_6(%arg0: i32) -> (i32, i32) {
    %c0_i32 = arith.constant 0 : i32
    %c0_i32_0 = arith.constant 0 : i32
    %c0_i32_1 = arith.constant 0 : i32
    return %c0_i32, %c0_i32_0 : i32, i32
  }
  func.func @transform_7(%arg0: i32) -> (i32, i32) {
    %c0_i32 = arith.constant 0 : i32
    %c0_i32_0 = arith.constant 0 : i32
    %c0_i32_1 = arith.constant 0 : i32
    return %c0_i32, %c0_i32_0 : i32, i32
  }
  func.func @transform_8(%arg0: i32) -> (i32, i32) {
    %c0_i32 = arith.constant 0 : i32
    %c0_i32_0 = arith.constant 0 : i32
    %c0_i32_1 = arith.constant 0 : i32
    return %c0_i32, %c0_i32_0 : i32, i32
  }
  func.func @transform_9(%arg0: i32) -> (i32, i32) {
    %c0_i32 = arith.constant 0 : i32
    %c0_i32_0 = arith.constant 0 : i32
    return %arg0, %c0_i32 : i32, i32
  }
}

module attributes {stable_mosaic.version = 11 : i64} {
  func.func @kernel(%arg0: i32, %arg1: memref<16x96xf32, #tpu.memory_space<vmem>>, %arg2: memref<96x128xf32, #tpu.memory_space<vmem>>, %arg3: memref<1x128xf32, #tpu.memory_space<vmem>>, %arg4: memref<128x128xf32, #tpu.memory_space<vmem>>, %arg5: memref<1x128xf32, #tpu.memory_space<vmem>>, %arg6: memref<128x128xf32, #tpu.memory_space<vmem>>, %arg7: memref<1x128xf32, #tpu.memory_space<vmem>>, %arg8: memref<128x64xf32, #tpu.memory_space<vmem>>, %arg9: memref<1x64xf32, #tpu.memory_space<vmem>>, %arg10: memref<64x64xf32, #tpu.memory_space<vmem>>, %arg11: memref<1x64xf32, #tpu.memory_space<vmem>>, %arg12: memref<64x128xf32, #tpu.memory_space<vmem>>, %arg13: memref<1x128xf32, #tpu.memory_space<vmem>>, %arg14: memref<1x128xf32, #tpu.memory_space<vmem>>, %arg15: memref<1x128xf32, #tpu.memory_space<vmem>>, %arg16: memref<16x128xf32, #tpu.memory_space<vmem>>) attributes {dimension_semantics = [#tpu.dimension_semantics<parallel>], iteration_bounds = array<i64: 1>, scalar_prefetch = 0 : i64, scratch_operands = 0 : i64, tpu.core_type = #tpu.core_type<tc>, window_params = [{transform_indices = @transform_0, window_bounds = array<i64: 16, 96>}, {pipeline_mode = #tpu.pipeline_mode<synchronous>, transform_indices = @transform_1, window_bounds = array<i64: 96, 128>}, {pipeline_mode = #tpu.pipeline_mode<synchronous>, transform_indices = @transform_2, window_bounds = array<i64: 1, 128>}, {pipeline_mode = #tpu.pipeline_mode<synchronous>, transform_indices = @transform_3, window_bounds = array<i64: 128, 128>}, {pipeline_mode = #tpu.pipeline_mode<synchronous>, transform_indices = @transform_4, window_bounds = array<i64: 1, 128>}, {pipeline_mode = #tpu.pipeline_mode<synchronous>, transform_indices = @transform_5, window_bounds = array<i64: 128, 128>}, {pipeline_mode = #tpu.pipeline_mode<synchronous>, transform_indices = @transform_6, window_bounds = array<i64: 1, 128>}, {pipeline_mode = #tpu.pipeline_mode<synchronous>, transform_indices = @transform_7, window_bounds = array<i64: 128, 64>}, {pipeline_mode = #tpu.pipeline_mode<synchronous>, transform_indices = @transform_8, window_bounds = array<i64: 1, 64>}, {pipeline_mode = #tpu.pipeline_mode<synchronous>, transform_indices = @transform_9, window_bounds = array<i64: 64, 64>}, {pipeline_mode = #tpu.pipeline_mode<synchronous>, transform_indices = @transform_10, window_bounds = array<i64: 1, 64>}, {pipeline_mode = #tpu.pipeline_mode<synchronous>, transform_indices = @transform_11, window_bounds = array<i64: 64, 128>}, {pipeline_mode = #tpu.pipeline_mode<synchronous>, transform_indices = @transform_12, window_bounds = array<i64: 1, 128>}, {pipeline_mode = #tpu.pipeline_mode<synchronous>, transform_indices = @transform_13, window_bounds = array<i64: 1, 128>}, {pipeline_mode = #tpu.pipeline_mode<synchronous>, transform_indices = @transform_14, window_bounds = array<i64: 1, 128>}, {transform_indices = @transform_15, window_bounds = array<i64: 16, 128>}]} {
    %c0 = arith.constant 0 : index
    %c0_0 = arith.constant 0 : index
    %0 = vector.load %arg1[%c0, %c0_0] : memref<16x96xf32, #tpu.memory_space<vmem>>, vector<16x96xf32>
    %c0_1 = arith.constant 0 : index
    %c0_2 = arith.constant 0 : index
    %1 = vector.load %arg2[%c0_1, %c0_2] : memref<96x128xf32, #tpu.memory_space<vmem>>, vector<96x128xf32>
    %cst = arith.constant dense<0.000000e+00> : vector<16x128xf32>
    %2 = tpu.matmul %0, %1, %cst {dimension_numbers = #tpu.dot_dimension_numbers<[1], [0], [0], [1], [0, 0, 1, 1], [], []>} : vector<16x96xf32>, vector<96x128xf32>, vector<16x128xf32> -> vector<16x128xf32>
    %c0_3 = arith.constant 0 : index
    %c0_4 = arith.constant 0 : index
    %3 = vector.load %arg3[%c0_3, %c0_4] : memref<1x128xf32, #tpu.memory_space<vmem>>, vector<1x128xf32>
    %4 = vector.broadcast %3 : vector<1x128xf32> to vector<16x128xf32>
    %5 = arith.addf %2, %4 : vector<16x128xf32>
    %cst_5 = arith.constant 5.000000e-01 : f32
    %6 = vector.broadcast %cst_5 : f32 to vector<16x128xf32>
    %7 = arith.mulf %6, %5 : vector<16x128xf32>
    %cst_6 = arith.constant 0.707106769 : f32
    %8 = vector.broadcast %cst_6 : f32 to vector<16x128xf32>
    %9 = arith.mulf %5, %8 : vector<16x128xf32>
    %cst_7 = arith.constant -4.000000e+00 : f32
    %cst_8 = arith.constant 4.000000e+00 : f32
    %10 = vector.broadcast %cst_7 : f32 to vector<16x128xf32>
    %11 = arith.maximumf %10, %9 : vector<16x128xf32>
    %12 = vector.broadcast %cst_8 : f32 to vector<16x128xf32>
    %13 = arith.minimumf %12, %11 : vector<16x128xf32>
    %14 = arith.mulf %13, %13 : vector<16x128xf32>
    %cst_9 = arith.constant 2.29050653E-4 : f32
    %15 = vector.broadcast %cst_9 : f32 to vector<16x128xf32>
    %16 = arith.mulf %15, %14 : vector<16x128xf32>
    %cst_10 = arith.constant 0.00340829091 : f32
    %17 = vector.broadcast %cst_10 : f32 to vector<16x128xf32>
    %18 = arith.addf %16, %17 : vector<16x128xf32>
    %19 = arith.mulf %18, %14 : vector<16x128xf32>
    %cst_11 = arith.constant 0.0509556942 : f32
    %20 = vector.broadcast %cst_11 : f32 to vector<16x128xf32>
    %21 = arith.addf %19, %20 : vector<16x128xf32>
    %22 = arith.mulf %21, %14 : vector<16x128xf32>
    %cst_12 = arith.constant 0.185208321 : f32
    %23 = vector.broadcast %cst_12 : f32 to vector<16x128xf32>
    %24 = arith.addf %22, %23 : vector<16x128xf32>
    %25 = arith.mulf %24, %14 : vector<16x128xf32>
    %cst_13 = arith.constant 1.12837911 : f32
    %26 = vector.broadcast %cst_13 : f32 to vector<16x128xf32>
    %27 = arith.addf %25, %26 : vector<16x128xf32>
    %cst_14 = arith.constant -1.17916031E-7 : f32
    %28 = vector.broadcast %cst_14 : f32 to vector<16x128xf32>
    %29 = arith.mulf %28, %14 : vector<16x128xf32>
    %cst_15 = arith.constant 2.35479656E-5 : f32
    %30 = vector.broadcast %cst_15 : f32 to vector<16x128xf32>
    %31 = arith.addf %29, %30 : vector<16x128xf32>
    %32 = arith.mulf %31, %14 : vector<16x128xf32>
    %cst_16 = arith.constant 0.00101796258 : f32
    %33 = vector.broadcast %cst_16 : f32 to vector<16x128xf32>
    %34 = arith.addf %32, %33 : vector<16x128xf32>
    %35 = arith.mulf %34, %14 : vector<16x128xf32>
    %cst_17 = arith.constant 0.0140704699 : f32
    %36 = vector.broadcast %cst_17 : f32 to vector<16x128xf32>
    %37 = arith.addf %35, %36 : vector<16x128xf32>
    %38 = arith.mulf %37, %14 : vector<16x128xf32>
    %cst_18 = arith.constant 0.110985048 : f32
    %39 = vector.broadcast %cst_18 : f32 to vector<16x128xf32>
    %40 = arith.addf %38, %39 : vector<16x128xf32>
    %41 = arith.mulf %40, %14 : vector<16x128xf32>
    %cst_19 = arith.constant 0.497469246 : f32
    %42 = vector.broadcast %cst_19 : f32 to vector<16x128xf32>
    %43 = arith.addf %41, %42 : vector<16x128xf32>
    %44 = arith.mulf %43, %14 : vector<16x128xf32>
    %cst_20 = arith.constant 1.000000e+00 : f32
    %45 = vector.broadcast %cst_20 : f32 to vector<16x128xf32>
    %46 = arith.addf %44, %45 : vector<16x128xf32>
    %47 = arith.mulf %13, %27 : vector<16x128xf32>
    %48 = tpu.reciprocal %46 {approx = true} : vector<16x128xf32> -> vector<16x128xf32>
    %49 = arith.mulf %47, %48 : vector<16x128xf32>
    %cst_21 = arith.constant 1.000000e+00 : f32
    %50 = vector.broadcast %cst_21 : f32 to vector<16x128xf32>
    %51 = arith.addf %50, %49 : vector<16x128xf32>
    %52 = arith.mulf %7, %51 : vector<16x128xf32>
    %c0_22 = arith.constant 0 : index
    %c0_23 = arith.constant 0 : index
    %53 = vector.load %arg4[%c0_22, %c0_23] : memref<128x128xf32, #tpu.memory_space<vmem>>, vector<128x128xf32>
    %cst_24 = arith.constant dense<0.000000e+00> : vector<16x128xf32>
    %54 = tpu.matmul %52, %53, %cst_24 {dimension_numbers = #tpu.dot_dimension_numbers<[1], [0], [0], [1], [0, 0, 1, 1], [], []>} : vector<16x128xf32>, vector<128x128xf32>, vector<16x128xf32> -> vector<16x128xf32>
    %c0_25 = arith.constant 0 : index
    %c0_26 = arith.constant 0 : index
    %55 = vector.load %arg5[%c0_25, %c0_26] : memref<1x128xf32, #tpu.memory_space<vmem>>, vector<1x128xf32>
    %56 = vector.broadcast %55 : vector<1x128xf32> to vector<16x128xf32>
    %57 = arith.addf %54, %56 : vector<16x128xf32>
    %cst_27 = arith.constant 5.000000e-01 : f32
    %58 = vector.broadcast %cst_27 : f32 to vector<16x128xf32>
    %59 = arith.mulf %58, %57 : vector<16x128xf32>
    %cst_28 = arith.constant 0.707106769 : f32
    %60 = vector.broadcast %cst_28 : f32 to vector<16x128xf32>
    %61 = arith.mulf %57, %60 : vector<16x128xf32>
    %cst_29 = arith.constant -4.000000e+00 : f32
    %cst_30 = arith.constant 4.000000e+00 : f32
    %62 = vector.broadcast %cst_29 : f32 to vector<16x128xf32>
    %63 = arith.maximumf %62, %61 : vector<16x128xf32>
    %64 = vector.broadcast %cst_30 : f32 to vector<16x128xf32>
    %65 = arith.minimumf %64, %63 : vector<16x128xf32>
    %66 = arith.mulf %65, %65 : vector<16x128xf32>
    %cst_31 = arith.constant 2.29050653E-4 : f32
    %67 = vector.broadcast %cst_31 : f32 to vector<16x128xf32>
    %68 = arith.mulf %67, %66 : vector<16x128xf32>
    %cst_32 = arith.constant 0.00340829091 : f32
    %69 = vector.broadcast %cst_32 : f32 to vector<16x128xf32>
    %70 = arith.addf %68, %69 : vector<16x128xf32>
    %71 = arith.mulf %70, %66 : vector<16x128xf32>
    %cst_33 = arith.constant 0.0509556942 : f32
    %72 = vector.broadcast %cst_33 : f32 to vector<16x128xf32>
    %73 = arith.addf %71, %72 : vector<16x128xf32>
    %74 = arith.mulf %73, %66 : vector<16x128xf32>
    %cst_34 = arith.constant 0.185208321 : f32
    %75 = vector.broadcast %cst_34 : f32 to vector<16x128xf32>
    %76 = arith.addf %74, %75 : vector<16x128xf32>
    %77 = arith.mulf %76, %66 : vector<16x128xf32>
    %cst_35 = arith.constant 1.12837911 : f32
    %78 = vector.broadcast %cst_35 : f32 to vector<16x128xf32>
    %79 = arith.addf %77, %78 : vector<16x128xf32>
    %cst_36 = arith.constant -1.17916031E-7 : f32
    %80 = vector.broadcast %cst_36 : f32 to vector<16x128xf32>
    %81 = arith.mulf %80, %66 : vector<16x128xf32>
    %cst_37 = arith.constant 2.35479656E-5 : f32
    %82 = vector.broadcast %cst_37 : f32 to vector<16x128xf32>
    %83 = arith.addf %81, %82 : vector<16x128xf32>
    %84 = arith.mulf %83, %66 : vector<16x128xf32>
    %cst_38 = arith.constant 0.00101796258 : f32
    %85 = vector.broadcast %cst_38 : f32 to vector<16x128xf32>
    %86 = arith.addf %84, %85 : vector<16x128xf32>
    %87 = arith.mulf %86, %66 : vector<16x128xf32>
    %cst_39 = arith.constant 0.0140704699 : f32
    %88 = vector.broadcast %cst_39 : f32 to vector<16x128xf32>
    %89 = arith.addf %87, %88 : vector<16x128xf32>
    %90 = arith.mulf %89, %66 : vector<16x128xf32>
    %cst_40 = arith.constant 0.110985048 : f32
    %91 = vector.broadcast %cst_40 : f32 to vector<16x128xf32>
    %92 = arith.addf %90, %91 : vector<16x128xf32>
    %93 = arith.mulf %92, %66 : vector<16x128xf32>
    %cst_41 = arith.constant 0.497469246 : f32
    %94 = vector.broadcast %cst_41 : f32 to vector<16x128xf32>
    %95 = arith.addf %93, %94 : vector<16x128xf32>
    %96 = arith.mulf %95, %66 : vector<16x128xf32>
    %cst_42 = arith.constant 1.000000e+00 : f32
    %97 = vector.broadcast %cst_42 : f32 to vector<16x128xf32>
    %98 = arith.addf %96, %97 : vector<16x128xf32>
    %99 = arith.mulf %65, %79 : vector<16x128xf32>
    %100 = tpu.reciprocal %98 {approx = true} : vector<16x128xf32> -> vector<16x128xf32>
    %101 = arith.mulf %99, %100 : vector<16x128xf32>
    %cst_43 = arith.constant 1.000000e+00 : f32
    %102 = vector.broadcast %cst_43 : f32 to vector<16x128xf32>
    %103 = arith.addf %102, %101 : vector<16x128xf32>
    %104 = arith.mulf %59, %103 : vector<16x128xf32>
    %c0_44 = arith.constant 0 : index
    %c0_45 = arith.constant 0 : index
    %105 = vector.load %arg6[%c0_44, %c0_45] : memref<128x128xf32, #tpu.memory_space<vmem>>, vector<128x128xf32>
    %cst_46 = arith.constant dense<0.000000e+00> : vector<16x128xf32>
    %106 = tpu.matmul %104, %105, %cst_46 {dimension_numbers = #tpu.dot_dimension_numbers<[1], [0], [0], [1], [0, 0, 1, 1], [], []>} : vector<16x128xf32>, vector<128x128xf32>, vector<16x128xf32> -> vector<16x128xf32>
    %c0_47 = arith.constant 0 : index
    %c0_48 = arith.constant 0 : index
    %107 = vector.load %arg7[%c0_47, %c0_48] : memref<1x128xf32, #tpu.memory_space<vmem>>, vector<1x128xf32>
    %108 = vector.broadcast %107 : vector<1x128xf32> to vector<16x128xf32>
    %109 = arith.addf %106, %108 : vector<16x128xf32>
    %c0_49 = arith.constant 0 : index
    %c0_50 = arith.constant 0 : index
    %110 = vector.load %arg8[%c0_49, %c0_50] : memref<128x64xf32, #tpu.memory_space<vmem>>, vector<128x64xf32>
    %cst_51 = arith.constant dense<0.000000e+00> : vector<16x64xf32>
    %111 = tpu.matmul %109, %110, %cst_51 {dimension_numbers = #tpu.dot_dimension_numbers<[1], [0], [0], [1], [0, 0, 1, 1], [], []>} : vector<16x128xf32>, vector<128x64xf32>, vector<16x64xf32> -> vector<16x64xf32>
    %c0_52 = arith.constant 0 : index
    %c0_53 = arith.constant 0 : index
    %112 = vector.load %arg9[%c0_52, %c0_53] : memref<1x64xf32, #tpu.memory_space<vmem>>, vector<1x64xf32>
    %113 = vector.broadcast %112 : vector<1x64xf32> to vector<16x64xf32>
    %114 = arith.addf %111, %113 : vector<16x64xf32>
    %cst_54 = arith.constant 5.000000e-01 : f32
    %115 = vector.broadcast %cst_54 : f32 to vector<16x64xf32>
    %116 = arith.mulf %115, %114 : vector<16x64xf32>
    %cst_55 = arith.constant 0.707106769 : f32
    %117 = vector.broadcast %cst_55 : f32 to vector<16x64xf32>
    %118 = arith.mulf %114, %117 : vector<16x64xf32>
    %cst_56 = arith.constant -4.000000e+00 : f32
    %cst_57 = arith.constant 4.000000e+00 : f32
    %119 = vector.broadcast %cst_56 : f32 to vector<16x64xf32>
    %120 = arith.maximumf %119, %118 : vector<16x64xf32>
    %121 = vector.broadcast %cst_57 : f32 to vector<16x64xf32>
    %122 = arith.minimumf %121, %120 : vector<16x64xf32>
    %123 = arith.mulf %122, %122 : vector<16x64xf32>
    %cst_58 = arith.constant 2.29050653E-4 : f32
    %124 = vector.broadcast %cst_58 : f32 to vector<16x64xf32>
    %125 = arith.mulf %124, %123 : vector<16x64xf32>
    %cst_59 = arith.constant 0.00340829091 : f32
    %126 = vector.broadcast %cst_59 : f32 to vector<16x64xf32>
    %127 = arith.addf %125, %126 : vector<16x64xf32>
    %128 = arith.mulf %127, %123 : vector<16x64xf32>
    %cst_60 = arith.constant 0.0509556942 : f32
    %129 = vector.broadcast %cst_60 : f32 to vector<16x64xf32>
    %130 = arith.addf %128, %129 : vector<16x64xf32>
    %131 = arith.mulf %130, %123 : vector<16x64xf32>
    %cst_61 = arith.constant 0.185208321 : f32
    %132 = vector.broadcast %cst_61 : f32 to vector<16x64xf32>
    %133 = arith.addf %131, %132 : vector<16x64xf32>
    %134 = arith.mulf %133, %123 : vector<16x64xf32>
    %cst_62 = arith.constant 1.12837911 : f32
    %135 = vector.broadcast %cst_62 : f32 to vector<16x64xf32>
    %136 = arith.addf %134, %135 : vector<16x64xf32>
    %cst_63 = arith.constant -1.17916031E-7 : f32
    %137 = vector.broadcast %cst_63 : f32 to vector<16x64xf32>
    %138 = arith.mulf %137, %123 : vector<16x64xf32>
    %cst_64 = arith.constant 2.35479656E-5 : f32
    %139 = vector.broadcast %cst_64 : f32 to vector<16x64xf32>
    %140 = arith.addf %138, %139 : vector<16x64xf32>
    %141 = arith.mulf %140, %123 : vector<16x64xf32>
    %cst_65 = arith.constant 0.00101796258 : f32
    %142 = vector.broadcast %cst_65 : f32 to vector<16x64xf32>
    %143 = arith.addf %141, %142 : vector<16x64xf32>
    %144 = arith.mulf %143, %123 : vector<16x64xf32>
    %cst_66 = arith.constant 0.0140704699 : f32
    %145 = vector.broadcast %cst_66 : f32 to vector<16x64xf32>
    %146 = arith.addf %144, %145 : vector<16x64xf32>
    %147 = arith.mulf %146, %123 : vector<16x64xf32>
    %cst_67 = arith.constant 0.110985048 : f32
    %148 = vector.broadcast %cst_67 : f32 to vector<16x64xf32>
    %149 = arith.addf %147, %148 : vector<16x64xf32>
    %150 = arith.mulf %149, %123 : vector<16x64xf32>
    %cst_68 = arith.constant 0.497469246 : f32
    %151 = vector.broadcast %cst_68 : f32 to vector<16x64xf32>
    %152 = arith.addf %150, %151 : vector<16x64xf32>
    %153 = arith.mulf %152, %123 : vector<16x64xf32>
    %cst_69 = arith.constant 1.000000e+00 : f32
    %154 = vector.broadcast %cst_69 : f32 to vector<16x64xf32>
    %155 = arith.addf %153, %154 : vector<16x64xf32>
    %156 = arith.mulf %122, %136 : vector<16x64xf32>
    %157 = tpu.reciprocal %155 {approx = true} : vector<16x64xf32> -> vector<16x64xf32>
    %158 = arith.mulf %156, %157 : vector<16x64xf32>
    %cst_70 = arith.constant 1.000000e+00 : f32
    %159 = vector.broadcast %cst_70 : f32 to vector<16x64xf32>
    %160 = arith.addf %159, %158 : vector<16x64xf32>
    %161 = arith.mulf %116, %160 : vector<16x64xf32>
    %c0_71 = arith.constant 0 : index
    %c0_72 = arith.constant 0 : index
    %162 = vector.load %arg10[%c0_71, %c0_72] : memref<64x64xf32, #tpu.memory_space<vmem>>, vector<64x64xf32>
    %cst_73 = arith.constant dense<0.000000e+00> : vector<16x64xf32>
    %163 = tpu.matmul %161, %162, %cst_73 {dimension_numbers = #tpu.dot_dimension_numbers<[1], [0], [0], [1], [0, 0, 1, 1], [], []>} : vector<16x64xf32>, vector<64x64xf32>, vector<16x64xf32> -> vector<16x64xf32>
    %c0_74 = arith.constant 0 : index
    %c0_75 = arith.constant 0 : index
    %164 = vector.load %arg11[%c0_74, %c0_75] : memref<1x64xf32, #tpu.memory_space<vmem>>, vector<1x64xf32>
    %165 = vector.broadcast %164 : vector<1x64xf32> to vector<16x64xf32>
    %166 = arith.addf %163, %165 : vector<16x64xf32>
    %cst_76 = arith.constant 5.000000e-01 : f32
    %167 = vector.broadcast %cst_76 : f32 to vector<16x64xf32>
    %168 = arith.mulf %167, %166 : vector<16x64xf32>
    %cst_77 = arith.constant 0.707106769 : f32
    %169 = vector.broadcast %cst_77 : f32 to vector<16x64xf32>
    %170 = arith.mulf %166, %169 : vector<16x64xf32>
    %cst_78 = arith.constant -4.000000e+00 : f32
    %cst_79 = arith.constant 4.000000e+00 : f32
    %171 = vector.broadcast %cst_78 : f32 to vector<16x64xf32>
    %172 = arith.maximumf %171, %170 : vector<16x64xf32>
    %173 = vector.broadcast %cst_79 : f32 to vector<16x64xf32>
    %174 = arith.minimumf %173, %172 : vector<16x64xf32>
    %175 = arith.mulf %174, %174 : vector<16x64xf32>
    %cst_80 = arith.constant 2.29050653E-4 : f32
    %176 = vector.broadcast %cst_80 : f32 to vector<16x64xf32>
    %177 = arith.mulf %176, %175 : vector<16x64xf32>
    %cst_81 = arith.constant 0.00340829091 : f32
    %178 = vector.broadcast %cst_81 : f32 to vector<16x64xf32>
    %179 = arith.addf %177, %178 : vector<16x64xf32>
    %180 = arith.mulf %179, %175 : vector<16x64xf32>
    %cst_82 = arith.constant 0.0509556942 : f32
    %181 = vector.broadcast %cst_82 : f32 to vector<16x64xf32>
    %182 = arith.addf %180, %181 : vector<16x64xf32>
    %183 = arith.mulf %182, %175 : vector<16x64xf32>
    %cst_83 = arith.constant 0.185208321 : f32
    %184 = vector.broadcast %cst_83 : f32 to vector<16x64xf32>
    %185 = arith.addf %183, %184 : vector<16x64xf32>
    %186 = arith.mulf %185, %175 : vector<16x64xf32>
    %cst_84 = arith.constant 1.12837911 : f32
    %187 = vector.broadcast %cst_84 : f32 to vector<16x64xf32>
    %188 = arith.addf %186, %187 : vector<16x64xf32>
    %cst_85 = arith.constant -1.17916031E-7 : f32
    %189 = vector.broadcast %cst_85 : f32 to vector<16x64xf32>
    %190 = arith.mulf %189, %175 : vector<16x64xf32>
    %cst_86 = arith.constant 2.35479656E-5 : f32
    %191 = vector.broadcast %cst_86 : f32 to vector<16x64xf32>
    %192 = arith.addf %190, %191 : vector<16x64xf32>
    %193 = arith.mulf %192, %175 : vector<16x64xf32>
    %cst_87 = arith.constant 0.00101796258 : f32
    %194 = vector.broadcast %cst_87 : f32 to vector<16x64xf32>
    %195 = arith.addf %193, %194 : vector<16x64xf32>
    %196 = arith.mulf %195, %175 : vector<16x64xf32>
    %cst_88 = arith.constant 0.0140704699 : f32
    %197 = vector.broadcast %cst_88 : f32 to vector<16x64xf32>
    %198 = arith.addf %196, %197 : vector<16x64xf32>
    %199 = arith.mulf %198, %175 : vector<16x64xf32>
    %cst_89 = arith.constant 0.110985048 : f32
    %200 = vector.broadcast %cst_89 : f32 to vector<16x64xf32>
    %201 = arith.addf %199, %200 : vector<16x64xf32>
    %202 = arith.mulf %201, %175 : vector<16x64xf32>
    %cst_90 = arith.constant 0.497469246 : f32
    %203 = vector.broadcast %cst_90 : f32 to vector<16x64xf32>
    %204 = arith.addf %202, %203 : vector<16x64xf32>
    %205 = arith.mulf %204, %175 : vector<16x64xf32>
    %cst_91 = arith.constant 1.000000e+00 : f32
    %206 = vector.broadcast %cst_91 : f32 to vector<16x64xf32>
    %207 = arith.addf %205, %206 : vector<16x64xf32>
    %208 = arith.mulf %174, %188 : vector<16x64xf32>
    %209 = tpu.reciprocal %207 {approx = true} : vector<16x64xf32> -> vector<16x64xf32>
    %210 = arith.mulf %208, %209 : vector<16x64xf32>
    %cst_92 = arith.constant 1.000000e+00 : f32
    %211 = vector.broadcast %cst_92 : f32 to vector<16x64xf32>
    %212 = arith.addf %211, %210 : vector<16x64xf32>
    %213 = arith.mulf %168, %212 : vector<16x64xf32>
    %c0_93 = arith.constant 0 : index
    %c0_94 = arith.constant 0 : index
    %214 = vector.load %arg12[%c0_93, %c0_94] : memref<64x128xf32, #tpu.memory_space<vmem>>, vector<64x128xf32>
    %cst_95 = arith.constant dense<0.000000e+00> : vector<16x128xf32>
    %215 = tpu.matmul %213, %214, %cst_95 {dimension_numbers = #tpu.dot_dimension_numbers<[1], [0], [0], [1], [0, 0, 1, 1], [], []>} : vector<16x64xf32>, vector<64x128xf32>, vector<16x128xf32> -> vector<16x128xf32>
    %c0_96 = arith.constant 0 : index
    %c0_97 = arith.constant 0 : index
    %216 = vector.load %arg13[%c0_96, %c0_97] : memref<1x128xf32, #tpu.memory_space<vmem>>, vector<1x128xf32>
    %217 = vector.broadcast %216 : vector<1x128xf32> to vector<16x128xf32>
    %218 = arith.addf %215, %217 : vector<16x128xf32>
    %219 = math.tanh %218 : vector<16x128xf32>
    %c0_98 = arith.constant 0 : index
    %c0_99 = arith.constant 0 : index
    %220 = vector.load %arg14[%c0_98, %c0_99] : memref<1x128xf32, #tpu.memory_space<vmem>>, vector<1x128xf32>
    %221 = vector.broadcast %220 : vector<1x128xf32> to vector<16x128xf32>
    %222 = arith.mulf %219, %221 : vector<16x128xf32>
    %c0_100 = arith.constant 0 : index
    %c0_101 = arith.constant 0 : index
    %223 = vector.load %arg15[%c0_100, %c0_101] : memref<1x128xf32, #tpu.memory_space<vmem>>, vector<1x128xf32>
    %224 = vector.broadcast %223 : vector<1x128xf32> to vector<16x128xf32>
    %225 = arith.addf %222, %224 : vector<16x128xf32>
    %c0_102 = arith.constant 0 : index
    %c0_103 = arith.constant 0 : index
    %226 = vector.load %arg16[%c0_102, %c0_103] : memref<16x128xf32, #tpu.memory_space<vmem>>, vector<16x128xf32>
    tpu.vector_store %arg16[%c0_102, %c0_103], %225 {strides = array<i32>} : memref<16x128xf32, #tpu.memory_space<vmem>>, vector<16x128xf32>,
    return
  }
  func.func @transform_0(%arg0: i32) -> (i32, i32) {
    %c0_i32 = arith.constant 0 : i32
    %c0_i32_0 = arith.constant 0 : i32
    return %arg0, %c0_i32 : i32, i32
  }
  func.func @transform_1(%arg0: i32) -> (i32, i32) {
    %c0_i32 = arith.constant 0 : i32
    %c0_i32_0 = arith.constant 0 : i32
    %c0_i32_1 = arith.constant 0 : i32
    return %c0_i32, %c0_i32_0 : i32, i32
  }
  func.func @transform_2(%arg0: i32) -> (i32, i32) {
    %c0_i32 = arith.constant 0 : i32
    %c0_i32_0 = arith.constant 0 : i32
    %c0_i32_1 = arith.constant 0 : i32
    return %c0_i32, %c0_i32_0 : i32, i32
  }
  func.func @transform_3(%arg0: i32) -> (i32, i32) {
    %c0_i32 = arith.constant 0 : i32
    %c0_i32_0 = arith.constant 0 : i32
    %c0_i32_1 = arith.constant 0 : i32
    return %c0_i32, %c0_i32_0 : i32, i32
  }
  func.func @transform_4(%arg0: i32) -> (i32, i32) {
    %c0_i32 = arith.constant 0 : i32
    %c0_i32_0 = arith.constant 0 : i32
    %c0_i32_1 = arith.constant 0 : i32
    return %c0_i32, %c0_i32_0 : i32, i32
  }
  func.func @transform_5(%arg0: i32) -> (i32, i32) {
    %c0_i32 = arith.constant 0 : i32
    %c0_i32_0 = arith.constant 0 : i32
    %c0_i32_1 = arith.constant 0 : i32
    return %c0_i32, %c0_i32_0 : i32, i32
  }
  func.func @transform_6(%arg0: i32) -> (i32, i32) {
    %c0_i32 = arith.constant 0 : i32
    %c0_i32_0 = arith.constant 0 : i32
    %c0_i32_1 = arith.constant 0 : i32
    return %c0_i32, %c0_i32_0 : i32, i32
  }
  func.func @transform_7(%arg0: i32) -> (i32, i32) {
    %c0_i32 = arith.constant 0 : i32
    %c0_i32_0 = arith.constant 0 : i32
    %c0_i32_1 = arith.constant 0 : i32
    return %c0_i32, %c0_i32_0 : i32, i32
  }
  func.func @transform_8(%arg0: i32) -> (i32, i32) {
    %c0_i32 = arith.constant 0 : i32
    %c0_i32_0 = arith.constant 0 : i32
    %c0_i32_1 = arith.constant 0 : i32
    return %c0_i32, %c0_i32_0 : i32, i32
  }
  func.func @transform_9(%arg0: i32) -> (i32, i32) {
    %c0_i32 = arith.constant 0 : i32
    %c0_i32_0 = arith.constant 0 : i32
    %c0_i32_1 = arith.constant 0 : i32
    return %c0_i32, %c0_i32_0 : i32, i32
  }
  func.func @transform_10(%arg0: i32) -> (i32, i32) {
    %c0_i32 = arith.constant 0 : i32
    %c0_i32_0 = arith.constant 0 : i32
    %c0_i32_1 = arith.constant 0 : i32
    return %c0_i32, %c0_i32_0 : i32, i32
  }
  func.func @transform_11(%arg0: i32) -> (i32, i32) {
    %c0_i32 = arith.constant 0 : i32
    %c0_i32_0 = arith.constant 0 : i32
    %c0_i32_1 = arith.constant 0 : i32
    return %c0_i32, %c0_i32_0 : i32, i32
  }
  func.func @transform_12(%arg0: i32) -> (i32, i32) {
    %c0_i32 = arith.constant 0 : i32
    %c0_i32_0 = arith.constant 0 : i32
    %c0_i32_1 = arith.constant 0 : i32
    return %c0_i32, %c0_i32_0 : i32, i32
  }
  func.func @transform_13(%arg0: i32) -> (i32, i32) {
    %c0_i32 = arith.constant 0 : i32
    %c0_i32_0 = arith.constant 0 : i32
    %c0_i32_1 = arith.constant 0 : i32
    return %c0_i32, %c0_i32_0 : i32, i32
  }
  func.func @transform_14(%arg0: i32) -> (i32, i32) {
    %c0_i32 = arith.constant 0 : i32
    %c0_i32_0 = arith.constant 0 : i32
    %c0_i32_1 = arith.constant 0 : i32
    return %c0_i32, %c0_i32_0 : i32, i32
  }
  func.func @transform_15(%arg0: i32) -> (i32, i32) {
    %c0_i32 = arith.constant 0 : i32
    %c0_i32_0 = arith.constant 0 : i32
    return %arg0, %c0_i32 : i32, i32
  }
}

module attributes {stable_mosaic.version = 11 : i64} {
  func.func @kernel(%arg0: i32, %arg1: memref<16x64xf32, #tpu.memory_space<vmem>>, %arg2: memref<64x128xf32, #tpu.memory_space<vmem>>, %arg3: memref<1x128xf32, #tpu.memory_space<vmem>>, %arg4: memref<128x128xf32, #tpu.memory_space<vmem>>, %arg5: memref<1x128xf32, #tpu.memory_space<vmem>>, %arg6: memref<128x128xf32, #tpu.memory_space<vmem>>, %arg7: memref<1x128xf32, #tpu.memory_space<vmem>>, %arg8: memref<128x64xf32, #tpu.memory_space<vmem>>, %arg9: memref<1x64xf32, #tpu.memory_space<vmem>>, %arg10: memref<64x64xf32, #tpu.memory_space<vmem>>, %arg11: memref<1x64xf32, #tpu.memory_space<vmem>>, %arg12: memref<64x128xf32, #tpu.memory_space<vmem>>, %arg13: memref<1x128xf32, #tpu.memory_space<vmem>>, %arg14: memref<1x128xf32, #tpu.memory_space<vmem>>, %arg15: memref<1x128xf32, #tpu.memory_space<vmem>>, %arg16: memref<16x128xf32, #tpu.memory_space<vmem>>) attributes {dimension_semantics = [#tpu.dimension_semantics<parallel>], iteration_bounds = array<i64: 1>, scalar_prefetch = 0 : i64, scratch_operands = 0 : i64, tpu.core_type = #tpu.core_type<tc>, window_params = [{transform_indices = @transform_0, window_bounds = array<i64: 16, 64>}, {pipeline_mode = #tpu.pipeline_mode<synchronous>, transform_indices = @transform_1, window_bounds = array<i64: 64, 128>}, {pipeline_mode = #tpu.pipeline_mode<synchronous>, transform_indices = @transform_2, window_bounds = array<i64: 1, 128>}, {pipeline_mode = #tpu.pipeline_mode<synchronous>, transform_indices = @transform_3, window_bounds = array<i64: 128, 128>}, {pipeline_mode = #tpu.pipeline_mode<synchronous>, transform_indices = @transform_4, window_bounds = array<i64: 1, 128>}, {pipeline_mode = #tpu.pipeline_mode<synchronous>, transform_indices = @transform_5, window_bounds = array<i64: 128, 128>}, {pipeline_mode = #tpu.pipeline_mode<synchronous>, transform_indices = @transform_6, window_bounds = array<i64: 1, 128>}, {pipeline_mode = #tpu.pipeline_mode<synchronous>, transform_indices = @transform_7, window_bounds = array<i64: 128, 64>}, {pipeline_mode = #tpu.pipeline_mode<synchronous>, transform_indices = @transform_8, window_bounds = array<i64: 1, 64>}, {pipeline_mode = #tpu.pipeline_mode<synchronous>, transform_indices = @transform_9, window_bounds = array<i64: 64, 64>}, {pipeline_mode = #tpu.pipeline_mode<synchronous>, transform_indices = @transform_10, window_bounds = array<i64: 1, 64>}, {pipeline_mode = #tpu.pipeline_mode<synchronous>, transform_indices = @transform_11, window_bounds = array<i64: 64, 128>}, {pipeline_mode = #tpu.pipeline_mode<synchronous>, transform_indices = @transform_12, window_bounds = array<i64: 1, 128>}, {pipeline_mode = #tpu.pipeline_mode<synchronous>, transform_indices = @transform_13, window_bounds = array<i64: 1, 128>}, {pipeline_mode = #tpu.pipeline_mode<synchronous>, transform_indices = @transform_14, window_bounds = array<i64: 1, 128>}, {transform_indices = @transform_15, window_bounds = array<i64: 16, 128>}]} {
    %c0 = arith.constant 0 : index
    %c0_0 = arith.constant 0 : index
    %0 = vector.load %arg1[%c0, %c0_0] : memref<16x64xf32, #tpu.memory_space<vmem>>, vector<16x64xf32>
    %c0_1 = arith.constant 0 : index
    %c0_2 = arith.constant 0 : index
    %1 = vector.load %arg2[%c0_1, %c0_2] : memref<64x128xf32, #tpu.memory_space<vmem>>, vector<64x128xf32>
    %cst = arith.constant dense<0.000000e+00> : vector<16x128xf32>
    %2 = tpu.matmul %0, %1, %cst {dimension_numbers = #tpu.dot_dimension_numbers<[1], [0], [0], [1], [0, 0, 1, 1], [], []>} : vector<16x64xf32>, vector<64x128xf32>, vector<16x128xf32> -> vector<16x128xf32>
    %c0_3 = arith.constant 0 : index
    %c0_4 = arith.constant 0 : index
    %3 = vector.load %arg3[%c0_3, %c0_4] : memref<1x128xf32, #tpu.memory_space<vmem>>, vector<1x128xf32>
    %4 = vector.broadcast %3 : vector<1x128xf32> to vector<16x128xf32>
    %5 = arith.addf %2, %4 : vector<16x128xf32>
    %cst_5 = arith.constant 5.000000e-01 : f32
    %6 = vector.broadcast %cst_5 : f32 to vector<16x128xf32>
    %7 = arith.mulf %6, %5 : vector<16x128xf32>
    %cst_6 = arith.constant 0.707106769 : f32
    %8 = vector.broadcast %cst_6 : f32 to vector<16x128xf32>
    %9 = arith.mulf %5, %8 : vector<16x128xf32>
    %cst_7 = arith.constant -4.000000e+00 : f32
    %cst_8 = arith.constant 4.000000e+00 : f32
    %10 = vector.broadcast %cst_7 : f32 to vector<16x128xf32>
    %11 = arith.maximumf %10, %9 : vector<16x128xf32>
    %12 = vector.broadcast %cst_8 : f32 to vector<16x128xf32>
    %13 = arith.minimumf %12, %11 : vector<16x128xf32>
    %14 = arith.mulf %13, %13 : vector<16x128xf32>
    %cst_9 = arith.constant 2.29050653E-4 : f32
    %15 = vector.broadcast %cst_9 : f32 to vector<16x128xf32>
    %16 = arith.mulf %15, %14 : vector<16x128xf32>
    %cst_10 = arith.constant 0.00340829091 : f32
    %17 = vector.broadcast %cst_10 : f32 to vector<16x128xf32>
    %18 = arith.addf %16, %17 : vector<16x128xf32>
    %19 = arith.mulf %18, %14 : vector<16x128xf32>
    %cst_11 = arith.constant 0.0509556942 : f32
    %20 = vector.broadcast %cst_11 : f32 to vector<16x128xf32>
    %21 = arith.addf %19, %20 : vector<16x128xf32>
    %22 = arith.mulf %21, %14 : vector<16x128xf32>
    %cst_12 = arith.constant 0.185208321 : f32
    %23 = vector.broadcast %cst_12 : f32 to vector<16x128xf32>
    %24 = arith.addf %22, %23 : vector<16x128xf32>
    %25 = arith.mulf %24, %14 : vector<16x128xf32>
    %cst_13 = arith.constant 1.12837911 : f32
    %26 = vector.broadcast %cst_13 : f32 to vector<16x128xf32>
    %27 = arith.addf %25, %26 : vector<16x128xf32>
    %cst_14 = arith.constant -1.17916031E-7 : f32
    %28 = vector.broadcast %cst_14 : f32 to vector<16x128xf32>
    %29 = arith.mulf %28, %14 : vector<16x128xf32>
    %cst_15 = arith.constant 2.35479656E-5 : f32
    %30 = vector.broadcast %cst_15 : f32 to vector<16x128xf32>
    %31 = arith.addf %29, %30 : vector<16x128xf32>
    %32 = arith.mulf %31, %14 : vector<16x128xf32>
    %cst_16 = arith.constant 0.00101796258 : f32
    %33 = vector.broadcast %cst_16 : f32 to vector<16x128xf32>
    %34 = arith.addf %32, %33 : vector<16x128xf32>
    %35 = arith.mulf %34, %14 : vector<16x128xf32>
    %cst_17 = arith.constant 0.0140704699 : f32
    %36 = vector.broadcast %cst_17 : f32 to vector<16x128xf32>
    %37 = arith.addf %35, %36 : vector<16x128xf32>
    %38 = arith.mulf %37, %14 : vector<16x128xf32>
    %cst_18 = arith.constant 0.110985048 : f32
    %39 = vector.broadcast %cst_18 : f32 to vector<16x128xf32>
    %40 = arith.addf %38, %39 : vector<16x128xf32>
    %41 = arith.mulf %40, %14 : vector<16x128xf32>
    %cst_19 = arith.constant 0.497469246 : f32
    %42 = vector.broadcast %cst_19 : f32 to vector<16x128xf32>
    %43 = arith.addf %41, %42 : vector<16x128xf32>
    %44 = arith.mulf %43, %14 : vector<16x128xf32>
    %cst_20 = arith.constant 1.000000e+00 : f32
    %45 = vector.broadcast %cst_20 : f32 to vector<16x128xf32>
    %46 = arith.addf %44, %45 : vector<16x128xf32>
    %47 = arith.mulf %13, %27 : vector<16x128xf32>
    %48 = tpu.reciprocal %46 {approx = true} : vector<16x128xf32> -> vector<16x128xf32>
    %49 = arith.mulf %47, %48 : vector<16x128xf32>
    %cst_21 = arith.constant 1.000000e+00 : f32
    %50 = vector.broadcast %cst_21 : f32 to vector<16x128xf32>
    %51 = arith.addf %50, %49 : vector<16x128xf32>
    %52 = arith.mulf %7, %51 : vector<16x128xf32>
    %c0_22 = arith.constant 0 : index
    %c0_23 = arith.constant 0 : index
    %53 = vector.load %arg4[%c0_22, %c0_23] : memref<128x128xf32, #tpu.memory_space<vmem>>, vector<128x128xf32>
    %cst_24 = arith.constant dense<0.000000e+00> : vector<16x128xf32>
    %54 = tpu.matmul %52, %53, %cst_24 {dimension_numbers = #tpu.dot_dimension_numbers<[1], [0], [0], [1], [0, 0, 1, 1], [], []>} : vector<16x128xf32>, vector<128x128xf32>, vector<16x128xf32> -> vector<16x128xf32>
    %c0_25 = arith.constant 0 : index
    %c0_26 = arith.constant 0 : index
    %55 = vector.load %arg5[%c0_25, %c0_26] : memref<1x128xf32, #tpu.memory_space<vmem>>, vector<1x128xf32>
    %56 = vector.broadcast %55 : vector<1x128xf32> to vector<16x128xf32>
    %57 = arith.addf %54, %56 : vector<16x128xf32>
    %cst_27 = arith.constant 5.000000e-01 : f32
    %58 = vector.broadcast %cst_27 : f32 to vector<16x128xf32>
    %59 = arith.mulf %58, %57 : vector<16x128xf32>
    %cst_28 = arith.constant 0.707106769 : f32
    %60 = vector.broadcast %cst_28 : f32 to vector<16x128xf32>
    %61 = arith.mulf %57, %60 : vector<16x128xf32>
    %cst_29 = arith.constant -4.000000e+00 : f32
    %cst_30 = arith.constant 4.000000e+00 : f32
    %62 = vector.broadcast %cst_29 : f32 to vector<16x128xf32>
    %63 = arith.maximumf %62, %61 : vector<16x128xf32>
    %64 = vector.broadcast %cst_30 : f32 to vector<16x128xf32>
    %65 = arith.minimumf %64, %63 : vector<16x128xf32>
    %66 = arith.mulf %65, %65 : vector<16x128xf32>
    %cst_31 = arith.constant 2.29050653E-4 : f32
    %67 = vector.broadcast %cst_31 : f32 to vector<16x128xf32>
    %68 = arith.mulf %67, %66 : vector<16x128xf32>
    %cst_32 = arith.constant 0.00340829091 : f32
    %69 = vector.broadcast %cst_32 : f32 to vector<16x128xf32>
    %70 = arith.addf %68, %69 : vector<16x128xf32>
    %71 = arith.mulf %70, %66 : vector<16x128xf32>
    %cst_33 = arith.constant 0.0509556942 : f32
    %72 = vector.broadcast %cst_33 : f32 to vector<16x128xf32>
    %73 = arith.addf %71, %72 : vector<16x128xf32>
    %74 = arith.mulf %73, %66 : vector<16x128xf32>
    %cst_34 = arith.constant 0.185208321 : f32
    %75 = vector.broadcast %cst_34 : f32 to vector<16x128xf32>
    %76 = arith.addf %74, %75 : vector<16x128xf32>
    %77 = arith.mulf %76, %66 : vector<16x128xf32>
    %cst_35 = arith.constant 1.12837911 : f32
    %78 = vector.broadcast %cst_35 : f32 to vector<16x128xf32>
    %79 = arith.addf %77, %78 : vector<16x128xf32>
    %cst_36 = arith.constant -1.17916031E-7 : f32
    %80 = vector.broadcast %cst_36 : f32 to vector<16x128xf32>
    %81 = arith.mulf %80, %66 : vector<16x128xf32>
    %cst_37 = arith.constant 2.35479656E-5 : f32
    %82 = vector.broadcast %cst_37 : f32 to vector<16x128xf32>
    %83 = arith.addf %81, %82 : vector<16x128xf32>
    %84 = arith.mulf %83, %66 : vector<16x128xf32>
    %cst_38 = arith.constant 0.00101796258 : f32
    %85 = vector.broadcast %cst_38 : f32 to vector<16x128xf32>
    %86 = arith.addf %84, %85 : vector<16x128xf32>
    %87 = arith.mulf %86, %66 : vector<16x128xf32>
    %cst_39 = arith.constant 0.0140704699 : f32
    %88 = vector.broadcast %cst_39 : f32 to vector<16x128xf32>
    %89 = arith.addf %87, %88 : vector<16x128xf32>
    %90 = arith.mulf %89, %66 : vector<16x128xf32>
    %cst_40 = arith.constant 0.110985048 : f32
    %91 = vector.broadcast %cst_40 : f32 to vector<16x128xf32>
    %92 = arith.addf %90, %91 : vector<16x128xf32>
    %93 = arith.mulf %92, %66 : vector<16x128xf32>
    %cst_41 = arith.constant 0.497469246 : f32
    %94 = vector.broadcast %cst_41 : f32 to vector<16x128xf32>
    %95 = arith.addf %93, %94 : vector<16x128xf32>
    %96 = arith.mulf %95, %66 : vector<16x128xf32>
    %cst_42 = arith.constant 1.000000e+00 : f32
    %97 = vector.broadcast %cst_42 : f32 to vector<16x128xf32>
    %98 = arith.addf %96, %97 : vector<16x128xf32>
    %99 = arith.mulf %65, %79 : vector<16x128xf32>
    %100 = tpu.reciprocal %98 {approx = true} : vector<16x128xf32> -> vector<16x128xf32>
    %101 = arith.mulf %99, %100 : vector<16x128xf32>
    %cst_43 = arith.constant 1.000000e+00 : f32
    %102 = vector.broadcast %cst_43 : f32 to vector<16x128xf32>
    %103 = arith.addf %102, %101 : vector<16x128xf32>
    %104 = arith.mulf %59, %103 : vector<16x128xf32>
    %c0_44 = arith.constant 0 : index
    %c0_45 = arith.constant 0 : index
    %105 = vector.load %arg6[%c0_44, %c0_45] : memref<128x128xf32, #tpu.memory_space<vmem>>, vector<128x128xf32>
    %cst_46 = arith.constant dense<0.000000e+00> : vector<16x128xf32>
    %106 = tpu.matmul %104, %105, %cst_46 {dimension_numbers = #tpu.dot_dimension_numbers<[1], [0], [0], [1], [0, 0, 1, 1], [], []>} : vector<16x128xf32>, vector<128x128xf32>, vector<16x128xf32> -> vector<16x128xf32>
    %c0_47 = arith.constant 0 : index
    %c0_48 = arith.constant 0 : index
    %107 = vector.load %arg7[%c0_47, %c0_48] : memref<1x128xf32, #tpu.memory_space<vmem>>, vector<1x128xf32>
    %108 = vector.broadcast %107 : vector<1x128xf32> to vector<16x128xf32>
    %109 = arith.addf %106, %108 : vector<16x128xf32>
    %c0_49 = arith.constant 0 : index
    %c0_50 = arith.constant 0 : index
    %110 = vector.load %arg8[%c0_49, %c0_50] : memref<128x64xf32, #tpu.memory_space<vmem>>, vector<128x64xf32>
    %cst_51 = arith.constant dense<0.000000e+00> : vector<16x64xf32>
    %111 = tpu.matmul %109, %110, %cst_51 {dimension_numbers = #tpu.dot_dimension_numbers<[1], [0], [0], [1], [0, 0, 1, 1], [], []>} : vector<16x128xf32>, vector<128x64xf32>, vector<16x64xf32> -> vector<16x64xf32>
    %c0_52 = arith.constant 0 : index
    %c0_53 = arith.constant 0 : index
    %112 = vector.load %arg9[%c0_52, %c0_53] : memref<1x64xf32, #tpu.memory_space<vmem>>, vector<1x64xf32>
    %113 = vector.broadcast %112 : vector<1x64xf32> to vector<16x64xf32>
    %114 = arith.addf %111, %113 : vector<16x64xf32>
    %cst_54 = arith.constant 5.000000e-01 : f32
    %115 = vector.broadcast %cst_54 : f32 to vector<16x64xf32>
    %116 = arith.mulf %115, %114 : vector<16x64xf32>
    %cst_55 = arith.constant 0.707106769 : f32
    %117 = vector.broadcast %cst_55 : f32 to vector<16x64xf32>
    %118 = arith.mulf %114, %117 : vector<16x64xf32>
    %cst_56 = arith.constant -4.000000e+00 : f32
    %cst_57 = arith.constant 4.000000e+00 : f32
    %119 = vector.broadcast %cst_56 : f32 to vector<16x64xf32>
    %120 = arith.maximumf %119, %118 : vector<16x64xf32>
    %121 = vector.broadcast %cst_57 : f32 to vector<16x64xf32>
    %122 = arith.minimumf %121, %120 : vector<16x64xf32>
    %123 = arith.mulf %122, %122 : vector<16x64xf32>
    %cst_58 = arith.constant 2.29050653E-4 : f32
    %124 = vector.broadcast %cst_58 : f32 to vector<16x64xf32>
    %125 = arith.mulf %124, %123 : vector<16x64xf32>
    %cst_59 = arith.constant 0.00340829091 : f32
    %126 = vector.broadcast %cst_59 : f32 to vector<16x64xf32>
    %127 = arith.addf %125, %126 : vector<16x64xf32>
    %128 = arith.mulf %127, %123 : vector<16x64xf32>
    %cst_60 = arith.constant 0.0509556942 : f32
    %129 = vector.broadcast %cst_60 : f32 to vector<16x64xf32>
    %130 = arith.addf %128, %129 : vector<16x64xf32>
    %131 = arith.mulf %130, %123 : vector<16x64xf32>
    %cst_61 = arith.constant 0.185208321 : f32
    %132 = vector.broadcast %cst_61 : f32 to vector<16x64xf32>
    %133 = arith.addf %131, %132 : vector<16x64xf32>
    %134 = arith.mulf %133, %123 : vector<16x64xf32>
    %cst_62 = arith.constant 1.12837911 : f32
    %135 = vector.broadcast %cst_62 : f32 to vector<16x64xf32>
    %136 = arith.addf %134, %135 : vector<16x64xf32>
    %cst_63 = arith.constant -1.17916031E-7 : f32
    %137 = vector.broadcast %cst_63 : f32 to vector<16x64xf32>
    %138 = arith.mulf %137, %123 : vector<16x64xf32>
    %cst_64 = arith.constant 2.35479656E-5 : f32
    %139 = vector.broadcast %cst_64 : f32 to vector<16x64xf32>
    %140 = arith.addf %138, %139 : vector<16x64xf32>
    %141 = arith.mulf %140, %123 : vector<16x64xf32>
    %cst_65 = arith.constant 0.00101796258 : f32
    %142 = vector.broadcast %cst_65 : f32 to vector<16x64xf32>
    %143 = arith.addf %141, %142 : vector<16x64xf32>
    %144 = arith.mulf %143, %123 : vector<16x64xf32>
    %cst_66 = arith.constant 0.0140704699 : f32
    %145 = vector.broadcast %cst_66 : f32 to vector<16x64xf32>
    %146 = arith.addf %144, %145 : vector<16x64xf32>
    %147 = arith.mulf %146, %123 : vector<16x64xf32>
    %cst_67 = arith.constant 0.110985048 : f32
    %148 = vector.broadcast %cst_67 : f32 to vector<16x64xf32>
    %149 = arith.addf %147, %148 : vector<16x64xf32>
    %150 = arith.mulf %149, %123 : vector<16x64xf32>
    %cst_68 = arith.constant 0.497469246 : f32
    %151 = vector.broadcast %cst_68 : f32 to vector<16x64xf32>
    %152 = arith.addf %150, %151 : vector<16x64xf32>
    %153 = arith.mulf %152, %123 : vector<16x64xf32>
    %cst_69 = arith.constant 1.000000e+00 : f32
    %154 = vector.broadcast %cst_69 : f32 to vector<16x64xf32>
    %155 = arith.addf %153, %154 : vector<16x64xf32>
    %156 = arith.mulf %122, %136 : vector<16x64xf32>
    %157 = tpu.reciprocal %155 {approx = true} : vector<16x64xf32> -> vector<16x64xf32>
    %158 = arith.mulf %156, %157 : vector<16x64xf32>
    %cst_70 = arith.constant 1.000000e+00 : f32
    %159 = vector.broadcast %cst_70 : f32 to vector<16x64xf32>
    %160 = arith.addf %159, %158 : vector<16x64xf32>
    %161 = arith.mulf %116, %160 : vector<16x64xf32>
    %c0_71 = arith.constant 0 : index
    %c0_72 = arith.constant 0 : index
    %162 = vector.load %arg10[%c0_71, %c0_72] : memref<64x64xf32, #tpu.memory_space<vmem>>, vector<64x64xf32>
    %cst_73 = arith.constant dense<0.000000e+00> : vector<16x64xf32>
    %163 = tpu.matmul %161, %162, %cst_73 {dimension_numbers = #tpu.dot_dimension_numbers<[1], [0], [0], [1], [0, 0, 1, 1], [], []>} : vector<16x64xf32>, vector<64x64xf32>, vector<16x64xf32> -> vector<16x64xf32>
    %c0_74 = arith.constant 0 : index
    %c0_75 = arith.constant 0 : index
    %164 = vector.load %arg11[%c0_74, %c0_75] : memref<1x64xf32, #tpu.memory_space<vmem>>, vector<1x64xf32>
    %165 = vector.broadcast %164 : vector<1x64xf32> to vector<16x64xf32>
    %166 = arith.addf %163, %165 : vector<16x64xf32>
    %cst_76 = arith.constant 5.000000e-01 : f32
    %167 = vector.broadcast %cst_76 : f32 to vector<16x64xf32>
    %168 = arith.mulf %167, %166 : vector<16x64xf32>
    %cst_77 = arith.constant 0.707106769 : f32
    %169 = vector.broadcast %cst_77 : f32 to vector<16x64xf32>
    %170 = arith.mulf %166, %169 : vector<16x64xf32>
    %cst_78 = arith.constant -4.000000e+00 : f32
    %cst_79 = arith.constant 4.000000e+00 : f32
    %171 = vector.broadcast %cst_78 : f32 to vector<16x64xf32>
    %172 = arith.maximumf %171, %170 : vector<16x64xf32>
    %173 = vector.broadcast %cst_79 : f32 to vector<16x64xf32>
    %174 = arith.minimumf %173, %172 : vector<16x64xf32>
    %175 = arith.mulf %174, %174 : vector<16x64xf32>
    %cst_80 = arith.constant 2.29050653E-4 : f32
    %176 = vector.broadcast %cst_80 : f32 to vector<16x64xf32>
    %177 = arith.mulf %176, %175 : vector<16x64xf32>
    %cst_81 = arith.constant 0.00340829091 : f32
    %178 = vector.broadcast %cst_81 : f32 to vector<16x64xf32>
    %179 = arith.addf %177, %178 : vector<16x64xf32>
    %180 = arith.mulf %179, %175 : vector<16x64xf32>
    %cst_82 = arith.constant 0.0509556942 : f32
    %181 = vector.broadcast %cst_82 : f32 to vector<16x64xf32>
    %182 = arith.addf %180, %181 : vector<16x64xf32>
    %183 = arith.mulf %182, %175 : vector<16x64xf32>
    %cst_83 = arith.constant 0.185208321 : f32
    %184 = vector.broadcast %cst_83 : f32 to vector<16x64xf32>
    %185 = arith.addf %183, %184 : vector<16x64xf32>
    %186 = arith.mulf %185, %175 : vector<16x64xf32>
    %cst_84 = arith.constant 1.12837911 : f32
    %187 = vector.broadcast %cst_84 : f32 to vector<16x64xf32>
    %188 = arith.addf %186, %187 : vector<16x64xf32>
    %cst_85 = arith.constant -1.17916031E-7 : f32
    %189 = vector.broadcast %cst_85 : f32 to vector<16x64xf32>
    %190 = arith.mulf %189, %175 : vector<16x64xf32>
    %cst_86 = arith.constant 2.35479656E-5 : f32
    %191 = vector.broadcast %cst_86 : f32 to vector<16x64xf32>
    %192 = arith.addf %190, %191 : vector<16x64xf32>
    %193 = arith.mulf %192, %175 : vector<16x64xf32>
    %cst_87 = arith.constant 0.00101796258 : f32
    %194 = vector.broadcast %cst_87 : f32 to vector<16x64xf32>
    %195 = arith.addf %193, %194 : vector<16x64xf32>
    %196 = arith.mulf %195, %175 : vector<16x64xf32>
    %cst_88 = arith.constant 0.0140704699 : f32
    %197 = vector.broadcast %cst_88 : f32 to vector<16x64xf32>
    %198 = arith.addf %196, %197 : vector<16x64xf32>
    %199 = arith.mulf %198, %175 : vector<16x64xf32>
    %cst_89 = arith.constant 0.110985048 : f32
    %200 = vector.broadcast %cst_89 : f32 to vector<16x64xf32>
    %201 = arith.addf %199, %200 : vector<16x64xf32>
    %202 = arith.mulf %201, %175 : vector<16x64xf32>
    %cst_90 = arith.constant 0.497469246 : f32
    %203 = vector.broadcast %cst_90 : f32 to vector<16x64xf32>
    %204 = arith.addf %202, %203 : vector<16x64xf32>
    %205 = arith.mulf %204, %175 : vector<16x64xf32>
    %cst_91 = arith.constant 1.000000e+00 : f32
    %206 = vector.broadcast %cst_91 : f32 to vector<16x64xf32>
    %207 = arith.addf %205, %206 : vector<16x64xf32>
    %208 = arith.mulf %174, %188 : vector<16x64xf32>
    %209 = tpu.reciprocal %207 {approx = true} : vector<16x64xf32> -> vector<16x64xf32>
    %210 = arith.mulf %208, %209 : vector<16x64xf32>
    %cst_92 = arith.constant 1.000000e+00 : f32
    %211 = vector.broadcast %cst_92 : f32 to vector<16x64xf32>
    %212 = arith.addf %211, %210 : vector<16x64xf32>
    %213 = arith.mulf %168, %212 : vector<16x64xf32>
    %c0_93 = arith.constant 0 : index
    %c0_94 = arith.constant 0 : index
    %214 = vector.load %arg12[%c0_93, %c0_94] : memref<64x128xf32, #tpu.memory_space<vmem>>, vector<64x128xf32>
    %cst_95 = arith.constant dense<0.000000e+00> : vector<16x128xf32>
    %215 = tpu.matmul %213, %214, %cst_95 {dimension_numbers = #tpu.dot_dimension_numbers<[1], [0], [0], [1], [0, 0, 1, 1], [], []>} : vector<16x64xf32>, vector<64x128xf32>, vector<16x128xf32> -> vector<16x128xf32>
    %c0_96 = arith.constant 0 : index
    %c0_97 = arith.constant 0 : index
    %216 = vector.load %arg13[%c0_96, %c0_97] : memref<1x128xf32, #tpu.memory_space<vmem>>, vector<1x128xf32>
    %217 = vector.broadcast %216 : vector<1x128xf32> to vector<16x128xf32>
    %218 = arith.addf %215, %217 : vector<16x128xf32>
    %219 = math.tanh %218 : vector<16x128xf32>
    %c0_98 = arith.constant 0 : index
    %c0_99 = arith.constant 0 : index
    %220 = vector.load %arg14[%c0_98, %c0_99] : memref<1x128xf32, #tpu.memory_space<vmem>>, vector<1x128xf32>
    %221 = vector.broadcast %220 : vector<1x128xf32> to vector<16x128xf32>
    %222 = arith.mulf %219, %221 : vector<16x128xf32>
    %c0_100 = arith.constant 0 : index
    %c0_101 = arith.constant 0 : index
    %223 = vector.load %arg15[%c0_100, %c0_101] : memref<1x128xf32, #tpu.memory_space<vmem>>, vector<1x128xf32>
    %224 = vector.broadcast %223 : vector<1x128xf32> to vector<16x128xf32>
    %225 = arith.addf %222, %224 : vector<16x128xf32>
    %c0_102 = arith.constant 0 : index
    %c0_103 = arith.constant 0 : index
    %226 = vector.load %arg16[%c0_102, %c0_103] : memref<16x128xf32, #tpu.memory_space<vmem>>, vector<16x128xf32>
    tpu.vector_store %arg16[%c0_102, %c0_103], %225 {strides = array<i32>} : memref<16x128xf32, #tpu.memory_space<vmem>>, vector<16x128xf32>,
    return
  }
  func.func @transform_0(%arg0: i32) -> (i32, i32) {
    %c0_i32 = arith.constant 0 : i32
    %c0_i32_0 = arith.constant 0 : i32
    return %arg0, %c0_i32 : i32, i32
  }
  func.func @transform_1(%arg0: i32) -> (i32, i32) {
    %c0_i32 = arith.constant 0 : i32
    %c0_i32_0 = arith.constant 0 : i32
    %c0_i32_1 = arith.constant 0 : i32
    return %c0_i32, %c0_i32_0 : i32, i32
  }
  func.func @transform_2(%arg0: i32) -> (i32, i32) {
    %c0_i32 = arith.constant 0 : i32
    %c0_i32_0 = arith.constant 0 : i32
    %c0_i32_1 = arith.constant 0 : i32
    return %c0_i32, %c0_i32_0 : i32, i32
  }
  func.func @transform_3(%arg0: i32) -> (i32, i32) {
    %c0_i32 = arith.constant 0 : i32
    %c0_i32_0 = arith.constant 0 : i32
    %c0_i32_1 = arith.constant 0 : i32
    return %c0_i32, %c0_i32_0 : i32, i32
  }
  func.func @transform_4(%arg0: i32) -> (i32, i32) {
    %c0_i32 = arith.constant 0 : i32
    %c0_i32_0 = arith.constant 0 : i32
    %c0_i32_1 = arith.constant 0 : i32
    return %c0_i32, %c0_i32_0 : i32, i32
  }
  func.func @transform_5(%arg0: i32) -> (i32, i32) {
    %c0_i32 = arith.constant 0 : i32
    %c0_i32_0 = arith.constant 0 : i32
    %c0_i32_1 = arith.constant 0 : i32
    return %c0_i32, %c0_i32_0 : i32, i32
  }
  func.func @transform_6(%arg0: i32) -> (i32, i32) {
    %c0_i32 = arith.constant 0 : i32
    %c0_i32_0 = arith.constant 0 : i32
    %c0_i32_1 = arith.constant 0 : i32
    return %c0_i32, %c0_i32_0 : i32, i32
  }
  func.func @transform_7(%arg0: i32) -> (i32, i32) {
    %c0_i32 = arith.constant 0 : i32
    %c0_i32_0 = arith.constant 0 : i32
    %c0_i32_1 = arith.constant 0 : i32
    return %c0_i32, %c0_i32_0 : i32, i32
  }
  func.func @transform_8(%arg0: i32) -> (i32, i32) {
    %c0_i32 = arith.constant 0 : i32
    %c0_i32_0 = arith.constant 0 : i32
    %c0_i32_1 = arith.constant 0 : i32
    return %c0_i32, %c0_i32_0 : i32, i32
  }
  func.func @transform_9(%arg0: i32) -> (i32, i32) {
    %c0_i32 = arith.constant 0 : i32
    %c0_i32_0 = arith.constant 0 : i32
    %c0_i32_1 = arith.constant 0 : i32
    return %c0_i32, %c0_i32_0 : i32, i32
  }
  func.func @transform_10(%arg0: i32) -> (i32, i32) {
    %c0_i32 = arith.constant 0 : i32
    %c0_i32_0 = arith.constant 0 : i32
    %c0_i32_1 = arith.constant 0 : i32
    return %c0_i32, %c0_i32_0 : i32, i32
  }
  func.func @transform_11(%arg0: i32) -> (i32, i32) {
    %c0_i32 = arith.constant 0 : i32
    %c0_i32_0 = arith.constant 0 : i32
    %c0_i32_1 = arith.constant 0 : i32
    return %c0_i32, %c0_i32_0 : i32, i32
  }
  func.func @transform_12(%arg0: i32) -> (i32, i32) {
    %c0_i32 = arith.constant 0 : i32
    %c0_i32_0 = arith.constant 0 : i32
    %c0_i32_1 = arith.constant 0 : i32
    return %c0_i32, %c0_i32_0 : i32, i32
  }
  func.func @transform_13(%arg0: i32) -> (i32, i32) {
    %c0_i32 = arith.constant 0 : i32
    %c0_i32_0 = arith.constant 0 : i32
    %c0_i32_1 = arith.constant 0 : i32
    return %c0_i32, %c0_i32_0 : i32, i32
  }
  func.func @transform_14(%arg0: i32) -> (i32, i32) {
    %c0_i32 = arith.constant 0 : i32
    %c0_i32_0 = arith.constant 0 : i32
    %c0_i32_1 = arith.constant 0 : i32
    return %c0_i32, %c0_i32_0 : i32, i32
  }
  func.func @transform_15(%arg0: i32) -> (i32, i32) {
    %c0_i32 = arith.constant 0 : i32
    %c0_i32_0 = arith.constant 0 : i32
    return %arg0, %c0_i32 : i32, i32
  }
}

module attributes {stable_mosaic.version = 11 : i64} {
  func.func @kernel(%arg0: i32, %arg1: memref<16x128xf32, #tpu.memory_space<vmem>>, %arg2: memref<128x64xf32, #tpu.memory_space<vmem>>, %arg3: memref<1x64xf32, #tpu.memory_space<vmem>>, %arg4: memref<64x64xf32, #tpu.memory_space<vmem>>, %arg5: memref<1x64xf32, #tpu.memory_space<vmem>>, %arg6: memref<64x64xf32, #tpu.memory_space<vmem>>, %arg7: memref<1x64xf32, #tpu.memory_space<vmem>>, %arg8: memref<64x32xf32, #tpu.memory_space<vmem>>, %arg9: memref<1x32xf32, #tpu.memory_space<vmem>>, %arg10: memref<32x32xf32, #tpu.memory_space<vmem>>, %arg11: memref<1x32xf32, #tpu.memory_space<vmem>>, %arg12: memref<32x128xf32, #tpu.memory_space<vmem>>, %arg13: memref<1x128xf32, #tpu.memory_space<vmem>>, %arg14: memref<1x128xf32, #tpu.memory_space<vmem>>, %arg15: memref<1x128xf32, #tpu.memory_space<vmem>>, %arg16: memref<16x128xf32, #tpu.memory_space<vmem>>) attributes {dimension_semantics = [#tpu.dimension_semantics<parallel>], iteration_bounds = array<i64: 1>, scalar_prefetch = 0 : i64, scratch_operands = 0 : i64, tpu.core_type = #tpu.core_type<tc>, window_params = [{transform_indices = @transform_0, window_bounds = array<i64: 16, 128>}, {pipeline_mode = #tpu.pipeline_mode<synchronous>, transform_indices = @transform_1, window_bounds = array<i64: 128, 64>}, {pipeline_mode = #tpu.pipeline_mode<synchronous>, transform_indices = @transform_2, window_bounds = array<i64: 1, 64>}, {pipeline_mode = #tpu.pipeline_mode<synchronous>, transform_indices = @transform_3, window_bounds = array<i64: 64, 64>}, {pipeline_mode = #tpu.pipeline_mode<synchronous>, transform_indices = @transform_4, window_bounds = array<i64: 1, 64>}, {pipeline_mode = #tpu.pipeline_mode<synchronous>, transform_indices = @transform_5, window_bounds = array<i64: 64, 64>}, {pipeline_mode = #tpu.pipeline_mode<synchronous>, transform_indices = @transform_6, window_bounds = array<i64: 1, 64>}, {pipeline_mode = #tpu.pipeline_mode<synchronous>, transform_indices = @transform_7, window_bounds = array<i64: 64, 32>}, {pipeline_mode = #tpu.pipeline_mode<synchronous>, transform_indices = @transform_8, window_bounds = array<i64: 1, 32>}, {pipeline_mode = #tpu.pipeline_mode<synchronous>, transform_indices = @transform_9, window_bounds = array<i64: 32, 32>}, {pipeline_mode = #tpu.pipeline_mode<synchronous>, transform_indices = @transform_10, window_bounds = array<i64: 1, 32>}, {pipeline_mode = #tpu.pipeline_mode<synchronous>, transform_indices = @transform_11, window_bounds = array<i64: 32, 128>}, {pipeline_mode = #tpu.pipeline_mode<synchronous>, transform_indices = @transform_12, window_bounds = array<i64: 1, 128>}, {pipeline_mode = #tpu.pipeline_mode<synchronous>, transform_indices = @transform_13, window_bounds = array<i64: 1, 128>}, {pipeline_mode = #tpu.pipeline_mode<synchronous>, transform_indices = @transform_14, window_bounds = array<i64: 1, 128>}, {transform_indices = @transform_15, window_bounds = array<i64: 16, 128>}]} {
    %c0 = arith.constant 0 : index
    %c0_0 = arith.constant 0 : index
    %0 = vector.load %arg1[%c0, %c0_0] : memref<16x128xf32, #tpu.memory_space<vmem>>, vector<16x128xf32>
    %c0_1 = arith.constant 0 : index
    %c0_2 = arith.constant 0 : index
    %1 = vector.load %arg2[%c0_1, %c0_2] : memref<128x64xf32, #tpu.memory_space<vmem>>, vector<128x64xf32>
    %cst = arith.constant dense<0.000000e+00> : vector<16x64xf32>
    %2 = tpu.matmul %0, %1, %cst {dimension_numbers = #tpu.dot_dimension_numbers<[1], [0], [0], [1], [0, 0, 1, 1], [], []>} : vector<16x128xf32>, vector<128x64xf32>, vector<16x64xf32> -> vector<16x64xf32>
    %c0_3 = arith.constant 0 : index
    %c0_4 = arith.constant 0 : index
    %3 = vector.load %arg3[%c0_3, %c0_4] : memref<1x64xf32, #tpu.memory_space<vmem>>, vector<1x64xf32>
    %4 = vector.broadcast %3 : vector<1x64xf32> to vector<16x64xf32>
    %5 = arith.addf %2, %4 : vector<16x64xf32>
    %cst_5 = arith.constant 5.000000e-01 : f32
    %6 = vector.broadcast %cst_5 : f32 to vector<16x64xf32>
    %7 = arith.mulf %6, %5 : vector<16x64xf32>
    %cst_6 = arith.constant 0.707106769 : f32
    %8 = vector.broadcast %cst_6 : f32 to vector<16x64xf32>
    %9 = arith.mulf %5, %8 : vector<16x64xf32>
    %cst_7 = arith.constant -4.000000e+00 : f32
    %cst_8 = arith.constant 4.000000e+00 : f32
    %10 = vector.broadcast %cst_7 : f32 to vector<16x64xf32>
    %11 = arith.maximumf %10, %9 : vector<16x64xf32>
    %12 = vector.broadcast %cst_8 : f32 to vector<16x64xf32>
    %13 = arith.minimumf %12, %11 : vector<16x64xf32>
    %14 = arith.mulf %13, %13 : vector<16x64xf32>
    %cst_9 = arith.constant 2.29050653E-4 : f32
    %15 = vector.broadcast %cst_9 : f32 to vector<16x64xf32>
    %16 = arith.mulf %15, %14 : vector<16x64xf32>
    %cst_10 = arith.constant 0.00340829091 : f32
    %17 = vector.broadcast %cst_10 : f32 to vector<16x64xf32>
    %18 = arith.addf %16, %17 : vector<16x64xf32>
    %19 = arith.mulf %18, %14 : vector<16x64xf32>
    %cst_11 = arith.constant 0.0509556942 : f32
    %20 = vector.broadcast %cst_11 : f32 to vector<16x64xf32>
    %21 = arith.addf %19, %20 : vector<16x64xf32>
    %22 = arith.mulf %21, %14 : vector<16x64xf32>
    %cst_12 = arith.constant 0.185208321 : f32
    %23 = vector.broadcast %cst_12 : f32 to vector<16x64xf32>
    %24 = arith.addf %22, %23 : vector<16x64xf32>
    %25 = arith.mulf %24, %14 : vector<16x64xf32>
    %cst_13 = arith.constant 1.12837911 : f32
    %26 = vector.broadcast %cst_13 : f32 to vector<16x64xf32>
    %27 = arith.addf %25, %26 : vector<16x64xf32>
    %cst_14 = arith.constant -1.17916031E-7 : f32
    %28 = vector.broadcast %cst_14 : f32 to vector<16x64xf32>
    %29 = arith.mulf %28, %14 : vector<16x64xf32>
    %cst_15 = arith.constant 2.35479656E-5 : f32
    %30 = vector.broadcast %cst_15 : f32 to vector<16x64xf32>
    %31 = arith.addf %29, %30 : vector<16x64xf32>
    %32 = arith.mulf %31, %14 : vector<16x64xf32>
    %cst_16 = arith.constant 0.00101796258 : f32
    %33 = vector.broadcast %cst_16 : f32 to vector<16x64xf32>
    %34 = arith.addf %32, %33 : vector<16x64xf32>
    %35 = arith.mulf %34, %14 : vector<16x64xf32>
    %cst_17 = arith.constant 0.0140704699 : f32
    %36 = vector.broadcast %cst_17 : f32 to vector<16x64xf32>
    %37 = arith.addf %35, %36 : vector<16x64xf32>
    %38 = arith.mulf %37, %14 : vector<16x64xf32>
    %cst_18 = arith.constant 0.110985048 : f32
    %39 = vector.broadcast %cst_18 : f32 to vector<16x64xf32>
    %40 = arith.addf %38, %39 : vector<16x64xf32>
    %41 = arith.mulf %40, %14 : vector<16x64xf32>
    %cst_19 = arith.constant 0.497469246 : f32
    %42 = vector.broadcast %cst_19 : f32 to vector<16x64xf32>
    %43 = arith.addf %41, %42 : vector<16x64xf32>
    %44 = arith.mulf %43, %14 : vector<16x64xf32>
    %cst_20 = arith.constant 1.000000e+00 : f32
    %45 = vector.broadcast %cst_20 : f32 to vector<16x64xf32>
    %46 = arith.addf %44, %45 : vector<16x64xf32>
    %47 = arith.mulf %13, %27 : vector<16x64xf32>
    %48 = tpu.reciprocal %46 {approx = true} : vector<16x64xf32> -> vector<16x64xf32>
    %49 = arith.mulf %47, %48 : vector<16x64xf32>
    %cst_21 = arith.constant 1.000000e+00 : f32
    %50 = vector.broadcast %cst_21 : f32 to vector<16x64xf32>
    %51 = arith.addf %50, %49 : vector<16x64xf32>
    %52 = arith.mulf %7, %51 : vector<16x64xf32>
    %c0_22 = arith.constant 0 : index
    %c0_23 = arith.constant 0 : index
    %53 = vector.load %arg4[%c0_22, %c0_23] : memref<64x64xf32, #tpu.memory_space<vmem>>, vector<64x64xf32>
    %cst_24 = arith.constant dense<0.000000e+00> : vector<16x64xf32>
    %54 = tpu.matmul %52, %53, %cst_24 {dimension_numbers = #tpu.dot_dimension_numbers<[1], [0], [0], [1], [0, 0, 1, 1], [], []>} : vector<16x64xf32>, vector<64x64xf32>, vector<16x64xf32> -> vector<16x64xf32>
    %c0_25 = arith.constant 0 : index
    %c0_26 = arith.constant 0 : index
    %55 = vector.load %arg5[%c0_25, %c0_26] : memref<1x64xf32, #tpu.memory_space<vmem>>, vector<1x64xf32>
    %56 = vector.broadcast %55 : vector<1x64xf32> to vector<16x64xf32>
    %57 = arith.addf %54, %56 : vector<16x64xf32>
    %cst_27 = arith.constant 5.000000e-01 : f32
    %58 = vector.broadcast %cst_27 : f32 to vector<16x64xf32>
    %59 = arith.mulf %58, %57 : vector<16x64xf32>
    %cst_28 = arith.constant 0.707106769 : f32
    %60 = vector.broadcast %cst_28 : f32 to vector<16x64xf32>
    %61 = arith.mulf %57, %60 : vector<16x64xf32>
    %cst_29 = arith.constant -4.000000e+00 : f32
    %cst_30 = arith.constant 4.000000e+00 : f32
    %62 = vector.broadcast %cst_29 : f32 to vector<16x64xf32>
    %63 = arith.maximumf %62, %61 : vector<16x64xf32>
    %64 = vector.broadcast %cst_30 : f32 to vector<16x64xf32>
    %65 = arith.minimumf %64, %63 : vector<16x64xf32>
    %66 = arith.mulf %65, %65 : vector<16x64xf32>
    %cst_31 = arith.constant 2.29050653E-4 : f32
    %67 = vector.broadcast %cst_31 : f32 to vector<16x64xf32>
    %68 = arith.mulf %67, %66 : vector<16x64xf32>
    %cst_32 = arith.constant 0.00340829091 : f32
    %69 = vector.broadcast %cst_32 : f32 to vector<16x64xf32>
    %70 = arith.addf %68, %69 : vector<16x64xf32>
    %71 = arith.mulf %70, %66 : vector<16x64xf32>
    %cst_33 = arith.constant 0.0509556942 : f32
    %72 = vector.broadcast %cst_33 : f32 to vector<16x64xf32>
    %73 = arith.addf %71, %72 : vector<16x64xf32>
    %74 = arith.mulf %73, %66 : vector<16x64xf32>
    %cst_34 = arith.constant 0.185208321 : f32
    %75 = vector.broadcast %cst_34 : f32 to vector<16x64xf32>
    %76 = arith.addf %74, %75 : vector<16x64xf32>
    %77 = arith.mulf %76, %66 : vector<16x64xf32>
    %cst_35 = arith.constant 1.12837911 : f32
    %78 = vector.broadcast %cst_35 : f32 to vector<16x64xf32>
    %79 = arith.addf %77, %78 : vector<16x64xf32>
    %cst_36 = arith.constant -1.17916031E-7 : f32
    %80 = vector.broadcast %cst_36 : f32 to vector<16x64xf32>
    %81 = arith.mulf %80, %66 : vector<16x64xf32>
    %cst_37 = arith.constant 2.35479656E-5 : f32
    %82 = vector.broadcast %cst_37 : f32 to vector<16x64xf32>
    %83 = arith.addf %81, %82 : vector<16x64xf32>
    %84 = arith.mulf %83, %66 : vector<16x64xf32>
    %cst_38 = arith.constant 0.00101796258 : f32
    %85 = vector.broadcast %cst_38 : f32 to vector<16x64xf32>
    %86 = arith.addf %84, %85 : vector<16x64xf32>
    %87 = arith.mulf %86, %66 : vector<16x64xf32>
    %cst_39 = arith.constant 0.0140704699 : f32
    %88 = vector.broadcast %cst_39 : f32 to vector<16x64xf32>
    %89 = arith.addf %87, %88 : vector<16x64xf32>
    %90 = arith.mulf %89, %66 : vector<16x64xf32>
    %cst_40 = arith.constant 0.110985048 : f32
    %91 = vector.broadcast %cst_40 : f32 to vector<16x64xf32>
    %92 = arith.addf %90, %91 : vector<16x64xf32>
    %93 = arith.mulf %92, %66 : vector<16x64xf32>
    %cst_41 = arith.constant 0.497469246 : f32
    %94 = vector.broadcast %cst_41 : f32 to vector<16x64xf32>
    %95 = arith.addf %93, %94 : vector<16x64xf32>
    %96 = arith.mulf %95, %66 : vector<16x64xf32>
    %cst_42 = arith.constant 1.000000e+00 : f32
    %97 = vector.broadcast %cst_42 : f32 to vector<16x64xf32>
    %98 = arith.addf %96, %97 : vector<16x64xf32>
    %99 = arith.mulf %65, %79 : vector<16x64xf32>
    %100 = tpu.reciprocal %98 {approx = true} : vector<16x64xf32> -> vector<16x64xf32>
    %101 = arith.mulf %99, %100 : vector<16x64xf32>
    %cst_43 = arith.constant 1.000000e+00 : f32
    %102 = vector.broadcast %cst_43 : f32 to vector<16x64xf32>
    %103 = arith.addf %102, %101 : vector<16x64xf32>
    %104 = arith.mulf %59, %103 : vector<16x64xf32>
    %c0_44 = arith.constant 0 : index
    %c0_45 = arith.constant 0 : index
    %105 = vector.load %arg6[%c0_44, %c0_45] : memref<64x64xf32, #tpu.memory_space<vmem>>, vector<64x64xf32>
    %cst_46 = arith.constant dense<0.000000e+00> : vector<16x64xf32>
    %106 = tpu.matmul %104, %105, %cst_46 {dimension_numbers = #tpu.dot_dimension_numbers<[1], [0], [0], [1], [0, 0, 1, 1], [], []>} : vector<16x64xf32>, vector<64x64xf32>, vector<16x64xf32> -> vector<16x64xf32>
    %c0_47 = arith.constant 0 : index
    %c0_48 = arith.constant 0 : index
    %107 = vector.load %arg7[%c0_47, %c0_48] : memref<1x64xf32, #tpu.memory_space<vmem>>, vector<1x64xf32>
    %108 = vector.broadcast %107 : vector<1x64xf32> to vector<16x64xf32>
    %109 = arith.addf %106, %108 : vector<16x64xf32>
    %c0_49 = arith.constant 0 : index
    %c0_50 = arith.constant 0 : index
    %110 = vector.load %arg8[%c0_49, %c0_50] : memref<64x32xf32, #tpu.memory_space<vmem>>, vector<64x32xf32>
    %cst_51 = arith.constant dense<0.000000e+00> : vector<16x32xf32>
    %111 = tpu.matmul %109, %110, %cst_51 {dimension_numbers = #tpu.dot_dimension_numbers<[1], [0], [0], [1], [0, 0, 1, 1], [], []>} : vector<16x64xf32>, vector<64x32xf32>, vector<16x32xf32> -> vector<16x32xf32>
    %c0_52 = arith.constant 0 : index
    %c0_53 = arith.constant 0 : index
    %112 = vector.load %arg9[%c0_52, %c0_53] : memref<1x32xf32, #tpu.memory_space<vmem>>, vector<1x32xf32>
    %113 = vector.broadcast %112 : vector<1x32xf32> to vector<16x32xf32>
    %114 = arith.addf %111, %113 : vector<16x32xf32>
    %cst_54 = arith.constant 5.000000e-01 : f32
    %115 = vector.broadcast %cst_54 : f32 to vector<16x32xf32>
    %116 = arith.mulf %115, %114 : vector<16x32xf32>
    %cst_55 = arith.constant 0.707106769 : f32
    %117 = vector.broadcast %cst_55 : f32 to vector<16x32xf32>
    %118 = arith.mulf %114, %117 : vector<16x32xf32>
    %cst_56 = arith.constant -4.000000e+00 : f32
    %cst_57 = arith.constant 4.000000e+00 : f32
    %119 = vector.broadcast %cst_56 : f32 to vector<16x32xf32>
    %120 = arith.maximumf %119, %118 : vector<16x32xf32>
    %121 = vector.broadcast %cst_57 : f32 to vector<16x32xf32>
    %122 = arith.minimumf %121, %120 : vector<16x32xf32>
    %123 = arith.mulf %122, %122 : vector<16x32xf32>
    %cst_58 = arith.constant 2.29050653E-4 : f32
    %124 = vector.broadcast %cst_58 : f32 to vector<16x32xf32>
    %125 = arith.mulf %124, %123 : vector<16x32xf32>
    %cst_59 = arith.constant 0.00340829091 : f32
    %126 = vector.broadcast %cst_59 : f32 to vector<16x32xf32>
    %127 = arith.addf %125, %126 : vector<16x32xf32>
    %128 = arith.mulf %127, %123 : vector<16x32xf32>
    %cst_60 = arith.constant 0.0509556942 : f32
    %129 = vector.broadcast %cst_60 : f32 to vector<16x32xf32>
    %130 = arith.addf %128, %129 : vector<16x32xf32>
    %131 = arith.mulf %130, %123 : vector<16x32xf32>
    %cst_61 = arith.constant 0.185208321 : f32
    %132 = vector.broadcast %cst_61 : f32 to vector<16x32xf32>
    %133 = arith.addf %131, %132 : vector<16x32xf32>
    %134 = arith.mulf %133, %123 : vector<16x32xf32>
    %cst_62 = arith.constant 1.12837911 : f32
    %135 = vector.broadcast %cst_62 : f32 to vector<16x32xf32>
    %136 = arith.addf %134, %135 : vector<16x32xf32>
    %cst_63 = arith.constant -1.17916031E-7 : f32
    %137 = vector.broadcast %cst_63 : f32 to vector<16x32xf32>
    %138 = arith.mulf %137, %123 : vector<16x32xf32>
    %cst_64 = arith.constant 2.35479656E-5 : f32
    %139 = vector.broadcast %cst_64 : f32 to vector<16x32xf32>
    %140 = arith.addf %138, %139 : vector<16x32xf32>
    %141 = arith.mulf %140, %123 : vector<16x32xf32>
    %cst_65 = arith.constant 0.00101796258 : f32
    %142 = vector.broadcast %cst_65 : f32 to vector<16x32xf32>
    %143 = arith.addf %141, %142 : vector<16x32xf32>
    %144 = arith.mulf %143, %123 : vector<16x32xf32>
    %cst_66 = arith.constant 0.0140704699 : f32
    %145 = vector.broadcast %cst_66 : f32 to vector<16x32xf32>
    %146 = arith.addf %144, %145 : vector<16x32xf32>
    %147 = arith.mulf %146, %123 : vector<16x32xf32>
    %cst_67 = arith.constant 0.110985048 : f32
    %148 = vector.broadcast %cst_67 : f32 to vector<16x32xf32>
    %149 = arith.addf %147, %148 : vector<16x32xf32>
    %150 = arith.mulf %149, %123 : vector<16x32xf32>
    %cst_68 = arith.constant 0.497469246 : f32
    %151 = vector.broadcast %cst_68 : f32 to vector<16x32xf32>
    %152 = arith.addf %150, %151 : vector<16x32xf32>
    %153 = arith.mulf %152, %123 : vector<16x32xf32>
    %cst_69 = arith.constant 1.000000e+00 : f32
    %154 = vector.broadcast %cst_69 : f32 to vector<16x32xf32>
    %155 = arith.addf %153, %154 : vector<16x32xf32>
    %156 = arith.mulf %122, %136 : vector<16x32xf32>
    %157 = tpu.reciprocal %155 {approx = true} : vector<16x32xf32> -> vector<16x32xf32>
    %158 = arith.mulf %156, %157 : vector<16x32xf32>
    %cst_70 = arith.constant 1.000000e+00 : f32
    %159 = vector.broadcast %cst_70 : f32 to vector<16x32xf32>
    %160 = arith.addf %159, %158 : vector<16x32xf32>
    %161 = arith.mulf %116, %160 : vector<16x32xf32>
    %c0_71 = arith.constant 0 : index
    %c0_72 = arith.constant 0 : index
    %162 = vector.load %arg10[%c0_71, %c0_72] : memref<32x32xf32, #tpu.memory_space<vmem>>, vector<32x32xf32>
    %cst_73 = arith.constant dense<0.000000e+00> : vector<16x32xf32>
    %163 = tpu.matmul %161, %162, %cst_73 {dimension_numbers = #tpu.dot_dimension_numbers<[1], [0], [0], [1], [0, 0, 1, 1], [], []>} : vector<16x32xf32>, vector<32x32xf32>, vector<16x32xf32> -> vector<16x32xf32>
    %c0_74 = arith.constant 0 : index
    %c0_75 = arith.constant 0 : index
    %164 = vector.load %arg11[%c0_74, %c0_75] : memref<1x32xf32, #tpu.memory_space<vmem>>, vector<1x32xf32>
    %165 = vector.broadcast %164 : vector<1x32xf32> to vector<16x32xf32>
    %166 = arith.addf %163, %165 : vector<16x32xf32>
    %cst_76 = arith.constant 5.000000e-01 : f32
    %167 = vector.broadcast %cst_76 : f32 to vector<16x32xf32>
    %168 = arith.mulf %167, %166 : vector<16x32xf32>
    %cst_77 = arith.constant 0.707106769 : f32
    %169 = vector.broadcast %cst_77 : f32 to vector<16x32xf32>
    %170 = arith.mulf %166, %169 : vector<16x32xf32>
    %cst_78 = arith.constant -4.000000e+00 : f32
    %cst_79 = arith.constant 4.000000e+00 : f32
    %171 = vector.broadcast %cst_78 : f32 to vector<16x32xf32>
    %172 = arith.maximumf %171, %170 : vector<16x32xf32>
    %173 = vector.broadcast %cst_79 : f32 to vector<16x32xf32>
    %174 = arith.minimumf %173, %172 : vector<16x32xf32>
    %175 = arith.mulf %174, %174 : vector<16x32xf32>
    %cst_80 = arith.constant 2.29050653E-4 : f32
    %176 = vector.broadcast %cst_80 : f32 to vector<16x32xf32>
    %177 = arith.mulf %176, %175 : vector<16x32xf32>
    %cst_81 = arith.constant 0.00340829091 : f32
    %178 = vector.broadcast %cst_81 : f32 to vector<16x32xf32>
    %179 = arith.addf %177, %178 : vector<16x32xf32>
    %180 = arith.mulf %179, %175 : vector<16x32xf32>
    %cst_82 = arith.constant 0.0509556942 : f32
    %181 = vector.broadcast %cst_82 : f32 to vector<16x32xf32>
    %182 = arith.addf %180, %181 : vector<16x32xf32>
    %183 = arith.mulf %182, %175 : vector<16x32xf32>
    %cst_83 = arith.constant 0.185208321 : f32
    %184 = vector.broadcast %cst_83 : f32 to vector<16x32xf32>
    %185 = arith.addf %183, %184 : vector<16x32xf32>
    %186 = arith.mulf %185, %175 : vector<16x32xf32>
    %cst_84 = arith.constant 1.12837911 : f32
    %187 = vector.broadcast %cst_84 : f32 to vector<16x32xf32>
    %188 = arith.addf %186, %187 : vector<16x32xf32>
    %cst_85 = arith.constant -1.17916031E-7 : f32
    %189 = vector.broadcast %cst_85 : f32 to vector<16x32xf32>
    %190 = arith.mulf %189, %175 : vector<16x32xf32>
    %cst_86 = arith.constant 2.35479656E-5 : f32
    %191 = vector.broadcast %cst_86 : f32 to vector<16x32xf32>
    %192 = arith.addf %190, %191 : vector<16x32xf32>
    %193 = arith.mulf %192, %175 : vector<16x32xf32>
    %cst_87 = arith.constant 0.00101796258 : f32
    %194 = vector.broadcast %cst_87 : f32 to vector<16x32xf32>
    %195 = arith.addf %193, %194 : vector<16x32xf32>
    %196 = arith.mulf %195, %175 : vector<16x32xf32>
    %cst_88 = arith.constant 0.0140704699 : f32
    %197 = vector.broadcast %cst_88 : f32 to vector<16x32xf32>
    %198 = arith.addf %196, %197 : vector<16x32xf32>
    %199 = arith.mulf %198, %175 : vector<16x32xf32>
    %cst_89 = arith.constant 0.110985048 : f32
    %200 = vector.broadcast %cst_89 : f32 to vector<16x32xf32>
    %201 = arith.addf %199, %200 : vector<16x32xf32>
    %202 = arith.mulf %201, %175 : vector<16x32xf32>
    %cst_90 = arith.constant 0.497469246 : f32
    %203 = vector.broadcast %cst_90 : f32 to vector<16x32xf32>
    %204 = arith.addf %202, %203 : vector<16x32xf32>
    %205 = arith.mulf %204, %175 : vector<16x32xf32>
    %cst_91 = arith.constant 1.000000e+00 : f32
    %206 = vector.broadcast %cst_91 : f32 to vector<16x32xf32>
    %207 = arith.addf %205, %206 : vector<16x32xf32>
    %208 = arith.mulf %174, %188 : vector<16x32xf32>
    %209 = tpu.reciprocal %207 {approx = true} : vector<16x32xf32> -> vector<16x32xf32>
    %210 = arith.mulf %208, %209 : vector<16x32xf32>
    %cst_92 = arith.constant 1.000000e+00 : f32
    %211 = vector.broadcast %cst_92 : f32 to vector<16x32xf32>
    %212 = arith.addf %211, %210 : vector<16x32xf32>
    %213 = arith.mulf %168, %212 : vector<16x32xf32>
    %c0_93 = arith.constant 0 : index
    %c0_94 = arith.constant 0 : index
    %214 = vector.load %arg12[%c0_93, %c0_94] : memref<32x128xf32, #tpu.memory_space<vmem>>, vector<32x128xf32>
    %cst_95 = arith.constant dense<0.000000e+00> : vector<16x128xf32>
    %215 = tpu.matmul %213, %214, %cst_95 {dimension_numbers = #tpu.dot_dimension_numbers<[1], [0], [0], [1], [0, 0, 1, 1], [], []>} : vector<16x32xf32>, vector<32x128xf32>, vector<16x128xf32> -> vector<16x128xf32>
    %c0_96 = arith.constant 0 : index
    %c0_97 = arith.constant 0 : index
    %216 = vector.load %arg13[%c0_96, %c0_97] : memref<1x128xf32, #tpu.memory_space<vmem>>, vector<1x128xf32>
    %217 = vector.broadcast %216 : vector<1x128xf32> to vector<16x128xf32>
    %218 = arith.addf %215, %217 : vector<16x128xf32>
    %219 = math.tanh %218 : vector<16x128xf32>
    %c0_98 = arith.constant 0 : index
    %c0_99 = arith.constant 0 : index
    %220 = vector.load %arg14[%c0_98, %c0_99] : memref<1x128xf32, #tpu.memory_space<vmem>>, vector<1x128xf32>
    %221 = vector.broadcast %220 : vector<1x128xf32> to vector<16x128xf32>
    %222 = arith.mulf %219, %221 : vector<16x128xf32>
    %c0_100 = arith.constant 0 : index
    %c0_101 = arith.constant 0 : index
    %223 = vector.load %arg15[%c0_100, %c0_101] : memref<1x128xf32, #tpu.memory_space<vmem>>, vector<1x128xf32>
    %224 = vector.broadcast %223 : vector<1x128xf32> to vector<16x128xf32>
    %225 = arith.addf %222, %224 : vector<16x128xf32>
    %c0_102 = arith.constant 0 : index
    %c0_103 = arith.constant 0 : index
    %226 = vector.load %arg16[%c0_102, %c0_103] : memref<16x128xf32, #tpu.memory_space<vmem>>, vector<16x128xf32>
    tpu.vector_store %arg16[%c0_102, %c0_103], %225 {strides = array<i32>} : memref<16x128xf32, #tpu.memory_space<vmem>>, vector<16x128xf32>,
    return
  }
  func.func @transform_0(%arg0: i32) -> (i32, i32) {
    %c0_i32 = arith.constant 0 : i32
    %c0_i32_0 = arith.constant 0 : i32
    return %arg0, %c0_i32 : i32, i32
  }
  func.func @transform_1(%arg0: i32) -> (i32, i32) {
    %c0_i32 = arith.constant 0 : i32
    %c0_i32_0 = arith.constant 0 : i32
    %c0_i32_1 = arith.constant 0 : i32
    return %c0_i32, %c0_i32_0 : i32, i32
  }
  func.func @transform_2(%arg0: i32) -> (i32, i32) {
    %c0_i32 = arith.constant 0 : i32
    %c0_i32_0 = arith.constant 0 : i32
    %c0_i32_1 = arith.constant 0 : i32
    return %c0_i32, %c0_i32_0 : i32, i32
  }
  func.func @transform_3(%arg0: i32) -> (i32, i32) {
    %c0_i32 = arith.constant 0 : i32
    %c0_i32_0 = arith.constant 0 : i32
    %c0_i32_1 = arith.constant 0 : i32
    return %c0_i32, %c0_i32_0 : i32, i32
  }
  func.func @transform_4(%arg0: i32) -> (i32, i32) {
    %c0_i32 = arith.constant 0 : i32
    %c0_i32_0 = arith.constant 0 : i32
    %c0_i32_1 = arith.constant 0 : i32
    return %c0_i32, %c0_i32_0 : i32, i32
  }
  func.func @transform_5(%arg0: i32) -> (i32, i32) {
    %c0_i32 = arith.constant 0 : i32
    %c0_i32_0 = arith.constant 0 : i32
    %c0_i32_1 = arith.constant 0 : i32
    return %c0_i32, %c0_i32_0 : i32, i32
  }
  func.func @transform_6(%arg0: i32) -> (i32, i32) {
    %c0_i32 = arith.constant 0 : i32
    %c0_i32_0 = arith.constant 0 : i32
    %c0_i32_1 = arith.constant 0 : i32
    return %c0_i32, %c0_i32_0 : i32, i32
  }
  func.func @transform_7(%arg0: i32) -> (i32, i32) {
    %c0_i32 = arith.constant 0 : i32
    %c0_i32_0 = arith.constant 0 : i32
    %c0_i32_1 = arith.constant 0 : i32
    return %c0_i32, %c0_i32_0 : i32, i32
  }
  func.func @transform_8(%arg0: i32) -> (i32, i32) {
    %c0_i32 = arith.constant 0 : i32
    %c0_i32_0 = arith.constant 0 : i32
    %c0_i32_1 = arith.constant 0 : i32
    return %c0_i32, %c0_i32_0 : i32, i32
  }
  func.func @transform_9(%arg0: i32) -> (i32, i32) {
    %c0_i32 = arith.constant 0 : i32
    %c0_i32_0 = arith.constant 0 : i32
    %c0_i32_1 = arith.constant 0 : i32
    return %c0_i32, %c0_i32_0 : i32, i32
  }
  func.func @transform_10(%arg0: i32) -> (i32, i32) {
    %c0_i32 = arith.constant 0 : i32
    %c0_i32_0 = arith.constant 0 : i32
    %c0_i32_1 = arith.constant 0 : i32
    return %c0_i32, %c0_i32_0 : i32, i32
  }
  func.func @transform_11(%arg0: i32) -> (i32, i32) {
    %c0_i32 = arith.constant 0 : i32
    %c0_i32_0 = arith.constant 0 : i32
    %c0_i32_1 = arith.constant 0 : i32
    return %c0_i32, %c0_i32_0 : i32, i32
  }
  func.func @transform_12(%arg0: i32) -> (i32, i32) {
    %c0_i32 = arith.constant 0 : i32
    %c0_i32_0 = arith.constant 0 : i32
    %c0_i32_1 = arith.constant 0 : i32
    return %c0_i32, %c0_i32_0 : i32, i32
  }
  func.func @transform_13(%arg0: i32) -> (i32, i32) {
    %c0_i32 = arith.constant 0 : i32
    %c0_i32_0 = arith.constant 0 : i32
    %c0_i32_1 = arith.constant 0 : i32
    return %c0_i32, %c0_i32_0 : i32, i32
  }
  func.func @transform_14(%arg0: i32) -> (i32, i32) {
    %c0_i32 = arith.constant 0 : i32
    %c0_i32_0 = arith.constant 0 : i32
    %c0_i32_1 = arith.constant 0 : i32
    return %c0_i32, %c0_i32_0 : i32, i32
  }
  func.func @transform_15(%arg0: i32) -> (i32, i32) {
    %c0_i32 = arith.constant 0 : i32
    %c0_i32_0 = arith.constant 0 : i32
    return %arg0, %c0_i32 : i32, i32
  }
}

module attributes {stable_mosaic.version = 11 : i64} {
  func.func @kernel(%arg0: i32, %arg1: memref<8x128xf32, #tpu.memory_space<vmem>>, %arg2: memref<128x96xf32, #tpu.memory_space<vmem>>, %arg3: memref<1x96xf32, #tpu.memory_space<vmem>>, %arg4: memref<96x96xf32, #tpu.memory_space<vmem>>, %arg5: memref<1x96xf32, #tpu.memory_space<vmem>>, %arg6: memref<96x96xf32, #tpu.memory_space<vmem>>, %arg7: memref<1x96xf32, #tpu.memory_space<vmem>>, %arg8: memref<96x32xf32, #tpu.memory_space<vmem>>, %arg9: memref<1x32xf32, #tpu.memory_space<vmem>>, %arg10: memref<32x32xf32, #tpu.memory_space<vmem>>, %arg11: memref<1x32xf32, #tpu.memory_space<vmem>>, %arg12: memref<32x128xf32, #tpu.memory_space<vmem>>, %arg13: memref<1x128xf32, #tpu.memory_space<vmem>>, %arg14: memref<1x128xf32, #tpu.memory_space<vmem>>, %arg15: memref<1x128xf32, #tpu.memory_space<vmem>>, %arg16: memref<8x128xf32, #tpu.memory_space<vmem>>) attributes {dimension_semantics = [#tpu.dimension_semantics<parallel>], iteration_bounds = array<i64: 1>, scalar_prefetch = 0 : i64, scratch_operands = 0 : i64, tpu.core_type = #tpu.core_type<tc>, window_params = [{transform_indices = @transform_0, window_bounds = array<i64: 8, 128>}, {pipeline_mode = #tpu.pipeline_mode<synchronous>, transform_indices = @transform_1, window_bounds = array<i64: 128, 96>}, {pipeline_mode = #tpu.pipeline_mode<synchronous>, transform_indices = @transform_2, window_bounds = array<i64: 1, 96>}, {pipeline_mode = #tpu.pipeline_mode<synchronous>, transform_indices = @transform_3, window_bounds = array<i64: 96, 96>}, {pipeline_mode = #tpu.pipeline_mode<synchronous>, transform_indices = @transform_4, window_bounds = array<i64: 1, 96>}, {pipeline_mode = #tpu.pipeline_mode<synchronous>, transform_indices = @transform_5, window_bounds = array<i64: 96, 96>}, {pipeline_mode = #tpu.pipeline_mode<synchronous>, transform_indices = @transform_6, window_bounds = array<i64: 1, 96>}, {pipeline_mode = #tpu.pipeline_mode<synchronous>, transform_indices = @transform_7, window_bounds = array<i64: 96, 32>}, {pipeline_mode = #tpu.pipeline_mode<synchronous>, transform_indices = @transform_8, window_bounds = array<i64: 1, 32>}, {pipeline_mode = #tpu.pipeline_mode<synchronous>, transform_indices = @transform_9, window_bounds = array<i64: 32, 32>}, {pipeline_mode = #tpu.pipeline_mode<synchronous>, transform_indices = @transform_10, window_bounds = array<i64: 1, 32>}, {pipeline_mode = #tpu.pipeline_mode<synchronous>, transform_indices = @transform_11, window_bounds = array<i64: 32, 128>}, {pipeline_mode = #tpu.pipeline_mode<synchronous>, transform_indices = @transform_12, window_bounds = array<i64: 1, 128>}, {pipeline_mode = #tpu.pipeline_mode<synchronous>, transform_indices = @transform_13, window_bounds = array<i64: 1, 128>}, {pipeline_mode = #tpu.pipeline_mode<synchronous>, transform_indices = @transform_14, window_bounds = array<i64: 1, 128>}, {transform_indices = @transform_15, window_bounds = array<i64: 8, 128>}]} {
    %c0 = arith.constant 0 : index
    %c0_0 = arith.constant 0 : index
    %0 = vector.load %arg1[%c0, %c0_0] : memref<8x128xf32, #tpu.memory_space<vmem>>, vector<8x128xf32>
    %c0_1 = arith.constant 0 : index
    %c0_2 = arith.constant 0 : index
    %1 = vector.load %arg2[%c0_1, %c0_2] : memref<128x96xf32, #tpu.memory_space<vmem>>, vector<128x96xf32>
    %cst = arith.constant dense<0.000000e+00> : vector<8x96xf32>
    %2 = tpu.matmul %0, %1, %cst {dimension_numbers = #tpu.dot_dimension_numbers<[1], [0], [0], [1], [0, 0, 1, 1], [], []>} : vector<8x128xf32>, vector<128x96xf32>, vector<8x96xf32> -> vector<8x96xf32>
    %c0_3 = arith.constant 0 : index
    %c0_4 = arith.constant 0 : index
    %3 = vector.load %arg3[%c0_3, %c0_4] : memref<1x96xf32, #tpu.memory_space<vmem>>, vector<1x96xf32>
    %4 = vector.broadcast %3 : vector<1x96xf32> to vector<8x96xf32>
    %5 = arith.addf %2, %4 : vector<8x96xf32>
    %cst_5 = arith.constant 5.000000e-01 : f32
    %6 = vector.broadcast %cst_5 : f32 to vector<8x96xf32>
    %7 = arith.mulf %6, %5 : vector<8x96xf32>
    %cst_6 = arith.constant 0.707106769 : f32
    %8 = vector.broadcast %cst_6 : f32 to vector<8x96xf32>
    %9 = arith.mulf %5, %8 : vector<8x96xf32>
    %cst_7 = arith.constant -4.000000e+00 : f32
    %cst_8 = arith.constant 4.000000e+00 : f32
    %10 = vector.broadcast %cst_7 : f32 to vector<8x96xf32>
    %11 = arith.maximumf %10, %9 : vector<8x96xf32>
    %12 = vector.broadcast %cst_8 : f32 to vector<8x96xf32>
    %13 = arith.minimumf %12, %11 : vector<8x96xf32>
    %14 = arith.mulf %13, %13 : vector<8x96xf32>
    %cst_9 = arith.constant 2.29050653E-4 : f32
    %15 = vector.broadcast %cst_9 : f32 to vector<8x96xf32>
    %16 = arith.mulf %15, %14 : vector<8x96xf32>
    %cst_10 = arith.constant 0.00340829091 : f32
    %17 = vector.broadcast %cst_10 : f32 to vector<8x96xf32>
    %18 = arith.addf %16, %17 : vector<8x96xf32>
    %19 = arith.mulf %18, %14 : vector<8x96xf32>
    %cst_11 = arith.constant 0.0509556942 : f32
    %20 = vector.broadcast %cst_11 : f32 to vector<8x96xf32>
    %21 = arith.addf %19, %20 : vector<8x96xf32>
    %22 = arith.mulf %21, %14 : vector<8x96xf32>
    %cst_12 = arith.constant 0.185208321 : f32
    %23 = vector.broadcast %cst_12 : f32 to vector<8x96xf32>
    %24 = arith.addf %22, %23 : vector<8x96xf32>
    %25 = arith.mulf %24, %14 : vector<8x96xf32>
    %cst_13 = arith.constant 1.12837911 : f32
    %26 = vector.broadcast %cst_13 : f32 to vector<8x96xf32>
    %27 = arith.addf %25, %26 : vector<8x96xf32>
    %cst_14 = arith.constant -1.17916031E-7 : f32
    %28 = vector.broadcast %cst_14 : f32 to vector<8x96xf32>
    %29 = arith.mulf %28, %14 : vector<8x96xf32>
    %cst_15 = arith.constant 2.35479656E-5 : f32
    %30 = vector.broadcast %cst_15 : f32 to vector<8x96xf32>
    %31 = arith.addf %29, %30 : vector<8x96xf32>
    %32 = arith.mulf %31, %14 : vector<8x96xf32>
    %cst_16 = arith.constant 0.00101796258 : f32
    %33 = vector.broadcast %cst_16 : f32 to vector<8x96xf32>
    %34 = arith.addf %32, %33 : vector<8x96xf32>
    %35 = arith.mulf %34, %14 : vector<8x96xf32>
    %cst_17 = arith.constant 0.0140704699 : f32
    %36 = vector.broadcast %cst_17 : f32 to vector<8x96xf32>
    %37 = arith.addf %35, %36 : vector<8x96xf32>
    %38 = arith.mulf %37, %14 : vector<8x96xf32>
    %cst_18 = arith.constant 0.110985048 : f32
    %39 = vector.broadcast %cst_18 : f32 to vector<8x96xf32>
    %40 = arith.addf %38, %39 : vector<8x96xf32>
    %41 = arith.mulf %40, %14 : vector<8x96xf32>
    %cst_19 = arith.constant 0.497469246 : f32
    %42 = vector.broadcast %cst_19 : f32 to vector<8x96xf32>
    %43 = arith.addf %41, %42 : vector<8x96xf32>
    %44 = arith.mulf %43, %14 : vector<8x96xf32>
    %cst_20 = arith.constant 1.000000e+00 : f32
    %45 = vector.broadcast %cst_20 : f32 to vector<8x96xf32>
    %46 = arith.addf %44, %45 : vector<8x96xf32>
    %47 = arith.mulf %13, %27 : vector<8x96xf32>
    %48 = tpu.reciprocal %46 {approx = true} : vector<8x96xf32> -> vector<8x96xf32>
    %49 = arith.mulf %47, %48 : vector<8x96xf32>
    %cst_21 = arith.constant 1.000000e+00 : f32
    %50 = vector.broadcast %cst_21 : f32 to vector<8x96xf32>
    %51 = arith.addf %50, %49 : vector<8x96xf32>
    %52 = arith.mulf %7, %51 : vector<8x96xf32>
    %c0_22 = arith.constant 0 : index
    %c0_23 = arith.constant 0 : index
    %53 = vector.load %arg4[%c0_22, %c0_23] : memref<96x96xf32, #tpu.memory_space<vmem>>, vector<96x96xf32>
    %cst_24 = arith.constant dense<0.000000e+00> : vector<8x96xf32>
    %54 = tpu.matmul %52, %53, %cst_24 {dimension_numbers = #tpu.dot_dimension_numbers<[1], [0], [0], [1], [0, 0, 1, 1], [], []>} : vector<8x96xf32>, vector<96x96xf32>, vector<8x96xf32> -> vector<8x96xf32>
    %c0_25 = arith.constant 0 : index
    %c0_26 = arith.constant 0 : index
    %55 = vector.load %arg5[%c0_25, %c0_26] : memref<1x96xf32, #tpu.memory_space<vmem>>, vector<1x96xf32>
    %56 = vector.broadcast %55 : vector<1x96xf32> to vector<8x96xf32>
    %57 = arith.addf %54, %56 : vector<8x96xf32>
    %cst_27 = arith.constant 5.000000e-01 : f32
    %58 = vector.broadcast %cst_27 : f32 to vector<8x96xf32>
    %59 = arith.mulf %58, %57 : vector<8x96xf32>
    %cst_28 = arith.constant 0.707106769 : f32
    %60 = vector.broadcast %cst_28 : f32 to vector<8x96xf32>
    %61 = arith.mulf %57, %60 : vector<8x96xf32>
    %cst_29 = arith.constant -4.000000e+00 : f32
    %cst_30 = arith.constant 4.000000e+00 : f32
    %62 = vector.broadcast %cst_29 : f32 to vector<8x96xf32>
    %63 = arith.maximumf %62, %61 : vector<8x96xf32>
    %64 = vector.broadcast %cst_30 : f32 to vector<8x96xf32>
    %65 = arith.minimumf %64, %63 : vector<8x96xf32>
    %66 = arith.mulf %65, %65 : vector<8x96xf32>
    %cst_31 = arith.constant 2.29050653E-4 : f32
    %67 = vector.broadcast %cst_31 : f32 to vector<8x96xf32>
    %68 = arith.mulf %67, %66 : vector<8x96xf32>
    %cst_32 = arith.constant 0.00340829091 : f32
    %69 = vector.broadcast %cst_32 : f32 to vector<8x96xf32>
    %70 = arith.addf %68, %69 : vector<8x96xf32>
    %71 = arith.mulf %70, %66 : vector<8x96xf32>
    %cst_33 = arith.constant 0.0509556942 : f32
    %72 = vector.broadcast %cst_33 : f32 to vector<8x96xf32>
    %73 = arith.addf %71, %72 : vector<8x96xf32>
    %74 = arith.mulf %73, %66 : vector<8x96xf32>
    %cst_34 = arith.constant 0.185208321 : f32
    %75 = vector.broadcast %cst_34 : f32 to vector<8x96xf32>
    %76 = arith.addf %74, %75 : vector<8x96xf32>
    %77 = arith.mulf %76, %66 : vector<8x96xf32>
    %cst_35 = arith.constant 1.12837911 : f32
    %78 = vector.broadcast %cst_35 : f32 to vector<8x96xf32>
    %79 = arith.addf %77, %78 : vector<8x96xf32>
    %cst_36 = arith.constant -1.17916031E-7 : f32
    %80 = vector.broadcast %cst_36 : f32 to vector<8x96xf32>
    %81 = arith.mulf %80, %66 : vector<8x96xf32>
    %cst_37 = arith.constant 2.35479656E-5 : f32
    %82 = vector.broadcast %cst_37 : f32 to vector<8x96xf32>
    %83 = arith.addf %81, %82 : vector<8x96xf32>
    %84 = arith.mulf %83, %66 : vector<8x96xf32>
    %cst_38 = arith.constant 0.00101796258 : f32
    %85 = vector.broadcast %cst_38 : f32 to vector<8x96xf32>
    %86 = arith.addf %84, %85 : vector<8x96xf32>
    %87 = arith.mulf %86, %66 : vector<8x96xf32>
    %cst_39 = arith.constant 0.0140704699 : f32
    %88 = vector.broadcast %cst_39 : f32 to vector<8x96xf32>
    %89 = arith.addf %87, %88 : vector<8x96xf32>
    %90 = arith.mulf %89, %66 : vector<8x96xf32>
    %cst_40 = arith.constant 0.110985048 : f32
    %91 = vector.broadcast %cst_40 : f32 to vector<8x96xf32>
    %92 = arith.addf %90, %91 : vector<8x96xf32>
    %93 = arith.mulf %92, %66 : vector<8x96xf32>
    %cst_41 = arith.constant 0.497469246 : f32
    %94 = vector.broadcast %cst_41 : f32 to vector<8x96xf32>
    %95 = arith.addf %93, %94 : vector<8x96xf32>
    %96 = arith.mulf %95, %66 : vector<8x96xf32>
    %cst_42 = arith.constant 1.000000e+00 : f32
    %97 = vector.broadcast %cst_42 : f32 to vector<8x96xf32>
    %98 = arith.addf %96, %97 : vector<8x96xf32>
    %99 = arith.mulf %65, %79 : vector<8x96xf32>
    %100 = tpu.reciprocal %98 {approx = true} : vector<8x96xf32> -> vector<8x96xf32>
    %101 = arith.mulf %99, %100 : vector<8x96xf32>
    %cst_43 = arith.constant 1.000000e+00 : f32
    %102 = vector.broadcast %cst_43 : f32 to vector<8x96xf32>
    %103 = arith.addf %102, %101 : vector<8x96xf32>
    %104 = arith.mulf %59, %103 : vector<8x96xf32>
    %c0_44 = arith.constant 0 : index
    %c0_45 = arith.constant 0 : index
    %105 = vector.load %arg6[%c0_44, %c0_45] : memref<96x96xf32, #tpu.memory_space<vmem>>, vector<96x96xf32>
    %cst_46 = arith.constant dense<0.000000e+00> : vector<8x96xf32>
    %106 = tpu.matmul %104, %105, %cst_46 {dimension_numbers = #tpu.dot_dimension_numbers<[1], [0], [0], [1], [0, 0, 1, 1], [], []>} : vector<8x96xf32>, vector<96x96xf32>, vector<8x96xf32> -> vector<8x96xf32>
    %c0_47 = arith.constant 0 : index
    %c0_48 = arith.constant 0 : index
    %107 = vector.load %arg7[%c0_47, %c0_48] : memref<1x96xf32, #tpu.memory_space<vmem>>, vector<1x96xf32>
    %108 = vector.broadcast %107 : vector<1x96xf32> to vector<8x96xf32>
    %109 = arith.addf %106, %108 : vector<8x96xf32>
    %c0_49 = arith.constant 0 : index
    %c0_50 = arith.constant 0 : index
    %110 = vector.load %arg8[%c0_49, %c0_50] : memref<96x32xf32, #tpu.memory_space<vmem>>, vector<96x32xf32>
    %cst_51 = arith.constant dense<0.000000e+00> : vector<8x32xf32>
    %111 = tpu.matmul %109, %110, %cst_51 {dimension_numbers = #tpu.dot_dimension_numbers<[1], [0], [0], [1], [0, 0, 1, 1], [], []>} : vector<8x96xf32>, vector<96x32xf32>, vector<8x32xf32> -> vector<8x32xf32>
    %c0_52 = arith.constant 0 : index
    %c0_53 = arith.constant 0 : index
    %112 = vector.load %arg9[%c0_52, %c0_53] : memref<1x32xf32, #tpu.memory_space<vmem>>, vector<1x32xf32>
    %113 = vector.broadcast %112 : vector<1x32xf32> to vector<8x32xf32>
    %114 = arith.addf %111, %113 : vector<8x32xf32>
    %cst_54 = arith.constant 5.000000e-01 : f32
    %115 = vector.broadcast %cst_54 : f32 to vector<8x32xf32>
    %116 = arith.mulf %115, %114 : vector<8x32xf32>
    %cst_55 = arith.constant 0.707106769 : f32
    %117 = vector.broadcast %cst_55 : f32 to vector<8x32xf32>
    %118 = arith.mulf %114, %117 : vector<8x32xf32>
    %cst_56 = arith.constant -4.000000e+00 : f32
    %cst_57 = arith.constant 4.000000e+00 : f32
    %119 = vector.broadcast %cst_56 : f32 to vector<8x32xf32>
    %120 = arith.maximumf %119, %118 : vector<8x32xf32>
    %121 = vector.broadcast %cst_57 : f32 to vector<8x32xf32>
    %122 = arith.minimumf %121, %120 : vector<8x32xf32>
    %123 = arith.mulf %122, %122 : vector<8x32xf32>
    %cst_58 = arith.constant 2.29050653E-4 : f32
    %124 = vector.broadcast %cst_58 : f32 to vector<8x32xf32>
    %125 = arith.mulf %124, %123 : vector<8x32xf32>
    %cst_59 = arith.constant 0.00340829091 : f32
    %126 = vector.broadcast %cst_59 : f32 to vector<8x32xf32>
    %127 = arith.addf %125, %126 : vector<8x32xf32>
    %128 = arith.mulf %127, %123 : vector<8x32xf32>
    %cst_60 = arith.constant 0.0509556942 : f32
    %129 = vector.broadcast %cst_60 : f32 to vector<8x32xf32>
    %130 = arith.addf %128, %129 : vector<8x32xf32>
    %131 = arith.mulf %130, %123 : vector<8x32xf32>
    %cst_61 = arith.constant 0.185208321 : f32
    %132 = vector.broadcast %cst_61 : f32 to vector<8x32xf32>
    %133 = arith.addf %131, %132 : vector<8x32xf32>
    %134 = arith.mulf %133, %123 : vector<8x32xf32>
    %cst_62 = arith.constant 1.12837911 : f32
    %135 = vector.broadcast %cst_62 : f32 to vector<8x32xf32>
    %136 = arith.addf %134, %135 : vector<8x32xf32>
    %cst_63 = arith.constant -1.17916031E-7 : f32
    %137 = vector.broadcast %cst_63 : f32 to vector<8x32xf32>
    %138 = arith.mulf %137, %123 : vector<8x32xf32>
    %cst_64 = arith.constant 2.35479656E-5 : f32
    %139 = vector.broadcast %cst_64 : f32 to vector<8x32xf32>
    %140 = arith.addf %138, %139 : vector<8x32xf32>
    %141 = arith.mulf %140, %123 : vector<8x32xf32>
    %cst_65 = arith.constant 0.00101796258 : f32
    %142 = vector.broadcast %cst_65 : f32 to vector<8x32xf32>
    %143 = arith.addf %141, %142 : vector<8x32xf32>
    %144 = arith.mulf %143, %123 : vector<8x32xf32>
    %cst_66 = arith.constant 0.0140704699 : f32
    %145 = vector.broadcast %cst_66 : f32 to vector<8x32xf32>
    %146 = arith.addf %144, %145 : vector<8x32xf32>
    %147 = arith.mulf %146, %123 : vector<8x32xf32>
    %cst_67 = arith.constant 0.110985048 : f32
    %148 = vector.broadcast %cst_67 : f32 to vector<8x32xf32>
    %149 = arith.addf %147, %148 : vector<8x32xf32>
    %150 = arith.mulf %149, %123 : vector<8x32xf32>
    %cst_68 = arith.constant 0.497469246 : f32
    %151 = vector.broadcast %cst_68 : f32 to vector<8x32xf32>
    %152 = arith.addf %150, %151 : vector<8x32xf32>
    %153 = arith.mulf %152, %123 : vector<8x32xf32>
    %cst_69 = arith.constant 1.000000e+00 : f32
    %154 = vector.broadcast %cst_69 : f32 to vector<8x32xf32>
    %155 = arith.addf %153, %154 : vector<8x32xf32>
    %156 = arith.mulf %122, %136 : vector<8x32xf32>
    %157 = tpu.reciprocal %155 {approx = true} : vector<8x32xf32> -> vector<8x32xf32>
    %158 = arith.mulf %156, %157 : vector<8x32xf32>
    %cst_70 = arith.constant 1.000000e+00 : f32
    %159 = vector.broadcast %cst_70 : f32 to vector<8x32xf32>
    %160 = arith.addf %159, %158 : vector<8x32xf32>
    %161 = arith.mulf %116, %160 : vector<8x32xf32>
    %c0_71 = arith.constant 0 : index
    %c0_72 = arith.constant 0 : index
    %162 = vector.load %arg10[%c0_71, %c0_72] : memref<32x32xf32, #tpu.memory_space<vmem>>, vector<32x32xf32>
    %cst_73 = arith.constant dense<0.000000e+00> : vector<8x32xf32>
    %163 = tpu.matmul %161, %162, %cst_73 {dimension_numbers = #tpu.dot_dimension_numbers<[1], [0], [0], [1], [0, 0, 1, 1], [], []>} : vector<8x32xf32>, vector<32x32xf32>, vector<8x32xf32> -> vector<8x32xf32>
    %c0_74 = arith.constant 0 : index
    %c0_75 = arith.constant 0 : index
    %164 = vector.load %arg11[%c0_74, %c0_75] : memref<1x32xf32, #tpu.memory_space<vmem>>, vector<1x32xf32>
    %165 = vector.broadcast %164 : vector<1x32xf32> to vector<8x32xf32>
    %166 = arith.addf %163, %165 : vector<8x32xf32>
    %cst_76 = arith.constant 5.000000e-01 : f32
    %167 = vector.broadcast %cst_76 : f32 to vector<8x32xf32>
    %168 = arith.mulf %167, %166 : vector<8x32xf32>
    %cst_77 = arith.constant 0.707106769 : f32
    %169 = vector.broadcast %cst_77 : f32 to vector<8x32xf32>
    %170 = arith.mulf %166, %169 : vector<8x32xf32>
    %cst_78 = arith.constant -4.000000e+00 : f32
    %cst_79 = arith.constant 4.000000e+00 : f32
    %171 = vector.broadcast %cst_78 : f32 to vector<8x32xf32>
    %172 = arith.maximumf %171, %170 : vector<8x32xf32>
    %173 = vector.broadcast %cst_79 : f32 to vector<8x32xf32>
    %174 = arith.minimumf %173, %172 : vector<8x32xf32>
    %175 = arith.mulf %174, %174 : vector<8x32xf32>
    %cst_80 = arith.constant 2.29050653E-4 : f32
    %176 = vector.broadcast %cst_80 : f32 to vector<8x32xf32>
    %177 = arith.mulf %176, %175 : vector<8x32xf32>
    %cst_81 = arith.constant 0.00340829091 : f32
    %178 = vector.broadcast %cst_81 : f32 to vector<8x32xf32>
    %179 = arith.addf %177, %178 : vector<8x32xf32>
    %180 = arith.mulf %179, %175 : vector<8x32xf32>
    %cst_82 = arith.constant 0.0509556942 : f32
    %181 = vector.broadcast %cst_82 : f32 to vector<8x32xf32>
    %182 = arith.addf %180, %181 : vector<8x32xf32>
    %183 = arith.mulf %182, %175 : vector<8x32xf32>
    %cst_83 = arith.constant 0.185208321 : f32
    %184 = vector.broadcast %cst_83 : f32 to vector<8x32xf32>
    %185 = arith.addf %183, %184 : vector<8x32xf32>
    %186 = arith.mulf %185, %175 : vector<8x32xf32>
    %cst_84 = arith.constant 1.12837911 : f32
    %187 = vector.broadcast %cst_84 : f32 to vector<8x32xf32>
    %188 = arith.addf %186, %187 : vector<8x32xf32>
    %cst_85 = arith.constant -1.17916031E-7 : f32
    %189 = vector.broadcast %cst_85 : f32 to vector<8x32xf32>
    %190 = arith.mulf %189, %175 : vector<8x32xf32>
    %cst_86 = arith.constant 2.35479656E-5 : f32
    %191 = vector.broadcast %cst_86 : f32 to vector<8x32xf32>
    %192 = arith.addf %190, %191 : vector<8x32xf32>
    %193 = arith.mulf %192, %175 : vector<8x32xf32>
    %cst_87 = arith.constant 0.00101796258 : f32
    %194 = vector.broadcast %cst_87 : f32 to vector<8x32xf32>
    %195 = arith.addf %193, %194 : vector<8x32xf32>
    %196 = arith.mulf %195, %175 : vector<8x32xf32>
    %cst_88 = arith.constant 0.0140704699 : f32
    %197 = vector.broadcast %cst_88 : f32 to vector<8x32xf32>
    %198 = arith.addf %196, %197 : vector<8x32xf32>
    %199 = arith.mulf %198, %175 : vector<8x32xf32>
    %cst_89 = arith.constant 0.110985048 : f32
    %200 = vector.broadcast %cst_89 : f32 to vector<8x32xf32>
    %201 = arith.addf %199, %200 : vector<8x32xf32>
    %202 = arith.mulf %201, %175 : vector<8x32xf32>
    %cst_90 = arith.constant 0.497469246 : f32
    %203 = vector.broadcast %cst_90 : f32 to vector<8x32xf32>
    %204 = arith.addf %202, %203 : vector<8x32xf32>
    %205 = arith.mulf %204, %175 : vector<8x32xf32>
    %cst_91 = arith.constant 1.000000e+00 : f32
    %206 = vector.broadcast %cst_91 : f32 to vector<8x32xf32>
    %207 = arith.addf %205, %206 : vector<8x32xf32>
    %208 = arith.mulf %174, %188 : vector<8x32xf32>
    %209 = tpu.reciprocal %207 {approx = true} : vector<8x32xf32> -> vector<8x32xf32>
    %210 = arith.mulf %208, %209 : vector<8x32xf32>
    %cst_92 = arith.constant 1.000000e+00 : f32
    %211 = vector.broadcast %cst_92 : f32 to vector<8x32xf32>
    %212 = arith.addf %211, %210 : vector<8x32xf32>
    %213 = arith.mulf %168, %212 : vector<8x32xf32>
    %c0_93 = arith.constant 0 : index
    %c0_94 = arith.constant 0 : index
    %214 = vector.load %arg12[%c0_93, %c0_94] : memref<32x128xf32, #tpu.memory_space<vmem>>, vector<32x128xf32>
    %cst_95 = arith.constant dense<0.000000e+00> : vector<8x128xf32>
    %215 = tpu.matmul %213, %214, %cst_95 {dimension_numbers = #tpu.dot_dimension_numbers<[1], [0], [0], [1], [0, 0, 1, 1], [], []>} : vector<8x32xf32>, vector<32x128xf32>, vector<8x128xf32> -> vector<8x128xf32>
    %c0_96 = arith.constant 0 : index
    %c0_97 = arith.constant 0 : index
    %216 = vector.load %arg13[%c0_96, %c0_97] : memref<1x128xf32, #tpu.memory_space<vmem>>, vector<1x128xf32>
    %217 = vector.broadcast %216 : vector<1x128xf32> to vector<8x128xf32>
    %218 = arith.addf %215, %217 : vector<8x128xf32>
    %219 = math.tanh %218 : vector<8x128xf32>
    %c0_98 = arith.constant 0 : index
    %c0_99 = arith.constant 0 : index
    %220 = vector.load %arg14[%c0_98, %c0_99] : memref<1x128xf32, #tpu.memory_space<vmem>>, vector<1x128xf32>
    %221 = vector.broadcast %220 : vector<1x128xf32> to vector<8x128xf32>
    %222 = arith.mulf %219, %221 : vector<8x128xf32>
    %c0_100 = arith.constant 0 : index
    %c0_101 = arith.constant 0 : index
    %223 = vector.load %arg15[%c0_100, %c0_101] : memref<1x128xf32, #tpu.memory_space<vmem>>, vector<1x128xf32>
    %224 = vector.broadcast %223 : vector<1x128xf32> to vector<8x128xf32>
    %225 = arith.addf %222, %224 : vector<8x128xf32>
    %c0_102 = arith.constant 0 : index
    %c0_103 = arith.constant 0 : index
    %226 = vector.load %arg16[%c0_102, %c0_103] : memref<8x128xf32, #tpu.memory_space<vmem>>, vector<8x128xf32>
    tpu.vector_store %arg16[%c0_102, %c0_103], %225 {strides = array<i32>} : memref<8x128xf32, #tpu.memory_space<vmem>>, vector<8x128xf32>,
    return
  }
  func.func @transform_0(%arg0: i32) -> (i32, i32) {
    %c0_i32 = arith.constant 0 : i32
    %c0_i32_0 = arith.constant 0 : i32
    return %arg0, %c0_i32 : i32, i32
  }
  func.func @transform_1(%arg0: i32) -> (i32, i32) {
    %c0_i32 = arith.constant 0 : i32
    %c0_i32_0 = arith.constant 0 : i32
    %c0_i32_1 = arith.constant 0 : i32
    return %c0_i32, %c0_i32_0 : i32, i32
  }
  func.func @transform_2(%arg0: i32) -> (i32, i32) {
    %c0_i32 = arith.constant 0 : i32
    %c0_i32_0 = arith.constant 0 : i32
    %c0_i32_1 = arith.constant 0 : i32
    return %c0_i32, %c0_i32_0 : i32, i32
  }
  func.func @transform_3(%arg0: i32) -> (i32, i32) {
    %c0_i32 = arith.constant 0 : i32
    %c0_i32_0 = arith.constant 0 : i32
    %c0_i32_1 = arith.constant 0 : i32
    return %c0_i32, %c0_i32_0 : i32, i32
  }
  func.func @transform_4(%arg0: i32) -> (i32, i32) {
    %c0_i32 = arith.constant 0 : i32
    %c0_i32_0 = arith.constant 0 : i32
    %c0_i32_1 = arith.constant 0 : i32
    return %c0_i32, %c0_i32_0 : i32, i32
  }
  func.func @transform_5(%arg0: i32) -> (i32, i32) {
    %c0_i32 = arith.constant 0 : i32
    %c0_i32_0 = arith.constant 0 : i32
    %c0_i32_1 = arith.constant 0 : i32
    return %c0_i32, %c0_i32_0 : i32, i32
  }
  func.func @transform_6(%arg0: i32) -> (i32, i32) {
    %c0_i32 = arith.constant 0 : i32
    %c0_i32_0 = arith.constant 0 : i32
    %c0_i32_1 = arith.constant 0 : i32
    return %c0_i32, %c0_i32_0 : i32, i32
  }
  func.func @transform_7(%arg0: i32) -> (i32, i32) {
    %c0_i32 = arith.constant 0 : i32
    %c0_i32_0 = arith.constant 0 : i32
    %c0_i32_1 = arith.constant 0 : i32
    return %c0_i32, %c0_i32_0 : i32, i32
  }
  func.func @transform_8(%arg0: i32) -> (i32, i32) {
    %c0_i32 = arith.constant 0 : i32
    %c0_i32_0 = arith.constant 0 : i32
    %c0_i32_1 = arith.constant 0 : i32
    return %c0_i32, %c0_i32_0 : i32, i32
  }
  func.func @transform_9(%arg0: i32) -> (i32, i32) {
    %c0_i32 = arith.constant 0 : i32
    %c0_i32_0 = arith.constant 0 : i32
    %c0_i32_1 = arith.constant 0 : i32
    return %c0_i32, %c0_i32_0 : i32, i32
  }
  func.func @transform_10(%arg0: i32) -> (i32, i32) {
    %c0_i32 = arith.constant 0 : i32
    %c0_i32_0 = arith.constant 0 : i32
    %c0_i32_1 = arith.constant 0 : i32
    return %c0_i32, %c0_i32_0 : i32, i32
  }
  func.func @transform_11(%arg0: i32) -> (i32, i32) {
    %c0_i32 = arith.constant 0 : i32
    %c0_i32_0 = arith.constant 0 : i32
    %c0_i32_1 = arith.constant 0 : i32
    return %c0_i32, %c0_i32_0 : i32, i32
  }
  func.func @transform_12(%arg0: i32) -> (i32, i32) {
    %c0_i32 = arith.constant 0 : i32
    %c0_i32_0 = arith.constant 0 : i32
    %c0_i32_1 = arith.constant 0 : i32
    return %c0_i32, %c0_i32_0 : i32, i32
  }
  func.func @transform_13(%arg0: i32) -> (i32, i32) {
    %c0_i32 = arith.constant 0 : i32
    %c0_i32_0 = arith.constant 0 : i32
    %c0_i32_1 = arith.constant 0 : i32
    return %c0_i32, %c0_i32_0 : i32, i32
  }
  func.func @transform_14(%arg0: i32) -> (i32, i32) {
    %c0_i32 = arith.constant 0 : i32
    %c0_i32_0 = arith.constant 0 : i32
    %c0_i32_1 = arith.constant 0 : i32
    return %c0_i32, %c0_i32_0 : i32, i32
  }
  func.func @transform_15(%arg0: i32) -> (i32, i32) {
    %c0_i32 = arith.constant 0 : i32
    %c0_i32_0 = arith.constant 0 : i32
    return %arg0, %c0_i32 : i32, i32
  }
}

</mosaic_0001>

<bundles_post_ra>
// kernel: forward.5
= control target key start
LH: loop header
LB: loop body
LE: loop exit
PB: predicated region body
PF: predicated region fallthrough
CT: control target
= control target key end

     0   :  { %vm45_vm0 = vcmask 261120   ;;  %vm206_vm1 = vcmask 785408   ;;  %s821_s1 = inlined_call_operand.vmem [shape: f32[32,96], index: 1, kind: input, shape index: {}]   ;;  %s822_s0 = inlined_call_operand.vmem [shape: f32[16,32], index: 0, kind: input, shape index: {}]   ;;  %s823_s3 = inlined_call_operand.vmem [shape: f32[96,96], index: 3, kind: input, shape index: {}]   ;;  %s824_s2 = inlined_call_operand.vmem [shape: f32[1,96], index: 2, kind: input, shape index: {}]   ;;  %s825_s5 = inlined_call_operand.vmem [shape: f32[96,128], index: 5, kind: input, shape index: {}]   ;;  %s826_s4 = inlined_call_operand.vmem [shape: f32[1,96], index: 4, kind: input, shape index: {}]   ;;  %s827_s6 = inlined_call_operand.vmem [shape: f32[1,128], index: 6, kind: input, shape index: {}]   ;;  %s828_s7 = inlined_call_operand.vmem [shape: f32[1,128], index: 7, kind: input, shape index: {}]   ;;  %s829_s8 = inlined_call_operand.vmem [shape: f32[1,128], index: 8, kind: input, shape index: {}]   ;;  %s830_s9 = inlined_call_operand.vmem [shape: f32[16,128], index: 9, kind: output, shape index: {}]  }
   0x1   :  { %v34_v0 = vld [vmem:[%s821_s1] sm:$0xff]  ;;  %v35_v1 = vld [vmem:[%s821_s1 + $0x8] sm:$0xff]  ;;  %v36_v2 = vld [vmem:[%s821_s1 + $0x10] sm:$0xff] }
   0x2   :  { %v588_v3 = vpack.c.bf16 %v35_v1, %v34_v0  ;;  %v37_v4 = vld [vmem:[%s821_s1 + $0x18] sm:$0xff]  ;;  %v32_v5 = vld [vmem:[%s822_s0] sm:$0xff]  ;;  %v33_v7 = vld [vmem:[%s822_s0 + $0x8] sm:$0xff] }
   0x3   :  { %v592_v6 = vpack.c.bf16 %v37_v4, %v36_v2  ;;  %531 = vmatprep.mubr.msk.f32.mxu0 %vm45_vm0, %v32_v5  ;;  %v187_v8 = vld [vmem:[%s823_s3] sm:$0xff]  ;;  %v188_v9 = vld [vmem:[%s823_s3 + $0x8] sm:$0xff]  ;;  %v189_v11 = vld [vmem:[%s823_s3 + $0x10] sm:$0xff] }
   0x4   :  { %589 = vmatprep.subr.bf16.mxu0 %v588_v3  ;;  %v596_v10 = vpack.c.bf16 %v188_v9, %v187_v8  ;;  %v190_v12 = vld [vmem:[%s823_s3 + $0x18] sm:$0xff]  ;;  %v191_v14 = vld [vmem:[%s823_s3 + $0x20] sm:$0xff]  ;;  %v192_v15 = vld [vmem:[%s823_s3 + $0x28] sm:$0xff] }
   0x5   :  { %591 = vmatpush3.bf16.msra.mxu0 %v588_v3  ;;  %v600_v13 = vpack.c.bf16 %v190_v12, %v189_v11  ;;  %v604_v16 = vpack.c.bf16 %v192_v15, %v191_v14  ;;  %v193_v17 = vld [vmem:[%s823_s3 + $0x30] sm:$0xff]  ;;  %v194_v18 = vld [vmem:[%s823_s3 + $0x38] sm:$0xff]  ;;  %v195_v20 = vld [vmem:[%s823_s3 + $0x40] sm:$0xff] }
   0x6   :  { %593 = vmatprep.subr.bf16.mxu0 %v592_v6  ;;  %597 = vmatprep.subr.bf16.mxu1 %v596_v10  ;;  %v608_v19 = vpack.c.bf16 %v194_v18, %v193_v17  ;;  %v196_v21 = vld [vmem:[%s823_s3 + $0x48] sm:$0xff]  ;;  %v197_v23 = vld [vmem:[%s823_s3 + $0x50] sm:$0xff]  ;;  %v198_v24 = vld [vmem:[%s823_s3 + $0x58] sm:$0xff] }
   0x7   :  { %599 = vmatpush3.bf16.msra.mxu1 %v596_v10  ;;  %v612_v22 = vpack.c.bf16 %v196_v21, %v195_v20  ;;  %v616_v25 = vpack.c.bf16 %v198_v24, %v197_v23  ;;  %v474_v26 = vld [vmem:[%s824_s2] ss:$0 sm:$0xff] }
   0x8   :  { %601 = vmatprep.subr.bf16.mxu1 %v600_v13 }
   0x9   :  { %595 = vmatpush3.bf16.msra.mxu0 %v592_v6 }
   0xb   :  { %603 = vmatpush3.bf16.msra.mxu1 %v600_v13 }
   0xc   :  { %532 = vmatmul.mubr.msk.f32.vlgmr.msra.gmra.mrb[0].mxu0 %vm45_vm0, %v33_v7  ;;  %605 = vmatprep.subr.bf16.mxu1 %v604_v16 }
   0xf   :  { %607 = vmatpush3.bf16.msra.mxu1 %v604_v16 }
  0x10   :  { %609 = vmatprep.subr.bf16.mxu1 %v608_v19 }
  0x13   :  { %611 = vmatpush3.bf16.msra.mxu1 %v608_v19 }
  0x14   :  { %613 = vmatprep.subr.bf16.mxu1 %v612_v22 }
  0x17   :  { %615 = vmatpush3.bf16.msra.mxu1 %v612_v22 }
  0x18   :  { %617 = vmatprep.subr.bf16.mxu1 %v616_v25 }
  0x1b   :  { %619 = vmatpush3.bf16.msra.mxu1 %v616_v25  ;;  %v348_v25 = vld [vmem:[%s825_s5] sm:$0xff] }
  0xdf   :  { %v533_v27 = vpop.f32.mrb[0].mxu0 }
  0xe0   :  { %v124_v28 = vadd.f32 %v533_v27, %v474_v26  ;;  %v118_v29 = vpop.f32.mrb[1].mxu0 }
  0xe1   :  { %v119_v30 = vadd.f32 %v474_v26, %v118_v29  ;;  %v349_v26 = vld [vmem:[%s825_s5 + $0x8] sm:$0xff]  ;;  %v351_v29 = vld [vmem:[%s825_s5 + $0x18] sm:$0xff] }
  0xe2   :  { %v130_v31 = vmul.f32 0.70710677, %v124_v28  ;;  %v128_v22 = vmul.f32 0.5, %v124_v28  ;;  %v620_v27 = vpack.c.bf16 %v349_v26, %v348_v25  ;;  %v350_v28 = vld [vmem:[%s825_s5 + $0x10] sm:$0xff] }
  0xe3   :  { %v129_v32 = vmul.f32 0.70710677, %v119_v30  ;;  %v127_v20 = vmul.f32 0.5, %v119_v30  ;;  %v624_v30 = vpack.c.bf16 %v351_v29, %v350_v28 }
  0xe4   :  { %v478_v33 = vclamps-f32 %v130_v31, 4.0  ;;  %621 = vmatprep.subr.bf16.mxu0 %v620_v27  ;;  %v352_v31 = vld [vmem:[%s825_s5 + $0x20] sm:$0xff] }
  0xe5   :  { %v477_v34 = vclamps-f32 %v129_v32, 4.0  ;;  %623 = vmatpush3.bf16.msra.mxu0 %v620_v27  ;;  %v353_v32 = vld [vmem:[%s825_s5 + $0x28] sm:$0xff] }
  0xe6   :  { %v136_v35 = vmul.f32 %v478_v33, %v478_v33  ;;  %625 = vmatprep.subr.bf16.mxu0 %v624_v30 }
  0xe7   :  { %v135_v36 = vmul.f32 %v477_v34, %v477_v34 }
  0xe8   :  { %v154_v37 = vmul.f32 -1.1791603e-07, %v136_v35  ;;  %v138_v38 = vmul.f32 0.00022905065, %v136_v35 }
  0xe9   :  { %v153_v39 = vmul.f32 -1.1791603e-07, %v135_v36  ;;  %v137_v41 = vmul.f32 0.00022905065, %v135_v36  ;;  %627 = vmatpush3.bf16.msra.mxu0 %v624_v30 }
  0xea   :  { %v156_v40 = vadd.f32 2.3547966e-05, %v154_v37  ;;  %v140_v44 = vadd.f32 0.003408291, %v138_v38  ;;  %v356_v37 = vld [vmem:[%s825_s5 + $0x40] sm:$0xff]  ;;  %v357_v38 = vld [vmem:[%s825_s5 + $0x48] sm:$0xff] }
  0xeb   :  { %v155_v42 = vadd.f32 2.3547966e-05, %v153_v39  ;;  %v139_v47 = vadd.f32 0.003408291, %v137_v41  ;;  %v636_v39 = vpack.c.bf16 %v357_v38, %v356_v37  ;;  %v359_v41 = vld [vmem:[%s825_s5 + $0x58] sm:$0xff] }
  0xec   :  { %v158_v43 = vmul.f32 %v156_v40, %v136_v35  ;;  %v142_v50 = vmul.f32 %v140_v44, %v136_v35  ;;  %v358_v40 = vld [vmem:[%s825_s5 + $0x50] sm:$0xff] }
  0xed   :  { %v157_v45 = vmul.f32 %v155_v42, %v135_v36  ;;  %v141_v53 = vmul.f32 %v139_v47, %v135_v36  ;;  %v640_v42 = vpack.c.bf16 %v359_v41, %v358_v40 }
  0xee   :  { %v160_v46 = vadd.f32 0.0010179626, %v158_v43  ;;  %v144_v56 = vadd.f32 0.050955694, %v142_v50  ;;  %v479_v43 = vld [vmem:[%s826_s4] ss:$0 sm:$0xff] }
  0xef   :  { %v159_v48 = vadd.f32 0.0010179626, %v157_v45  ;;  %v143_v59 = vadd.f32 0.050955694, %v141_v53 }
  0xf0   :  { %v162_v49 = vmul.f32 %v160_v46, %v136_v35  ;;  %v146_v62 = vmul.f32 %v144_v56, %v136_v35 }
  0xf1   :  { %v161_v51 = vmul.f32 %v159_v48, %v135_v36  ;;  %v145_v1 = vmul.f32 %v143_v59, %v135_v36 }
  0xf2   :  { %v164_v52 = vadd.f32 0.01407047, %v162_v49  ;;  %v148_v4 = vadd.f32 0.18520832, %v146_v62 }
  0xf3   :  { %v163_v54 = vadd.f32 0.01407047, %v161_v51  ;;  %v147_v7 = vadd.f32 0.18520832, %v145_v1 }
  0xf4   :  { %v166_v55 = vmul.f32 %v164_v52, %v136_v35  ;;  %v150_v9 = vmul.f32 %v148_v4, %v136_v35 }
  0xf5   :  { %v165_v57 = vmul.f32 %v163_v54, %v135_v36  ;;  %v149_v10 = vmul.f32 %v147_v7, %v135_v36 }
  0xf6   :  { %v168_v58 = vadd.f32 0.11098505, %v166_v55  ;;  %v152_v11 = vadd.f32 1.1283791, %v150_v9 }
  0xf7   :  { %v167_v60 = vadd.f32 0.11098505, %v165_v57  ;;  %v151_v12 = vadd.f32 1.1283791, %v149_v10 }
  0xf8   :  { %v170_v61 = vmul.f32 %v168_v58, %v136_v35  ;;  %v178_v13 = vmul.f32 %v478_v33, %v152_v11  ;;  %v628_v33 = vpack.c.bf16 %v353_v32, %v352_v31 }
  0xf9   :  { %v169_v63 = vmul.f32 %v167_v60, %v135_v36  ;;  %v177_v15 = vmul.f32 %v477_v34, %v151_v12  ;;  %v354_v34 = vld [vmem:[%s825_s5 + $0x30] sm:$0xff] }
  0xfa   :  { %v172_v0 = vadd.f32 0.49746925, %v170_v61  ;;  %629 = vmatprep.subr.bf16.mxu0 %v628_v33 }
  0xfb   :  { %v171_v2 = vadd.f32 0.49746925, %v169_v63  ;;  %631 = vmatpush3.bf16.msra.mxu0 %v628_v33 }
  0xfc   :  { %v174_v3 = vmul.f32 %v172_v0, %v136_v35  ;;  %v355_v35 = vld [vmem:[%s825_s5 + $0x38] sm:$0xff] }
  0xfd   :  { %v173_v5 = vmul.f32 %v171_v2, %v135_v36  ;;  %v632_v36 = vpack.c.bf16 %v355_v35, %v354_v34 }
  0xfe   :  { %v176_v6 = vadd.f32 1.0, %v174_v3 }
  0xff   :  { %v175_v8 = vadd.f32 1.0, %v173_v5  ;;  %633 = vmatprep.subr.bf16.mxu0 %v632_v36 }
 0x100   :  { %644 = vrcp.f32 %v176_v6  ;;  %635 = vmatpush3.bf16.msra.mxu0 %v632_v36 }
 0x101   :  { %646 = vrcp.f32 %v175_v8  ;;  %637 = vmatprep.subr.bf16.mxu0 %v636_v39 }
 0x104   :  { %639 = vmatpush3.bf16.msra.mxu0 %v636_v39 }
 0x105   :  { %641 = vmatprep.subr.bf16.mxu0 %v640_v42 }
 0x108   :  { %643 = vmatpush3.bf16.msra.mxu0 %v640_v42  ;;  %v484_v42 = vld [vmem:[%s827_s6] ss:$0 sm:$0xff] }
 0x10a   :  { %v645_v14 = vpop.eup %644 }
 0x10b   :  { %v647_v16 = vpop.eup %646  ;;  %v182_v17 = vmul.f32 %v645_v14, %v178_v13 }
 0x10c   :  { %v181_v18 = vmul.f32 %v647_v16, %v177_v15 }
 0x10d   :  { %v184_v19 = vadd.f32 1.0, %v182_v17 }
 0x10e   :  { %v183_v21 = vadd.f32 1.0, %v181_v18 }
 0x10f   :  { %v186_v24 = vmul.f32 %v184_v19, %v128_v22 }
 0x110   :  { %v185_v23 = vmul.f32 %v183_v21, %v127_v20 }
 0x112   :  { %558 = vmatprep.mubr.msk.f32.mxu1 %vm206_vm1, %v185_v23 }
 0x113   :  { %559 = vmatmul.mubr.msk.f32.vlgmr.msra.gmra.mrb[0].mxu1 %vm206_vm1, %v186_v24 }
 0x1e6   :  { %v560_v44 = vpop.f32.mrb[0].mxu1 }
 0x1e7   :  { %v285_v45 = vadd.f32 %v560_v44, %v479_v43  ;;  %v279_v46 = vpop.f32.mrb[1].mxu1 }
 0x1e8   :  { %v280_v47 = vadd.f32 %v479_v43, %v279_v46 }
 0x1e9   :  { %v291_v48 = vmul.f32 0.70710677, %v285_v45  ;;  %v289_v39 = vmul.f32 0.5, %v285_v45  ;;  %v487_v45 = vld [vmem:[%s828_s7] ss:$0 sm:$0xff] }
 0x1ea   :  { %v290_v49 = vmul.f32 0.70710677, %v280_v47  ;;  %v288_v37 = vmul.f32 0.5, %v280_v47 }
 0x1eb   :  { %v483_v50 = vclamps-f32 %v291_v48, 4.0 }
 0x1ec   :  { %v482_v51 = vclamps-f32 %v290_v49, 4.0  ;;  %v488_v49 = vld [vmem:[%s829_s8] ss:$0 sm:$0xff] }
 0x1ed   :  { %v297_v52 = vmul.f32 %v483_v50, %v483_v50 }
 0x1ee   :  { %v296_v53 = vmul.f32 %v482_v51, %v482_v51 }
 0x1ef   :  { %v315_v54 = vmul.f32 -1.1791603e-07, %v297_v52  ;;  %v299_v55 = vmul.f32 0.00022905065, %v297_v52 }
 0x1f0   :  { %v314_v56 = vmul.f32 -1.1791603e-07, %v296_v53  ;;  %v298_v58 = vmul.f32 0.00022905065, %v296_v53 }
 0x1f1   :  { %v317_v57 = vadd.f32 2.3547966e-05, %v315_v54  ;;  %v301_v61 = vadd.f32 0.003408291, %v299_v55 }
 0x1f2   :  { %v316_v59 = vadd.f32 2.3547966e-05, %v314_v56  ;;  %v300_v0 = vadd.f32 0.003408291, %v298_v58 }
 0x1f3   :  { %v319_v60 = vmul.f32 %v317_v57, %v297_v52  ;;  %v303_v3 = vmul.f32 %v301_v61, %v297_v52 }
 0x1f4   :  { %v318_v62 = vmul.f32 %v316_v59, %v296_v53  ;;  %v302_v6 = vmul.f32 %v300_v0, %v296_v53 }
 0x1f5   :  { %v321_v63 = vadd.f32 0.0010179626, %v319_v60  ;;  %v305_v9 = vadd.f32 0.050955694, %v303_v3 }
 0x1f6   :  { %v320_v1 = vadd.f32 0.0010179626, %v318_v62  ;;  %v304_v12 = vadd.f32 0.050955694, %v302_v6 }
 0x1f7   :  { %v323_v2 = vmul.f32 %v321_v63, %v297_v52  ;;  %v307_v15 = vmul.f32 %v305_v9, %v297_v52 }
 0x1f8   :  { %v322_v4 = vmul.f32 %v320_v1, %v296_v53  ;;  %v306_v18 = vmul.f32 %v304_v12, %v296_v53 }
 0x1f9   :  { %v325_v5 = vadd.f32 0.01407047, %v323_v2  ;;  %v309_v21 = vadd.f32 0.18520832, %v307_v15 }
 0x1fa   :  { %v324_v7 = vadd.f32 0.01407047, %v322_v4  ;;  %v308_v24 = vadd.f32 0.18520832, %v306_v18 }
 0x1fb   :  { %v327_v8 = vmul.f32 %v325_v5, %v297_v52  ;;  %v311_v26 = vmul.f32 %v309_v21, %v297_v52 }
 0x1fc   :  { %v326_v10 = vmul.f32 %v324_v7, %v296_v53  ;;  %v310_v27 = vmul.f32 %v308_v24, %v296_v53 }
 0x1fd   :  { %v329_v11 = vadd.f32 0.11098505, %v327_v8  ;;  %v313_v28 = vadd.f32 1.1283791, %v311_v26 }
 0x1fe   :  { %v328_v13 = vadd.f32 0.11098505, %v326_v10  ;;  %v312_v29 = vadd.f32 1.1283791, %v310_v27 }
 0x1ff   :  { %v331_v14 = vmul.f32 %v329_v11, %v297_v52  ;;  %v339_v30 = vmul.f32 %v483_v50, %v313_v28 }
 0x200   :  { %v330_v16 = vmul.f32 %v328_v13, %v296_v53  ;;  %v338_v32 = vmul.f32 %v482_v51, %v312_v29 }
 0x201   :  { %v333_v17 = vadd.f32 0.49746925, %v331_v14 }
 0x202   :  { %v332_v19 = vadd.f32 0.49746925, %v330_v16 }
 0x203   :  { %v335_v20 = vmul.f32 %v333_v17, %v297_v52 }
 0x204   :  { %v334_v22 = vmul.f32 %v332_v19, %v296_v53 }
 0x205   :  { %v337_v23 = vadd.f32 1.0, %v335_v20 }
 0x206   :  { %v336_v25 = vadd.f32 1.0, %v334_v22 }
 0x207   :  { %648 = vrcp.f32 %v337_v23 }
 0x208   :  { %650 = vrcp.f32 %v336_v25 }
 0x211   :  { %v649_v31 = vpop.eup %648 }
 0x212   :  { %v651_v33 = vpop.eup %650  ;;  %v343_v34 = vmul.f32 %v649_v31, %v339_v30 }
 0x213   :  { %v342_v35 = vmul.f32 %v651_v33, %v338_v32 }
 0x214   :  { %v345_v36 = vadd.f32 1.0, %v343_v34 }
 0x215   :  { %v344_v38 = vadd.f32 1.0, %v342_v35 }
 0x216   :  { %v347_v41 = vmul.f32 %v345_v36, %v289_v39 }
 0x217   :  { %v346_v40 = vmul.f32 %v344_v38, %v288_v37 }
 0x219   :  { %585 = vmatprep.mubr.msk.f32.mxu0 %vm206_vm1, %v346_v40 }
 0x21a   :  { %586 = vmatmul.mubr.msk.f32.vlgmr.msra.gmra.mrb[2].mxu0 %vm206_vm1, %v347_v41 }
 0x2ed   :  { %v587_v43 = vpop.f32.mrb[2].mxu0 }
 0x2ee   :  { %v445_v44 = vadd.f32 %v587_v43, %v484_v42  ;;  %v439_v46 = vpop.f32.mrb[3].mxu0 }
 0x2ef   :  { %v440_v48 = vadd.f32 %v484_v42, %v439_v46 }
 0x2f0   :  { %652 = vtanh.f32 %v445_v44 }
 0x2f1   :  { %654 = vtanh.f32 %v440_v48 }
 0x2fa   :  { %v653_v47 = vpop.eup %652 }
 0x2fb   :  { %v655_v50 = vpop.eup %654  ;;  %v458_v51 = vmul.f32 %v653_v47, %v487_v45 }
 0x2fc   :  { %v457_v52 = vmul.f32 %v655_v50, %v487_v45 }
 0x2fd   :  { %v467_v53 = vadd.f32 %v488_v49, %v458_v51 }
 0x2fe   :  { %v466_v54 = vadd.f32 %v488_v49, %v457_v52 }
 0x2ff   :  { %469 = vst [vmem:[%s830_s9 + $0x8] sm:$0xff] %v467_v53 }
 0x300   :  { %468 = vst [vmem:[%s830_s9] sm:$0xff] %v466_v54 }

// kernel: forward.7
= control target key start
LH: loop header
LB: loop body
LE: loop exit
PB: predicated region body
PF: predicated region fallthrough
CT: control target
= control target key end

     0   :  { %vm71_vm0 = vcmask 785408   ;;  %vm642_vm1 = vcmask 523264   ;;  %s1708_s1 = inlined_call_operand.vmem [shape: f32[96,128], index: 1, kind: input, shape index: {}]   ;;  %s1709_s0 = inlined_call_operand.vmem [shape: f32[16,96], index: 0, kind: input, shape index: {}]   ;;  %s1710_s3 = inlined_call_operand.vmem [shape: f32[128,128], index: 3, kind: input, shape index: {}]   ;;  %s1711_s2 = inlined_call_operand.vmem [shape: f32[1,128], index: 2, kind: input, shape index: {}]   ;;  %s1712_s5 = inlined_call_operand.vmem [shape: f32[128,128], index: 5, kind: input, shape index: {}]   ;;  %s1713_s7 = inlined_call_operand.vmem [shape: f32[128,64], index: 7, kind: input, shape index: {}]   ;;  %s1714_s4 = inlined_call_operand.vmem [shape: f32[1,128], index: 4, kind: input, shape index: {}]   ;;  %s1715_s6 = inlined_call_operand.vmem [shape: f32[1,128], index: 6, kind: input, shape index: {}]   ;;  %s1716_s9 = inlined_call_operand.vmem [shape: f32[64,64], index: 9, kind: input, shape index: {}]   ;;  %s1717_s8 = inlined_call_operand.vmem [shape: f32[1,64], index: 8, kind: input, shape index: {}]   ;;  %s1718_s11 = inlined_call_operand.vmem [shape: f32[64,128], index: 11, kind: input, shape index: {}]   ;;  %s1719_s10 = inlined_call_operand.vmem [shape: f32[1,64], index: 10, kind: input, shape index: {}]   ;;  %s1720_s12 = inlined_call_operand.vmem [shape: f32[1,128], index: 12, kind: input, shape index: {}]   ;;  %s1721_s13 = inlined_call_operand.vmem [shape: f32[1,128], index: 13, kind: input, shape index: {}]   ;;  %s1722_s14 = inlined_call_operand.vmem [shape: f32[1,128], index: 14, kind: input, shape index: {}]   ;;  %s1723_s15 = inlined_call_operand.vmem [shape: f32[16,128], index: 15, kind: output, shape index: {}]  }
   0x1   :  { %v52_v0 = vld [vmem:[%s1708_s1] sm:$0xff]  ;;  %v53_v1 = vld [vmem:[%s1708_s1 + $0x8] sm:$0xff]  ;;  %v54_v2 = vld [vmem:[%s1708_s1 + $0x10] sm:$0xff] }
   0x2   :  { %v1186_v3 = vpack.c.bf16 %v53_v1, %v52_v0  ;;  %v55_v4 = vld [vmem:[%s1708_s1 + $0x18] sm:$0xff]  ;;  %v56_v6 = vld [vmem:[%s1708_s1 + $0x20] sm:$0xff]  ;;  %v57_v7 = vld [vmem:[%s1708_s1 + $0x28] sm:$0xff] }
   0x3   :  { %v1190_v5 = vpack.c.bf16 %v55_v4, %v54_v2  ;;  %v50_v8 = vld [vmem:[%s1709_s0] sm:$0xff]  ;;  %v1194_v9 = vpack.c.bf16 %v57_v7, %v56_v6  ;;  %v58_v10 = vld [vmem:[%s1708_s1 + $0x30] sm:$0xff]  ;;  %v59_v11 = vld [vmem:[%s1708_s1 + $0x38] sm:$0xff] }
   0x4   :  { %1187 = vmatprep.subr.bf16.mxu0 %v1186_v3  ;;  %1040 = vmatprep.mubr.msk.f32.mxu0 %vm71_vm0, %v50_v8  ;;  %v1198_v12 = vpack.c.bf16 %v59_v11, %v58_v10  ;;  %v60_v13 = vld [vmem:[%s1708_s1 + $0x40] sm:$0xff]  ;;  %v61_v14 = vld [vmem:[%s1708_s1 + $0x48] sm:$0xff]  ;;  %v62_v16 = vld [vmem:[%s1708_s1 + $0x50] sm:$0xff] }
   0x5   :  { %1189 = vmatpush3.bf16.msra.mxu0 %v1186_v3  ;;  %v1202_v15 = vpack.c.bf16 %v61_v14, %v60_v13  ;;  %v63_v17 = vld [vmem:[%s1708_s1 + $0x58] sm:$0xff]  ;;  %v51_v19 = vld [vmem:[%s1709_s0 + $0x8] sm:$0xff]  ;;  %v213_v20 = vld [vmem:[%s1710_s3] sm:$0xff] }
   0x6   :  { %1191 = vmatprep.subr.bf16.mxu0 %v1190_v5  ;;  %v1206_v18 = vpack.c.bf16 %v63_v17, %v62_v16  ;;  %v214_v21 = vld [vmem:[%s1710_s3 + $0x8] sm:$0xff]  ;;  %v215_v23 = vld [vmem:[%s1710_s3 + $0x10] sm:$0xff]  ;;  %v216_v24 = vld [vmem:[%s1710_s3 + $0x18] sm:$0xff] }
   0x7   :  { %v1210_v22 = vpack.c.bf16 %v214_v21, %v213_v20  ;;  %v1214_v25 = vpack.c.bf16 %v216_v24, %v215_v23  ;;  %v217_v26 = vld [vmem:[%s1710_s3 + $0x20] sm:$0xff]  ;;  %v218_v27 = vld [vmem:[%s1710_s3 + $0x28] sm:$0xff]  ;;  %v219_v28 = vld [vmem:[%s1710_s3 + $0x30] sm:$0xff] }
   0x8   :  { %v1218_v29 = vpack.c.bf16 %v218_v27, %v217_v26  ;;  %v220_v30 = vld [vmem:[%s1710_s3 + $0x38] sm:$0xff]  ;;  %v221_v32 = vld [vmem:[%s1710_s3 + $0x40] sm:$0xff]  ;;  %v222_v33 = vld [vmem:[%s1710_s3 + $0x48] sm:$0xff] }
   0x9   :  { %1193 = vmatpush3.bf16.msra.mxu0 %v1190_v5  ;;  %1211 = vmatprep.subr.bf16.mxu1 %v1210_v22  ;;  %v1222_v31 = vpack.c.bf16 %v220_v30, %v219_v28  ;;  %v1226_v34 = vpack.c.bf16 %v222_v33, %v221_v32  ;;  %v223_v35 = vld [vmem:[%s1710_s3 + $0x50] sm:$0xff]  ;;  %v224_v36 = vld [vmem:[%s1710_s3 + $0x58] sm:$0xff]  ;;  %v225_v38 = vld [vmem:[%s1710_s3 + $0x60] sm:$0xff] }
   0xa   :  { %1195 = vmatprep.subr.bf16.mxu0 %v1194_v9  ;;  %1213 = vmatpush3.bf16.msra.mxu1 %v1210_v22  ;;  %v1230_v37 = vpack.c.bf16 %v224_v36, %v223_v35  ;;  %v226_v39 = vld [vmem:[%s1710_s3 + $0x68] sm:$0xff]  ;;  %v227_v41 = vld [vmem:[%s1710_s3 + $0x70] sm:$0xff]  ;;  %v228_v42 = vld [vmem:[%s1710_s3 + $0x78] sm:$0xff] }
   0xb   :  { %1215 = vmatprep.subr.bf16.mxu1 %v1214_v25  ;;  %v1234_v40 = vpack.c.bf16 %v226_v39, %v225_v38  ;;  %v1238_v43 = vpack.c.bf16 %v228_v42, %v227_v41  ;;  %v906_v44 = vld [vmem:[%s1711_s2] ss:$0 sm:$0xff] }
   0xd   :  { %1197 = vmatpush3.bf16.msra.mxu0 %v1194_v9 }
   0xe   :  { %1199 = vmatprep.subr.bf16.mxu0 %v1198_v12  ;;  %1217 = vmatpush3.bf16.msra.mxu1 %v1214_v25 }
   0xf   :  { %1219 = vmatprep.subr.bf16.mxu1 %v1218_v29 }
  0x11   :  { %1201 = vmatpush3.bf16.msra.mxu0 %v1198_v12 }
  0x12   :  { %1203 = vmatprep.subr.bf16.mxu0 %v1202_v15  ;;  %1221 = vmatpush3.bf16.msra.mxu1 %v1218_v29 }
  0x13   :  { %1223 = vmatprep.subr.bf16.mxu1 %v1222_v31 }
  0x15   :  { %1205 = vmatpush3.bf16.msra.mxu0 %v1202_v15 }
  0x16   :  { %1207 = vmatprep.subr.bf16.mxu0 %v1206_v18  ;;  %1225 = vmatpush3.bf16.msra.mxu1 %v1222_v31 }
  0x17   :  { %1227 = vmatprep.subr.bf16.mxu1 %v1226_v34 }
  0x19   :  { %1209 = vmatpush3.bf16.msra.mxu0 %v1206_v18 }
  0x1a   :  { %1229 = vmatpush3.bf16.msra.mxu1 %v1226_v34 }
  0x1b   :  { %1231 = vmatprep.subr.bf16.mxu1 %v1230_v37 }
  0x1c   :  { %1041 = vmatmul.mubr.msk.f32.vlgmr.msra.gmra.mrb[0].mxu0 %vm71_vm0, %v51_v19 }
  0x1e   :  { %1233 = vmatpush3.bf16.msra.mxu1 %v1230_v37 }
  0x1f   :  { %1235 = vmatprep.subr.bf16.mxu1 %v1234_v40 }
  0x22   :  { %1237 = vmatpush3.bf16.msra.mxu1 %v1234_v40 }
  0x23   :  { %1239 = vmatprep.subr.bf16.mxu1 %v1238_v43 }
  0x26   :  { %1241 = vmatpush3.bf16.msra.mxu1 %v1238_v43  ;;  %v371_v43 = vld [vmem:[%s1712_s5] sm:$0xff] }
  0xef   :  { %v1042_v45 = vpop.f32.mrb[0].mxu0 }
  0xf0   :  { %v150_v46 = vadd.f32 %v1042_v45, %v906_v44  ;;  %v144_v47 = vpop.f32.mrb[1].mxu0 }
  0xf1   :  { %v145_v48 = vadd.f32 %v906_v44, %v144_v47  ;;  %v372_v44 = vld [vmem:[%s1712_s5 + $0x8] sm:$0xff]  ;;  %v373_v47 = vld [vmem:[%s1712_s5 + $0x10] sm:$0xff] }
  0xf2   :  { %v156_v49 = vmul.f32 0.70710677, %v150_v46  ;;  %v154_v40 = vmul.f32 0.5, %v150_v46  ;;  %v1242_v45 = vpack.c.bf16 %v372_v44, %v371_v43  ;;  %v374_v46 = vld [vmem:[%s1712_s5 + $0x18] sm:$0xff] }
  0xf3   :  { %v155_v50 = vmul.f32 0.70710677, %v145_v48  ;;  %v153_v38 = vmul.f32 0.5, %v145_v48  ;;  %v1246_v48 = vpack.c.bf16 %v374_v46, %v373_v47 }
  0xf4   :  { %v910_v51 = vclamps-f32 %v156_v49, 4.0  ;;  %1243 = vmatprep.subr.bf16.mxu0 %v1242_v45  ;;  %v375_v49 = vld [vmem:[%s1712_s5 + $0x20] sm:$0xff] }
  0xf5   :  { %v909_v52 = vclamps-f32 %v155_v50, 4.0  ;;  %1245 = vmatpush3.bf16.msra.mxu0 %v1242_v45  ;;  %v376_v50 = vld [vmem:[%s1712_s5 + $0x28] sm:$0xff] }
  0xf6   :  { %v162_v53 = vmul.f32 %v910_v51, %v910_v51  ;;  %1247 = vmatprep.subr.bf16.mxu0 %v1246_v48 }
  0xf7   :  { %v161_v54 = vmul.f32 %v909_v52, %v909_v52 }
  0xf8   :  { %v180_v55 = vmul.f32 -1.1791603e-07, %v162_v53  ;;  %v164_v56 = vmul.f32 0.00022905065, %v162_v53 }
  0xf9   :  { %v179_v57 = vmul.f32 -1.1791603e-07, %v161_v54  ;;  %v163_v58 = vmul.f32 0.00022905065, %v161_v54  ;;  %1249 = vmatpush3.bf16.msra.mxu0 %v1246_v48 }
  0xfa   :  { %v182_v59 = vadd.f32 2.3547966e-05, %v180_v55  ;;  %v166_v62 = vadd.f32 0.003408291, %v164_v56  ;;  %v379_v55 = vld [vmem:[%s1712_s5 + $0x40] sm:$0xff]  ;;  %v380_v56 = vld [vmem:[%s1712_s5 + $0x48] sm:$0xff] }
  0xfb   :  { %v181_v60 = vadd.f32 2.3547966e-05, %v179_v57  ;;  %v165_v0 = vadd.f32 0.003408291, %v163_v58  ;;  %v1258_v57 = vpack.c.bf16 %v380_v56, %v379_v55  ;;  %v381_v58 = vld [vmem:[%s1712_s5 + $0x50] sm:$0xff] }
  0xfc   :  { %v184_v61 = vmul.f32 %v182_v59, %v162_v53  ;;  %v168_v4 = vmul.f32 %v166_v62, %v162_v53  ;;  %v382_v59 = vld [vmem:[%s1712_s5 + $0x58] sm:$0xff]  ;;  %v384_v62 = vld [vmem:[%s1712_s5 + $0x68] sm:$0xff] }
  0xfd   :  { %v183_v63 = vmul.f32 %v181_v60, %v161_v54  ;;  %v167_v6 = vmul.f32 %v165_v0, %v161_v54  ;;  %v1262_v60 = vpack.c.bf16 %v382_v59, %v381_v58  ;;  %v385_v0 = vld [vmem:[%s1712_s5 + $0x70] sm:$0xff] }
  0xfe   :  { %v186_v1 = vadd.f32 0.0010179626, %v184_v61  ;;  %v170_v10 = vadd.f32 0.050955694, %v168_v4  ;;  %v383_v61 = vld [vmem:[%s1712_s5 + $0x60] sm:$0xff]  ;;  %v470_v4 = vld [vmem:[%s1713_s7 + $0x8] sm:$0xff] }
  0xff   :  { %v185_v2 = vadd.f32 0.0010179626, %v183_v63  ;;  %v169_v12 = vadd.f32 0.050955694, %v167_v6  ;;  %v1266_v63 = vpack.c.bf16 %v384_v62, %v383_v61 }
 0x100   :  { %v188_v3 = vmul.f32 %v186_v1, %v162_v53  ;;  %v172_v16 = vmul.f32 %v170_v10, %v162_v53  ;;  %v386_v1 = vld [vmem:[%s1712_s5 + $0x78] sm:$0xff]  ;;  %v474_v10 = vld [vmem:[%s1713_s7 + $0x28] sm:$0xff] }
 0x101   :  { %v187_v5 = vmul.f32 %v185_v2, %v161_v54  ;;  %v171_v18 = vmul.f32 %v169_v12, %v161_v54  ;;  %v1270_v2 = vpack.c.bf16 %v386_v1, %v385_v0  ;;  %v475_v12 = vld [vmem:[%s1713_s7 + $0x30] sm:$0xff] }
 0x102   :  { %v190_v7 = vadd.f32 0.01407047, %v188_v3  ;;  %v174_v22 = vadd.f32 0.18520832, %v172_v16  ;;  %v469_v3 = vld [vmem:[%s1713_s7] sm:$0xff]  ;;  %v478_v16 = vld [vmem:[%s1713_s7 + $0x48] sm:$0xff] }
 0x103   :  { %v189_v8 = vadd.f32 0.01407047, %v187_v5  ;;  %v173_v24 = vadd.f32 0.18520832, %v171_v18  ;;  %v471_v5 = vld [vmem:[%s1713_s7 + $0x10] sm:$0xff]  ;;  %v1274_v6 = vpack.c.bf16 %v470_v4, %v469_v3 }
 0x104   :  { %v192_v9 = vmul.f32 %v190_v7, %v162_v53  ;;  %v176_v27 = vmul.f32 %v174_v22, %v162_v53  ;;  %v472_v7 = vld [vmem:[%s1713_s7 + $0x18] sm:$0xff]  ;;  %v479_v18 = vld [vmem:[%s1713_s7 + $0x50] sm:$0xff]  ;;  %v482_v22 = vld [vmem:[%s1713_s7 + $0x68] sm:$0xff] }
 0x105   :  { %v191_v11 = vmul.f32 %v189_v8, %v161_v54  ;;  %v175_v28 = vmul.f32 %v173_v24, %v161_v54  ;;  %v1278_v8 = vpack.c.bf16 %v472_v7, %v471_v5  ;;  %1275 = vmatprep.subr.bf16.mxu1 %v1274_v6  ;;  %v911_v24 = vld [vmem:[%s1714_s4] ss:$0 sm:$0xff] }
 0x106   :  { %v194_v13 = vadd.f32 0.11098505, %v192_v9  ;;  %v178_v29 = vadd.f32 1.1283791, %v176_v27  ;;  %v473_v9 = vld [vmem:[%s1713_s7 + $0x20] sm:$0xff] }
 0x107   :  { %v193_v14 = vadd.f32 0.11098505, %v191_v11  ;;  %v177_v30 = vadd.f32 1.1283791, %v175_v28  ;;  %v1282_v11 = vpack.c.bf16 %v474_v10, %v473_v9 }
 0x108   :  { %v196_v15 = vmul.f32 %v194_v13, %v162_v53  ;;  %v204_v31 = vmul.f32 %v910_v51, %v178_v29  ;;  %v1250_v51 = vpack.c.bf16 %v376_v50, %v375_v49  ;;  %v476_v13 = vld [vmem:[%s1713_s7 + $0x38] sm:$0xff] }
 0x109   :  { %v195_v17 = vmul.f32 %v193_v14, %v161_v54  ;;  %v203_v33 = vmul.f32 %v909_v52, %v177_v30  ;;  %v377_v52 = vld [vmem:[%s1712_s5 + $0x30] sm:$0xff]  ;;  %v1286_v14 = vpack.c.bf16 %v476_v13, %v475_v12 }
 0x10a   :  { %v198_v19 = vadd.f32 0.49746925, %v196_v15  ;;  %1251 = vmatprep.subr.bf16.mxu0 %v1250_v51  ;;  %v477_v15 = vld [vmem:[%s1713_s7 + $0x40] sm:$0xff] }
 0x10b   :  { %v197_v20 = vadd.f32 0.49746925, %v195_v17  ;;  %1253 = vmatpush3.bf16.msra.mxu0 %v1250_v51  ;;  %v1290_v17 = vpack.c.bf16 %v478_v16, %v477_v15 }
 0x10c   :  { %v200_v21 = vmul.f32 %v198_v19, %v162_v53  ;;  %v378_v53 = vld [vmem:[%s1712_s5 + $0x38] sm:$0xff] }
 0x10d   :  { %v199_v23 = vmul.f32 %v197_v20, %v161_v54  ;;  %v1254_v54 = vpack.c.bf16 %v378_v53, %v377_v52  ;;  %v480_v19 = vld [vmem:[%s1713_s7 + $0x58] sm:$0xff] }
 0x10e   :  { %v202_v25 = vadd.f32 1.0, %v200_v21  ;;  %v1294_v20 = vpack.c.bf16 %v480_v19, %v479_v18  ;;  %v481_v21 = vld [vmem:[%s1713_s7 + $0x60] sm:$0xff] }
 0x10f   :  { %v201_v26 = vadd.f32 1.0, %v199_v23  ;;  %1255 = vmatprep.subr.bf16.mxu0 %v1254_v54  ;;  %v1298_v23 = vpack.c.bf16 %v482_v22, %v481_v21 }
 0x110   :  { %1338 = vrcp.f32 %v202_v25  ;;  %1257 = vmatpush3.bf16.msra.mxu0 %v1254_v54 }
 0x111   :  { %1340 = vrcp.f32 %v201_v26  ;;  %1259 = vmatprep.subr.bf16.mxu0 %v1258_v57 }
 0x114   :  { %1261 = vmatpush3.bf16.msra.mxu0 %v1258_v57 }
 0x115   :  { %1263 = vmatprep.subr.bf16.mxu0 %v1262_v60 }
 0x118   :  { %1265 = vmatpush3.bf16.msra.mxu0 %v1262_v60 }
 0x119   :  { %1267 = vmatprep.subr.bf16.mxu0 %v1266_v63 }
 0x11a   :  { %v1339_v32 = vpop.eup %1338 }
 0x11b   :  { %v1341_v34 = vpop.eup %1340  ;;  %v208_v35 = vmul.f32 %v1339_v32, %v204_v31 }
 0x11c   :  { %v207_v36 = vmul.f32 %v1341_v34, %v203_v33  ;;  %1269 = vmatpush3.bf16.msra.mxu0 %v1266_v63 }
 0x11d   :  { %v210_v37 = vadd.f32 1.0, %v208_v35  ;;  %1271 = vmatprep.subr.bf16.mxu0 %v1270_v2 }
 0x11e   :  { %v209_v39 = vadd.f32 1.0, %v207_v36 }
 0x11f   :  { %v212_v42 = vmul.f32 %v210_v37, %v154_v40 }
 0x120   :  { %v211_v41 = vmul.f32 %v209_v39, %v153_v38  ;;  %1273 = vmatpush3.bf16.msra.mxu0 %v1270_v2 }
 0x122   :  { %1075 = vmatprep.mubr.f32.mxu1 %v211_v41 }
 0x123   :  { %1076 = vmatmul.mubr.f32.vlgmr.msra.gmra.mrb[0].mxu1 %v212_v42 }
 0x124   :  { %1277 = vmatpush3.bf16.msra.mxu1 %v1274_v6 }
 0x125   :  { %1279 = vmatprep.subr.bf16.mxu1 %v1278_v8 }
 0x128   :  { %1281 = vmatpush3.bf16.msra.mxu1 %v1278_v8 }
 0x129   :  { %1283 = vmatprep.subr.bf16.mxu1 %v1282_v11 }
 0x12c   :  { %1285 = vmatpush3.bf16.msra.mxu1 %v1282_v11 }
 0x12d   :  { %1287 = vmatprep.subr.bf16.mxu1 %v1286_v14 }
 0x130   :  { %1289 = vmatpush3.bf16.msra.mxu1 %v1286_v14 }
 0x131   :  { %1291 = vmatprep.subr.bf16.mxu1 %v1290_v17 }
 0x134   :  { %1293 = vmatpush3.bf16.msra.mxu1 %v1290_v17 }
 0x135   :  { %1295 = vmatprep.subr.bf16.mxu1 %v1294_v20 }
 0x138   :  { %1297 = vmatpush3.bf16.msra.mxu1 %v1294_v20 }
 0x139   :  { %1299 = vmatprep.subr.bf16.mxu1 %v1298_v23 }
 0x13c   :  { %1301 = vmatpush3.bf16.msra.mxu1 %v1298_v23  ;;  %v483_v23 = vld [vmem:[%s1713_s7 + $0x70] sm:$0xff] }
 0x1f6   :  { %v1077_v25 = vpop.f32.mrb[0].mxu1 }
 0x1f7   :  { %v308_v26 = vadd.f32 %v1077_v25, %v911_v24  ;;  %v302_v27 = vpop.f32.mrb[1].mxu1 }
 0x1f8   :  { %v303_v28 = vadd.f32 %v911_v24, %v302_v27  ;;  %v484_v24 = vld [vmem:[%s1713_s7 + $0x78] sm:$0xff]  ;;  %v914_v27 = vld [vmem:[%s1715_s6] ss:$0 sm:$0xff] }
 0x1f9   :  { %v314_v29 = vmul.f32 0.70710677, %v308_v26  ;;  %v312_v20 = vmul.f32 0.5, %v308_v26  ;;  %v1302_v25 = vpack.c.bf16 %v484_v24, %v483_v23 }
 0x1fa   :  { %v313_v30 = vmul.f32 0.70710677, %v303_v28  ;;  %v311_v18 = vmul.f32 0.5, %v303_v28 }
 0x1fb   :  { %v913_v31 = vclamps-f32 %v314_v29, 4.0  ;;  %1303 = vmatprep.subr.bf16.mxu1 %v1302_v25 }
 0x1fc   :  { %v912_v32 = vclamps-f32 %v313_v30, 4.0  ;;  %1305 = vmatpush3.bf16.msra.mxu1 %v1302_v25 }
 0x1fd   :  { %v320_v33 = vmul.f32 %v913_v31, %v913_v31 }
 0x1fe   :  { %v319_v34 = vmul.f32 %v912_v32, %v912_v32 }
 0x1ff   :  { %v338_v35 = vmul.f32 -1.1791603e-07, %v320_v33  ;;  %v322_v36 = vmul.f32 0.00022905065, %v320_v33 }
 0x200   :  { %v337_v37 = vmul.f32 -1.1791603e-07, %v319_v34  ;;  %v321_v39 = vmul.f32 0.00022905065, %v319_v34 }
 0x201   :  { %v340_v38 = vadd.f32 2.3547966e-05, %v338_v35  ;;  %v324_v42 = vadd.f32 0.003408291, %v322_v36  ;;  %v630_v35 = vld [vmem:[%s1716_s9 + $0x18] sm:$0xff] }
 0x202   :  { %v339_v40 = vadd.f32 2.3547966e-05, %v337_v37  ;;  %v323_v45 = vadd.f32 0.003408291, %v321_v39  ;;  %v631_v37 = vld [vmem:[%s1716_s9 + $0x20] sm:$0xff] }
 0x203   :  { %v342_v41 = vmul.f32 %v340_v38, %v320_v33  ;;  %v326_v48 = vmul.f32 %v324_v42, %v320_v33  ;;  %v632_v38 = vld [vmem:[%s1716_s9 + $0x28] sm:$0xff] }
 0x204   :  { %v341_v43 = vmul.f32 %v339_v40, %v319_v34  ;;  %v325_v51 = vmul.f32 %v323_v45, %v319_v34  ;;  %v1314_v39 = vpack.c.bf16 %v632_v38, %v631_v37  ;;  %v633_v40 = vld [vmem:[%s1716_s9 + $0x30] sm:$0xff] }
 0x205   :  { %v344_v44 = vadd.f32 0.0010179626, %v342_v41  ;;  %v328_v54 = vadd.f32 0.050955694, %v326_v48  ;;  %v634_v41 = vld [vmem:[%s1716_s9 + $0x38] sm:$0xff] }
 0x206   :  { %v343_v47 = vadd.f32 0.0010179626, %v341_v43  ;;  %v327_v57 = vadd.f32 0.050955694, %v325_v51  ;;  %v1318_v42 = vpack.c.bf16 %v634_v41, %v633_v40  ;;  %v915_v43 = vld [vmem:[%s1717_s8] ss:$0 sm:$0xff] }
 0x207   :  { %v346_v46 = vmul.f32 %v344_v44, %v320_v33  ;;  %v330_v60 = vmul.f32 %v328_v54, %v320_v33 }
 0x208   :  { %v345_v49 = vmul.f32 %v343_v47, %v319_v34  ;;  %v329_v63 = vmul.f32 %v327_v57, %v319_v34 }
 0x209   :  { %v348_v50 = vadd.f32 0.01407047, %v346_v46  ;;  %v332_v2 = vadd.f32 0.18520832, %v330_v60 }
 0x20a   :  { %v347_v52 = vadd.f32 0.01407047, %v345_v49  ;;  %v331_v5 = vadd.f32 0.18520832, %v329_v63 }
 0x20b   :  { %v350_v53 = vmul.f32 %v348_v50, %v320_v33  ;;  %v334_v7 = vmul.f32 %v332_v2, %v320_v33 }
 0x20c   :  { %v349_v55 = vmul.f32 %v347_v52, %v319_v34  ;;  %v333_v8 = vmul.f32 %v331_v5, %v319_v34 }
 0x20d   :  { %v352_v56 = vadd.f32 0.11098505, %v350_v53  ;;  %v336_v9 = vadd.f32 1.1283791, %v334_v7 }
 0x20e   :  { %v351_v58 = vadd.f32 0.11098505, %v349_v55  ;;  %v335_v10 = vadd.f32 1.1283791, %v333_v8 }
 0x20f   :  { %v354_v59 = vmul.f32 %v352_v56, %v320_v33  ;;  %v362_v11 = vmul.f32 %v913_v31, %v336_v9  ;;  %v627_v31 = vld [vmem:[%s1716_s9] sm:$0xff] }
 0x210   :  { %v353_v61 = vmul.f32 %v351_v58, %v319_v34  ;;  %v361_v13 = vmul.f32 %v912_v32, %v335_v10  ;;  %v628_v32 = vld [vmem:[%s1716_s9 + $0x8] sm:$0xff] }
 0x211   :  { %v356_v62 = vadd.f32 0.49746925, %v354_v59 }
 0x212   :  { %v355_v0 = vadd.f32 0.49746925, %v353_v61 }
 0x213   :  { %v358_v1 = vmul.f32 %v356_v62, %v320_v33  ;;  %v1306_v33 = vpack.c.bf16 %v628_v32, %v627_v31 }
 0x214   :  { %v357_v3 = vmul.f32 %v355_v0, %v319_v34  ;;  %v629_v34 = vld [vmem:[%s1716_s9 + $0x10] sm:$0xff] }
 0x215   :  { %v360_v4 = vadd.f32 1.0, %v358_v1  ;;  %1307 = vmatprep.subr.bf16.mxu0 %v1306_v33  ;;  %v1310_v36 = vpack.c.bf16 %v630_v35, %v629_v34 }
 0x216   :  { %v359_v6 = vadd.f32 1.0, %v357_v3 }
 0x217   :  { %1342 = vrcp.f32 %v360_v4 }
 0x218   :  { %1344 = vrcp.f32 %v359_v6 }
 0x221   :  { %v1343_v12 = vpop.eup %1342 }
 0x222   :  { %v1345_v14 = vpop.eup %1344  ;;  %v366_v15 = vmul.f32 %v1343_v12, %v362_v11 }
 0x223   :  { %v365_v16 = vmul.f32 %v1345_v14, %v361_v13 }
 0x224   :  { %v368_v17 = vadd.f32 1.0, %v366_v15 }
 0x225   :  { %v367_v19 = vadd.f32 1.0, %v365_v16 }
 0x226   :  { %v370_v22 = vmul.f32 %v368_v17, %v312_v20 }
 0x227   :  { %v369_v21 = vmul.f32 %v367_v19, %v311_v18 }
 0x229   :  { %1110 = vmatprep.mubr.f32.mxu0 %v369_v21 }
 0x22a   :  { %1111 = vmatmul.mubr.f32.vlgmr.msra.gmra.mrb[2].mxu0 %v370_v22 }
 0x22b   :  { %1309 = vmatpush3.bf16.msra.mxu0 %v1306_v33 }
 0x22c   :  { %1311 = vmatprep.subr.bf16.mxu0 %v1310_v36 }
 0x22f   :  { %1313 = vmatpush3.bf16.msra.mxu0 %v1310_v36 }
 0x230   :  { %1315 = vmatprep.subr.bf16.mxu0 %v1314_v39 }
 0x233   :  { %1317 = vmatpush3.bf16.msra.mxu0 %v1314_v39 }
 0x234   :  { %1319 = vmatprep.subr.bf16.mxu0 %v1318_v42 }
 0x237   :  { %1321 = vmatpush3.bf16.msra.mxu0 %v1318_v42  ;;  %v784_v42 = vld [vmem:[%s1718_s11] sm:$0xff] }
 0x2fd   :  { %v1112_v26 = vpop.f32.mrb[2].mxu0 }
 0x2fe   :  { %v460_v28 = vpop.f32.mrb[3].mxu0  ;;  %v466_v30 = vadd.f32 %v1112_v26, %v914_v27 }
 0x2ff   :  { %v461_v29 = vadd.f32 %v914_v27, %v460_v28 }
 0x301   :  { %1145 = vmatprep.mubr.f32.mxu1 %v461_v29 }
 0x302   :  { %1146 = vmatmul.mubr.f32.vlgmr.msra.gmra.mrb[2].mxu1 %v466_v30 }
 0x3d5   :  { %v1147_v44 = vpop.f32.mrb[2].mxu1 }
 0x3d6   :  { %v564_v45 = vadd.f32 %v1147_v44, %v915_v43  ;;  %v558_v47 = vpop.f32.mrb[3].mxu1 }
 0x3d7   :  { %v559_v46 = vadd.f32 %v915_v43, %v558_v47  ;;  %v785_v43 = vld [vmem:[%s1718_s11 + $0x8] sm:$0xff]  ;;  %v787_v47 = vld [vmem:[%s1718_s11 + $0x18] sm:$0xff] }
 0x3d8   :  { %v570_v48 = vmul.f32 0.70710677, %v564_v45  ;;  %v568_v39 = vmul.f32 0.5, %v564_v45  ;;  %v1322_v44 = vpack.c.bf16 %v785_v43, %v784_v42  ;;  %v786_v45 = vld [vmem:[%s1718_s11 + $0x10] sm:$0xff] }
 0x3d9   :  { %v569_v49 = vmul.f32 0.70710677, %v559_v46  ;;  %v567_v37 = vmul.f32 0.5, %v559_v46  ;;  %v1326_v46 = vpack.c.bf16 %v787_v47, %v786_v45 }
 0x3da   :  { %v917_v50 = vclamps-f32 %v570_v48, 4.0  ;;  %1323 = vmatprep.subr.bf16.mxu1 %v1322_v44  ;;  %v788_v48 = vld [vmem:[%s1718_s11 + $0x20] sm:$0xff] }
 0x3db   :  { %v916_v51 = vclamps-f32 %v569_v49, 4.0  ;;  %1325 = vmatpush3.bf16.msra.mxu1 %v1322_v44  ;;  %v789_v49 = vld [vmem:[%s1718_s11 + $0x28] sm:$0xff] }
 0x3dc   :  { %v576_v52 = vmul.f32 %v917_v50, %v917_v50  ;;  %1327 = vmatprep.subr.bf16.mxu1 %v1326_v46 }
 0x3dd   :  { %v575_v53 = vmul.f32 %v916_v51, %v916_v51 }
 0x3de   :  { %v594_v54 = vmul.f32 -1.1791603e-07, %v576_v52  ;;  %v578_v55 = vmul.f32 0.00022905065, %v576_v52 }
 0x3df   :  { %v593_v56 = vmul.f32 -1.1791603e-07, %v575_v53  ;;  %v577_v58 = vmul.f32 0.00022905065, %v575_v53  ;;  %1329 = vmatpush3.bf16.msra.mxu1 %v1326_v46 }
 0x3e0   :  { %v596_v57 = vadd.f32 2.3547966e-05, %v594_v54  ;;  %v580_v61 = vadd.f32 0.003408291, %v578_v55  ;;  %v918_v54 = vld [vmem:[%s1719_s10] ss:$0 sm:$0xff] }
 0x3e1   :  { %v595_v59 = vadd.f32 2.3547966e-05, %v593_v56  ;;  %v579_v0 = vadd.f32 0.003408291, %v577_v58 }
 0x3e2   :  { %v598_v60 = vmul.f32 %v596_v57, %v576_v52  ;;  %v582_v3 = vmul.f32 %v580_v61, %v576_v52 }
 0x3e3   :  { %v597_v62 = vmul.f32 %v595_v59, %v575_v53  ;;  %v581_v6 = vmul.f32 %v579_v0, %v575_v53 }
 0x3e4   :  { %v600_v63 = vadd.f32 0.0010179626, %v598_v60  ;;  %v584_v9 = vadd.f32 0.050955694, %v582_v3 }
 0x3e5   :  { %v599_v1 = vadd.f32 0.0010179626, %v597_v62  ;;  %v583_v12 = vadd.f32 0.050955694, %v581_v6 }
 0x3e6   :  { %v602_v2 = vmul.f32 %v600_v63, %v576_v52  ;;  %v586_v15 = vmul.f32 %v584_v9, %v576_v52 }
 0x3e7   :  { %v601_v4 = vmul.f32 %v599_v1, %v575_v53  ;;  %v585_v18 = vmul.f32 %v583_v12, %v575_v53 }
 0x3e8   :  { %v604_v5 = vadd.f32 0.01407047, %v602_v2  ;;  %v588_v21 = vadd.f32 0.18520832, %v586_v15 }
 0x3e9   :  { %v603_v7 = vadd.f32 0.01407047, %v601_v4  ;;  %v587_v24 = vadd.f32 0.18520832, %v585_v18 }
 0x3ea   :  { %v606_v8 = vmul.f32 %v604_v5, %v576_v52  ;;  %v590_v27 = vmul.f32 %v588_v21, %v576_v52 }
 0x3eb   :  { %v605_v10 = vmul.f32 %v603_v7, %v575_v53  ;;  %v589_v26 = vmul.f32 %v587_v24, %v575_v53 }
 0x3ec   :  { %v608_v11 = vadd.f32 0.11098505, %v606_v8  ;;  %v592_v28 = vadd.f32 1.1283791, %v590_v27 }
 0x3ed   :  { %v607_v13 = vadd.f32 0.11098505, %v605_v10  ;;  %v591_v29 = vadd.f32 1.1283791, %v589_v26 }
 0x3ee   :  { %v610_v14 = vmul.f32 %v608_v11, %v576_v52  ;;  %v618_v30 = vmul.f32 %v917_v50, %v592_v28  ;;  %v1330_v50 = vpack.c.bf16 %v789_v49, %v788_v48 }
 0x3ef   :  { %v609_v16 = vmul.f32 %v607_v13, %v575_v53  ;;  %v617_v32 = vmul.f32 %v916_v51, %v591_v29  ;;  %v790_v51 = vld [vmem:[%s1718_s11 + $0x30] sm:$0xff] }
 0x3f0   :  { %v612_v17 = vadd.f32 0.49746925, %v610_v14  ;;  %1331 = vmatprep.subr.bf16.mxu1 %v1330_v50 }
 0x3f1   :  { %v611_v19 = vadd.f32 0.49746925, %v609_v16  ;;  %1333 = vmatpush3.bf16.msra.mxu1 %v1330_v50 }
 0x3f2   :  { %v614_v20 = vmul.f32 %v612_v17, %v576_v52  ;;  %v791_v52 = vld [vmem:[%s1718_s11 + $0x38] sm:$0xff] }
 0x3f3   :  { %v613_v22 = vmul.f32 %v611_v19, %v575_v53  ;;  %v1334_v53 = vpack.c.bf16 %v791_v52, %v790_v51 }
 0x3f4   :  { %v616_v23 = vadd.f32 1.0, %v614_v20 }
 0x3f5   :  { %v615_v25 = vadd.f32 1.0, %v613_v22  ;;  %1335 = vmatprep.subr.bf16.mxu1 %v1334_v53 }
 0x3f6   :  { %1346 = vrcp.f32 %v616_v23  ;;  %1337 = vmatpush3.bf16.msra.mxu1 %v1334_v53  ;;  %v923_v53 = vld [vmem:[%s1720_s12] ss:$0 sm:$0xff] }
 0x3f7   :  { %1348 = vrcp.f32 %v615_v25 }
 0x400   :  { %v1347_v31 = vpop.eup %1346 }
 0x401   :  { %v1349_v33 = vpop.eup %1348  ;;  %v622_v34 = vmul.f32 %v1347_v31, %v618_v30 }
 0x402   :  { %v621_v35 = vmul.f32 %v1349_v33, %v617_v32 }
 0x403   :  { %v624_v36 = vadd.f32 1.0, %v622_v34 }
 0x404   :  { %v623_v38 = vadd.f32 1.0, %v621_v35 }
 0x405   :  { %v626_v41 = vmul.f32 %v624_v36, %v568_v39 }
 0x406   :  { %v625_v40 = vmul.f32 %v623_v38, %v567_v37 }
 0x408   :  { %1164 = vmatprep.mubr.msk.f32.mxu0 %vm642_vm1, %v625_v40 }
 0x409   :  { %1165 = vmatmul.mubr.msk.f32.vlgmr.msra.gmra.mrb[4].mxu0 %vm642_vm1, %v626_v41 }
 0x4dc   :  { %v1166_v55 = vpop.f32.mrb[4].mxu0 }
 0x4dd   :  { %v721_v56 = vadd.f32 %v1166_v55, %v918_v54  ;;  %v715_v57 = vpop.f32.mrb[5].mxu0 }
 0x4de   :  { %v716_v58 = vadd.f32 %v918_v54, %v715_v57 }
 0x4df   :  { %v727_v59 = vmul.f32 0.70710677, %v721_v56  ;;  %v725_v50 = vmul.f32 0.5, %v721_v56  ;;  %v926_v56 = vld [vmem:[%s1721_s13] ss:$0 sm:$0xff] }
 0x4e0   :  { %v726_v60 = vmul.f32 0.70710677, %v716_v58  ;;  %v724_v48 = vmul.f32 0.5, %v716_v58 }
 0x4e1   :  { %v922_v61 = vclamps-f32 %v727_v59, 4.0 }
 0x4e2   :  { %v921_v62 = vclamps-f32 %v726_v60, 4.0  ;;  %v927_v60 = vld [vmem:[%s1722_s14] ss:$0 sm:$0xff] }
 0x4e3   :  { %v733_v63 = vmul.f32 %v922_v61, %v922_v61 }
 0x4e4   :  { %v732_v0 = vmul.f32 %v921_v62, %v921_v62 }
 0x4e5   :  { %v751_v1 = vmul.f32 -1.1791603e-07, %v733_v63  ;;  %v735_v2 = vmul.f32 0.00022905065, %v733_v63 }
 0x4e6   :  { %v750_v3 = vmul.f32 -1.1791603e-07, %v732_v0  ;;  %v734_v5 = vmul.f32 0.00022905065, %v732_v0 }
 0x4e7   :  { %v753_v4 = vadd.f32 2.3547966e-05, %v751_v1  ;;  %v737_v8 = vadd.f32 0.003408291, %v735_v2 }
 0x4e8   :  { %v752_v6 = vadd.f32 2.3547966e-05, %v750_v3  ;;  %v736_v11 = vadd.f32 0.003408291, %v734_v5 }
 0x4e9   :  { %v755_v7 = vmul.f32 %v753_v4, %v733_v63  ;;  %v739_v14 = vmul.f32 %v737_v8, %v733_v63 }
 0x4ea   :  { %v754_v9 = vmul.f32 %v752_v6, %v732_v0  ;;  %v738_v17 = vmul.f32 %v736_v11, %v732_v0 }
 0x4eb   :  { %v757_v10 = vadd.f32 0.0010179626, %v755_v7  ;;  %v741_v20 = vadd.f32 0.050955694, %v739_v14 }
 0x4ec   :  { %v756_v12 = vadd.f32 0.0010179626, %v754_v9  ;;  %v740_v23 = vadd.f32 0.050955694, %v738_v17 }
 0x4ed   :  { %v759_v13 = vmul.f32 %v757_v10, %v733_v63  ;;  %v743_v27 = vmul.f32 %v741_v20, %v733_v63 }
 0x4ee   :  { %v758_v15 = vmul.f32 %v756_v12, %v732_v0  ;;  %v742_v29 = vmul.f32 %v740_v23, %v732_v0 }
 0x4ef   :  { %v761_v16 = vadd.f32 0.01407047, %v759_v13  ;;  %v745_v32 = vadd.f32 0.18520832, %v743_v27 }
 0x4f0   :  { %v760_v18 = vadd.f32 0.01407047, %v758_v15  ;;  %v744_v35 = vadd.f32 0.18520832, %v742_v29 }
 0x4f1   :  { %v763_v19 = vmul.f32 %v761_v16, %v733_v63  ;;  %v747_v37 = vmul.f32 %v745_v32, %v733_v63 }
 0x4f2   :  { %v762_v21 = vmul.f32 %v760_v18, %v732_v0  ;;  %v746_v38 = vmul.f32 %v744_v35, %v732_v0 }
 0x4f3   :  { %v765_v22 = vadd.f32 0.11098505, %v763_v19  ;;  %v749_v39 = vadd.f32 1.1283791, %v747_v37 }
 0x4f4   :  { %v764_v24 = vadd.f32 0.11098505, %v762_v21  ;;  %v748_v40 = vadd.f32 1.1283791, %v746_v38 }
 0x4f5   :  { %v767_v25 = vmul.f32 %v765_v22, %v733_v63  ;;  %v775_v41 = vmul.f32 %v922_v61, %v749_v39 }
 0x4f6   :  { %v766_v26 = vmul.f32 %v764_v24, %v732_v0  ;;  %v774_v43 = vmul.f32 %v921_v62, %v748_v40 }
 0x4f7   :  { %v769_v28 = vadd.f32 0.49746925, %v767_v25 }
 0x4f8   :  { %v768_v30 = vadd.f32 0.49746925, %v766_v26 }
 0x4f9   :  { %v771_v31 = vmul.f32 %v769_v28, %v733_v63 }
 0x4fa   :  { %v770_v33 = vmul.f32 %v768_v30, %v732_v0 }
 0x4fb   :  { %v773_v34 = vadd.f32 1.0, %v771_v31 }
 0x4fc   :  { %v772_v36 = vadd.f32 1.0, %v770_v33 }
 0x4fd   :  { %1350 = vrcp.f32 %v773_v34 }
 0x4fe   :  { %1352 = vrcp.f32 %v772_v36 }
 0x507   :  { %v1351_v42 = vpop.eup %1350 }
 0x508   :  { %v1353_v44 = vpop.eup %1352  ;;  %v779_v45 = vmul.f32 %v1351_v42, %v775_v41 }
 0x509   :  { %v778_v47 = vmul.f32 %v1353_v44, %v774_v43 }
 0x50a   :  { %v781_v46 = vadd.f32 1.0, %v779_v45 }
 0x50b   :  { %v780_v49 = vadd.f32 1.0, %v778_v47 }
 0x50c   :  { %v783_v52 = vmul.f32 %v781_v46, %v725_v50 }
 0x50d   :  { %v782_v51 = vmul.f32 %v780_v49, %v724_v48 }
 0x50f   :  { %1183 = vmatprep.mubr.msk.f32.mxu1 %vm642_vm1, %v782_v51 }
 0x510   :  { %1184 = vmatmul.mubr.msk.f32.vlgmr.msra.gmra.mrb[4].mxu1 %vm642_vm1, %v783_v52 }
 0x5e3   :  { %v1185_v54 = vpop.f32.mrb[4].mxu1 }
 0x5e4   :  { %v877_v55 = vadd.f32 %v1185_v54, %v923_v53  ;;  %v871_v57 = vpop.f32.mrb[5].mxu1 }
 0x5e5   :  { %v872_v59 = vadd.f32 %v923_v53, %v871_v57 }
 0x5e6   :  { %1354 = vtanh.f32 %v877_v55 }
 0x5e7   :  { %1356 = vtanh.f32 %v872_v59 }
 0x5f0   :  { %v1355_v58 = vpop.eup %1354 }
 0x5f1   :  { %v1357_v61 = vpop.eup %1356  ;;  %v890_v62 = vmul.f32 %v1355_v58, %v926_v56 }
 0x5f2   :  { %v889_v63 = vmul.f32 %v1357_v61, %v926_v56 }
 0x5f3   :  { %v899_v0 = vadd.f32 %v927_v60, %v890_v62 }
 0x5f4   :  { %v898_v1 = vadd.f32 %v927_v60, %v889_v63 }
 0x5f5   :  { %901 = vst [vmem:[%s1723_s15 + $0x8] sm:$0xff] %v899_v0 }
 0x5f6   :  { %900 = vst [vmem:[%s1723_s15] sm:$0xff] %v898_v1 }

// kernel: forward.6
= control target key start
LH: loop header
LB: loop body
LE: loop exit
PB: predicated region body
PF: predicated region fallthrough
CT: control target
= control target key end

     0   :  { %vm67_vm0 = vcmask 523264   ;;  %s1671_s1 = inlined_call_operand.vmem [shape: f32[64,128], index: 1, kind: input, shape index: {}]   ;;  %s1672_s0 = inlined_call_operand.vmem [shape: f32[16,64], index: 0, kind: input, shape index: {}]   ;;  %s1673_s3 = inlined_call_operand.vmem [shape: f32[128,128], index: 3, kind: input, shape index: {}]   ;;  %s1674_s2 = inlined_call_operand.vmem [shape: f32[1,128], index: 2, kind: input, shape index: {}]   ;;  %s1675_s5 = inlined_call_operand.vmem [shape: f32[128,128], index: 5, kind: input, shape index: {}]   ;;  %s1676_s7 = inlined_call_operand.vmem [shape: f32[128,64], index: 7, kind: input, shape index: {}]   ;;  %s1677_s4 = inlined_call_operand.vmem [shape: f32[1,128], index: 4, kind: input, shape index: {}]   ;;  %s1678_s6 = inlined_call_operand.vmem [shape: f32[1,128], index: 6, kind: input, shape index: {}]   ;;  %s1679_s9 = inlined_call_operand.vmem [shape: f32[64,64], index: 9, kind: input, shape index: {}]   ;;  %s1680_s8 = inlined_call_operand.vmem [shape: f32[1,64], index: 8, kind: input, shape index: {}]   ;;  %s1681_s11 = inlined_call_operand.vmem [shape: f32[64,128], index: 11, kind: input, shape index: {}]   ;;  %s1682_s10 = inlined_call_operand.vmem [shape: f32[1,64], index: 10, kind: input, shape index: {}]   ;;  %s1683_s12 = inlined_call_operand.vmem [shape: f32[1,128], index: 12, kind: input, shape index: {}]   ;;  %s1684_s13 = inlined_call_operand.vmem [shape: f32[1,128], index: 13, kind: input, shape index: {}]   ;;  %s1685_s14 = inlined_call_operand.vmem [shape: f32[1,128], index: 14, kind: input, shape index: {}]   ;;  %s1686_s15 = inlined_call_operand.vmem [shape: f32[16,128], index: 15, kind: output, shape index: {}]  }
   0x1   :  { %v52_v0 = vld [vmem:[%s1671_s1] sm:$0xff]  ;;  %v53_v1 = vld [vmem:[%s1671_s1 + $0x8] sm:$0xff]  ;;  %v54_v2 = vld [vmem:[%s1671_s1 + $0x10] sm:$0xff] }
   0x2   :  { %v1169_v3 = vpack.c.bf16 %v53_v1, %v52_v0  ;;  %v55_v4 = vld [vmem:[%s1671_s1 + $0x18] sm:$0xff]  ;;  %v56_v6 = vld [vmem:[%s1671_s1 + $0x20] sm:$0xff]  ;;  %v57_v7 = vld [vmem:[%s1671_s1 + $0x28] sm:$0xff] }
   0x3   :  { %v1173_v5 = vpack.c.bf16 %v55_v4, %v54_v2  ;;  %v50_v8 = vld [vmem:[%s1672_s0] sm:$0xff]  ;;  %v1177_v9 = vpack.c.bf16 %v57_v7, %v56_v6  ;;  %v58_v10 = vld [vmem:[%s1671_s1 + $0x30] sm:$0xff]  ;;  %v59_v11 = vld [vmem:[%s1671_s1 + $0x38] sm:$0xff] }
   0x4   :  { %1170 = vmatprep.subr.bf16.mxu0 %v1169_v3  ;;  %1023 = vmatprep.mubr.msk.f32.mxu0 %vm67_vm0, %v50_v8  ;;  %v1181_v12 = vpack.c.bf16 %v59_v11, %v58_v10  ;;  %v51_v13 = vld [vmem:[%s1672_s0 + $0x8] sm:$0xff]  ;;  %v209_v14 = vld [vmem:[%s1673_s3] sm:$0xff]  ;;  %v211_v17 = vld [vmem:[%s1673_s3 + $0x10] sm:$0xff] }
   0x5   :  { %1172 = vmatpush3.bf16.msra.mxu0 %v1169_v3  ;;  %v210_v15 = vld [vmem:[%s1673_s3 + $0x8] sm:$0xff]  ;;  %v212_v18 = vld [vmem:[%s1673_s3 + $0x18] sm:$0xff]  ;;  %v213_v20 = vld [vmem:[%s1673_s3 + $0x20] sm:$0xff] }
   0x6   :  { %1174 = vmatprep.subr.bf16.mxu0 %v1173_v5  ;;  %v1185_v16 = vpack.c.bf16 %v210_v15, %v209_v14  ;;  %v1189_v19 = vpack.c.bf16 %v212_v18, %v211_v17  ;;  %v214_v21 = vld [vmem:[%s1673_s3 + $0x28] sm:$0xff]  ;;  %v215_v22 = vld [vmem:[%s1673_s3 + $0x30] sm:$0xff]  ;;  %v216_v24 = vld [vmem:[%s1673_s3 + $0x38] sm:$0xff] }
   0x7   :  { %v1193_v23 = vpack.c.bf16 %v214_v21, %v213_v20  ;;  %v1197_v25 = vpack.c.bf16 %v216_v24, %v215_v22  ;;  %v217_v26 = vld [vmem:[%s1673_s3 + $0x40] sm:$0xff]  ;;  %v218_v27 = vld [vmem:[%s1673_s3 + $0x48] sm:$0xff]  ;;  %v219_v29 = vld [vmem:[%s1673_s3 + $0x50] sm:$0xff] }
   0x8   :  { %1186 = vmatprep.subr.bf16.mxu1 %v1185_v16  ;;  %v1201_v28 = vpack.c.bf16 %v218_v27, %v217_v26  ;;  %v220_v30 = vld [vmem:[%s1673_s3 + $0x58] sm:$0xff]  ;;  %v221_v32 = vld [vmem:[%s1673_s3 + $0x60] sm:$0xff]  ;;  %v222_v33 = vld [vmem:[%s1673_s3 + $0x68] sm:$0xff] }
   0x9   :  { %1176 = vmatpush3.bf16.msra.mxu0 %v1173_v5  ;;  %1188 = vmatpush3.bf16.msra.mxu1 %v1185_v16  ;;  %v1205_v31 = vpack.c.bf16 %v220_v30, %v219_v29  ;;  %v1209_v34 = vpack.c.bf16 %v222_v33, %v221_v32  ;;  %v223_v35 = vld [vmem:[%s1673_s3 + $0x70] sm:$0xff]  ;;  %v224_v36 = vld [vmem:[%s1673_s3 + $0x78] sm:$0xff]  ;;  %v901_v38 = vld [vmem:[%s1674_s2] ss:$0 sm:$0xff] }
   0xa   :  { %1178 = vmatprep.subr.bf16.mxu0 %v1177_v9  ;;  %1190 = vmatprep.subr.bf16.mxu1 %v1189_v19  ;;  %v1213_v37 = vpack.c.bf16 %v224_v36, %v223_v35 }
   0xd   :  { %1180 = vmatpush3.bf16.msra.mxu0 %v1177_v9  ;;  %1192 = vmatpush3.bf16.msra.mxu1 %v1189_v19 }
   0xe   :  { %1182 = vmatprep.subr.bf16.mxu0 %v1181_v12  ;;  %1194 = vmatprep.subr.bf16.mxu1 %v1193_v23 }
  0x11   :  { %1184 = vmatpush3.bf16.msra.mxu0 %v1181_v12  ;;  %1196 = vmatpush3.bf16.msra.mxu1 %v1193_v23 }
  0x12   :  { %1198 = vmatprep.subr.bf16.mxu1 %v1197_v25 }
  0x14   :  { %1024 = vmatmul.mubr.msk.f32.vlgmr.msra.gmra.mrb[0].mxu0 %vm67_vm0, %v51_v13 }
  0x15   :  { %1200 = vmatpush3.bf16.msra.mxu1 %v1197_v25 }
  0x16   :  { %1202 = vmatprep.subr.bf16.mxu1 %v1201_v28 }
  0x19   :  { %1204 = vmatpush3.bf16.msra.mxu1 %v1201_v28 }
  0x1a   :  { %1206 = vmatprep.subr.bf16.mxu1 %v1205_v31 }
  0x1d   :  { %1208 = vmatpush3.bf16.msra.mxu1 %v1205_v31 }
  0x1e   :  { %1210 = vmatprep.subr.bf16.mxu1 %v1209_v34 }
  0x21   :  { %1212 = vmatpush3.bf16.msra.mxu1 %v1209_v34 }
  0x22   :  { %1214 = vmatprep.subr.bf16.mxu1 %v1213_v37 }
  0x25   :  { %1216 = vmatpush3.bf16.msra.mxu1 %v1213_v37  ;;  %v367_v37 = vld [vmem:[%s1675_s5] sm:$0xff] }
  0xe7   :  { %v1025_v39 = vpop.f32.mrb[0].mxu0 }
  0xe8   :  { %v146_v40 = vadd.f32 %v1025_v39, %v901_v38  ;;  %v140_v41 = vpop.f32.mrb[1].mxu0 }
  0xe9   :  { %v141_v42 = vadd.f32 %v901_v38, %v140_v41  ;;  %v368_v38 = vld [vmem:[%s1675_s5 + $0x8] sm:$0xff]  ;;  %v369_v41 = vld [vmem:[%s1675_s5 + $0x10] sm:$0xff] }
  0xea   :  { %v152_v43 = vmul.f32 0.70710677, %v146_v40  ;;  %v150_v34 = vmul.f32 0.5, %v146_v40  ;;  %v1217_v39 = vpack.c.bf16 %v368_v38, %v367_v37  ;;  %v370_v40 = vld [vmem:[%s1675_s5 + $0x18] sm:$0xff] }
  0xeb   :  { %v151_v44 = vmul.f32 0.70710677, %v141_v42  ;;  %v149_v32 = vmul.f32 0.5, %v141_v42  ;;  %v1221_v42 = vpack.c.bf16 %v370_v40, %v369_v41 }
  0xec   :  { %v905_v45 = vclamps-f32 %v152_v43, 4.0  ;;  %1218 = vmatprep.subr.bf16.mxu0 %v1217_v39  ;;  %v371_v43 = vld [vmem:[%s1675_s5 + $0x20] sm:$0xff] }
  0xed   :  { %v904_v46 = vclamps-f32 %v151_v44, 4.0  ;;  %1220 = vmatpush3.bf16.msra.mxu0 %v1217_v39  ;;  %v372_v44 = vld [vmem:[%s1675_s5 + $0x28] sm:$0xff] }
  0xee   :  { %v158_v47 = vmul.f32 %v905_v45, %v905_v45  ;;  %1222 = vmatprep.subr.bf16.mxu0 %v1221_v42 }
  0xef   :  { %v157_v48 = vmul.f32 %v904_v46, %v904_v46 }
  0xf0   :  { %v176_v49 = vmul.f32 -1.1791603e-07, %v158_v47  ;;  %v160_v50 = vmul.f32 0.00022905065, %v158_v47 }
  0xf1   :  { %v175_v51 = vmul.f32 -1.1791603e-07, %v157_v48  ;;  %v159_v52 = vmul.f32 0.00022905065, %v157_v48  ;;  %1224 = vmatpush3.bf16.msra.mxu0 %v1221_v42 }
  0xf2   :  { %v178_v53 = vadd.f32 2.3547966e-05, %v176_v49  ;;  %v162_v56 = vadd.f32 0.003408291, %v160_v50  ;;  %v375_v49 = vld [vmem:[%s1675_s5 + $0x40] sm:$0xff]  ;;  %v376_v50 = vld [vmem:[%s1675_s5 + $0x48] sm:$0xff] }
  0xf3   :  { %v177_v54 = vadd.f32 2.3547966e-05, %v175_v51  ;;  %v161_v58 = vadd.f32 0.003408291, %v159_v52  ;;  %v1233_v51 = vpack.c.bf16 %v376_v50, %v375_v49  ;;  %v377_v52 = vld [vmem:[%s1675_s5 + $0x50] sm:$0xff] }
  0xf4   :  { %v180_v55 = vmul.f32 %v178_v53, %v158_v47  ;;  %v164_v62 = vmul.f32 %v162_v56, %v158_v47  ;;  %v378_v53 = vld [vmem:[%s1675_s5 + $0x58] sm:$0xff]  ;;  %v380_v56 = vld [vmem:[%s1675_s5 + $0x68] sm:$0xff] }
  0xf5   :  { %v179_v57 = vmul.f32 %v177_v54, %v157_v48  ;;  %v163_v0 = vmul.f32 %v161_v58, %v157_v48  ;;  %v1237_v54 = vpack.c.bf16 %v378_v53, %v377_v52  ;;  %v381_v58 = vld [vmem:[%s1675_s5 + $0x70] sm:$0xff] }
  0xf6   :  { %v182_v59 = vadd.f32 0.0010179626, %v180_v55  ;;  %v166_v4 = vadd.f32 0.050955694, %v164_v62  ;;  %v379_v55 = vld [vmem:[%s1675_s5 + $0x60] sm:$0xff]  ;;  %v466_v62 = vld [vmem:[%s1676_s7 + $0x8] sm:$0xff] }
  0xf7   :  { %v181_v60 = vadd.f32 0.0010179626, %v179_v57  ;;  %v165_v6 = vadd.f32 0.050955694, %v163_v0  ;;  %v1241_v57 = vpack.c.bf16 %v380_v56, %v379_v55 }
  0xf8   :  { %v184_v61 = vmul.f32 %v182_v59, %v158_v47  ;;  %v168_v10 = vmul.f32 %v166_v4, %v158_v47  ;;  %v382_v59 = vld [vmem:[%s1675_s5 + $0x78] sm:$0xff]  ;;  %v470_v4 = vld [vmem:[%s1676_s7 + $0x28] sm:$0xff] }
  0xf9   :  { %v183_v63 = vmul.f32 %v181_v60, %v157_v48  ;;  %v167_v12 = vmul.f32 %v165_v6, %v157_v48  ;;  %v1245_v60 = vpack.c.bf16 %v382_v59, %v381_v58  ;;  %v471_v6 = vld [vmem:[%s1676_s7 + $0x30] sm:$0xff] }
  0xfa   :  { %v186_v1 = vadd.f32 0.01407047, %v184_v61  ;;  %v170_v16 = vadd.f32 0.18520832, %v168_v10  ;;  %v465_v61 = vld [vmem:[%s1676_s7] sm:$0xff]  ;;  %v474_v10 = vld [vmem:[%s1676_s7 + $0x48] sm:$0xff] }
  0xfb   :  { %v185_v2 = vadd.f32 0.01407047, %v183_v63  ;;  %v169_v18 = vadd.f32 0.18520832, %v167_v12  ;;  %v467_v63 = vld [vmem:[%s1676_s7 + $0x10] sm:$0xff]  ;;  %v1249_v0 = vpack.c.bf16 %v466_v62, %v465_v61 }
  0xfc   :  { %v188_v3 = vmul.f32 %v186_v1, %v158_v47  ;;  %v172_v21 = vmul.f32 %v170_v16, %v158_v47  ;;  %v468_v1 = vld [vmem:[%s1676_s7 + $0x18] sm:$0xff]  ;;  %v475_v12 = vld [vmem:[%s1676_s7 + $0x50] sm:$0xff]  ;;  %v478_v16 = vld [vmem:[%s1676_s7 + $0x68] sm:$0xff] }
  0xfd   :  { %v187_v5 = vmul.f32 %v185_v2, %v157_v48  ;;  %v171_v22 = vmul.f32 %v169_v18, %v157_v48  ;;  %v1253_v2 = vpack.c.bf16 %v468_v1, %v467_v63  ;;  %1250 = vmatprep.subr.bf16.mxu1 %v1249_v0  ;;  %v906_v18 = vld [vmem:[%s1677_s4] ss:$0 sm:$0xff] }
  0xfe   :  { %v190_v7 = vadd.f32 0.11098505, %v188_v3  ;;  %v174_v23 = vadd.f32 1.1283791, %v172_v21  ;;  %v469_v3 = vld [vmem:[%s1676_s7 + $0x20] sm:$0xff] }
  0xff   :  { %v189_v8 = vadd.f32 0.11098505, %v187_v5  ;;  %v173_v24 = vadd.f32 1.1283791, %v171_v22  ;;  %v1257_v5 = vpack.c.bf16 %v470_v4, %v469_v3 }
 0x100   :  { %v192_v9 = vmul.f32 %v190_v7, %v158_v47  ;;  %v200_v25 = vmul.f32 %v905_v45, %v174_v23  ;;  %v1225_v45 = vpack.c.bf16 %v372_v44, %v371_v43  ;;  %v472_v7 = vld [vmem:[%s1676_s7 + $0x38] sm:$0xff] }
 0x101   :  { %v191_v11 = vmul.f32 %v189_v8, %v157_v48  ;;  %v199_v27 = vmul.f32 %v904_v46, %v173_v24  ;;  %v373_v46 = vld [vmem:[%s1675_s5 + $0x30] sm:$0xff]  ;;  %v1261_v8 = vpack.c.bf16 %v472_v7, %v471_v6 }
 0x102   :  { %v194_v13 = vadd.f32 0.49746925, %v192_v9  ;;  %1226 = vmatprep.subr.bf16.mxu0 %v1225_v45  ;;  %v473_v9 = vld [vmem:[%s1676_s7 + $0x40] sm:$0xff] }
 0x103   :  { %v193_v14 = vadd.f32 0.49746925, %v191_v11  ;;  %1228 = vmatpush3.bf16.msra.mxu0 %v1225_v45  ;;  %v1265_v11 = vpack.c.bf16 %v474_v10, %v473_v9 }
 0x104   :  { %v196_v15 = vmul.f32 %v194_v13, %v158_v47  ;;  %v374_v47 = vld [vmem:[%s1675_s5 + $0x38] sm:$0xff] }
 0x105   :  { %v195_v17 = vmul.f32 %v193_v14, %v157_v48  ;;  %v1229_v48 = vpack.c.bf16 %v374_v47, %v373_v46  ;;  %v476_v13 = vld [vmem:[%s1676_s7 + $0x58] sm:$0xff] }
 0x106   :  { %v198_v19 = vadd.f32 1.0, %v196_v15  ;;  %v1269_v14 = vpack.c.bf16 %v476_v13, %v475_v12  ;;  %v477_v15 = vld [vmem:[%s1676_s7 + $0x60] sm:$0xff] }
 0x107   :  { %v197_v20 = vadd.f32 1.0, %v195_v17  ;;  %1230 = vmatprep.subr.bf16.mxu0 %v1229_v48  ;;  %v1273_v17 = vpack.c.bf16 %v478_v16, %v477_v15 }
 0x108   :  { %1313 = vrcp.f32 %v198_v19  ;;  %1232 = vmatpush3.bf16.msra.mxu0 %v1229_v48 }
 0x109   :  { %1315 = vrcp.f32 %v197_v20  ;;  %1234 = vmatprep.subr.bf16.mxu0 %v1233_v51 }
 0x10c   :  { %1236 = vmatpush3.bf16.msra.mxu0 %v1233_v51 }
 0x10d   :  { %1238 = vmatprep.subr.bf16.mxu0 %v1237_v54 }
 0x110   :  { %1240 = vmatpush3.bf16.msra.mxu0 %v1237_v54 }
 0x111   :  { %1242 = vmatprep.subr.bf16.mxu0 %v1241_v57 }
 0x112   :  { %v1314_v26 = vpop.eup %1313 }
 0x113   :  { %v1316_v28 = vpop.eup %1315  ;;  %v204_v29 = vmul.f32 %v1314_v26, %v200_v25 }
 0x114   :  { %v203_v30 = vmul.f32 %v1316_v28, %v199_v27  ;;  %1244 = vmatpush3.bf16.msra.mxu0 %v1241_v57 }
 0x115   :  { %v206_v31 = vadd.f32 1.0, %v204_v29  ;;  %1246 = vmatprep.subr.bf16.mxu0 %v1245_v60 }
 0x116   :  { %v205_v33 = vadd.f32 1.0, %v203_v30 }
 0x117   :  { %v208_v36 = vmul.f32 %v206_v31, %v150_v34 }
 0x118   :  { %v207_v35 = vmul.f32 %v205_v33, %v149_v32  ;;  %1248 = vmatpush3.bf16.msra.mxu0 %v1245_v60 }
 0x11a   :  { %1058 = vmatprep.mubr.f32.mxu1 %v207_v35 }
 0x11b   :  { %1059 = vmatmul.mubr.f32.vlgmr.msra.gmra.mrb[0].mxu1 %v208_v36 }
 0x11c   :  { %1252 = vmatpush3.bf16.msra.mxu1 %v1249_v0 }
 0x11d   :  { %1254 = vmatprep.subr.bf16.mxu1 %v1253_v2 }
 0x120   :  { %1256 = vmatpush3.bf16.msra.mxu1 %v1253_v2 }
 0x121   :  { %1258 = vmatprep.subr.bf16.mxu1 %v1257_v5 }
 0x124   :  { %1260 = vmatpush3.bf16.msra.mxu1 %v1257_v5 }
 0x125   :  { %1262 = vmatprep.subr.bf16.mxu1 %v1261_v8 }
 0x128   :  { %1264 = vmatpush3.bf16.msra.mxu1 %v1261_v8 }
 0x129   :  { %1266 = vmatprep.subr.bf16.mxu1 %v1265_v11 }
 0x12c   :  { %1268 = vmatpush3.bf16.msra.mxu1 %v1265_v11 }
 0x12d   :  { %1270 = vmatprep.subr.bf16.mxu1 %v1269_v14 }
 0x130   :  { %1272 = vmatpush3.bf16.msra.mxu1 %v1269_v14 }
 0x131   :  { %1274 = vmatprep.subr.bf16.mxu1 %v1273_v17 }
 0x134   :  { %1276 = vmatpush3.bf16.msra.mxu1 %v1273_v17  ;;  %v479_v17 = vld [vmem:[%s1676_s7 + $0x70] sm:$0xff] }
 0x1ee   :  { %v1060_v19 = vpop.f32.mrb[0].mxu1 }
 0x1ef   :  { %v304_v20 = vadd.f32 %v1060_v19, %v906_v18  ;;  %v298_v21 = vpop.f32.mrb[1].mxu1 }
 0x1f0   :  { %v299_v22 = vadd.f32 %v906_v18, %v298_v21  ;;  %v480_v18 = vld [vmem:[%s1676_s7 + $0x78] sm:$0xff]  ;;  %v909_v21 = vld [vmem:[%s1678_s6] ss:$0 sm:$0xff] }
 0x1f1   :  { %v310_v23 = vmul.f32 0.70710677, %v304_v20  ;;  %v308_v14 = vmul.f32 0.5, %v304_v20  ;;  %v1277_v19 = vpack.c.bf16 %v480_v18, %v479_v17 }
 0x1f2   :  { %v309_v24 = vmul.f32 0.70710677, %v299_v22  ;;  %v307_v12 = vmul.f32 0.5, %v299_v22 }
 0x1f3   :  { %v908_v25 = vclamps-f32 %v310_v23, 4.0  ;;  %1278 = vmatprep.subr.bf16.mxu1 %v1277_v19 }
 0x1f4   :  { %v907_v26 = vclamps-f32 %v309_v24, 4.0  ;;  %1280 = vmatpush3.bf16.msra.mxu1 %v1277_v19 }
 0x1f5   :  { %v316_v27 = vmul.f32 %v908_v25, %v908_v25 }
 0x1f6   :  { %v315_v28 = vmul.f32 %v907_v26, %v907_v26 }
 0x1f7   :  { %v334_v29 = vmul.f32 -1.1791603e-07, %v316_v27  ;;  %v318_v30 = vmul.f32 0.00022905065, %v316_v27 }
 0x1f8   :  { %v333_v31 = vmul.f32 -1.1791603e-07, %v315_v28  ;;  %v317_v33 = vmul.f32 0.00022905065, %v315_v28 }
 0x1f9   :  { %v336_v32 = vadd.f32 2.3547966e-05, %v334_v29  ;;  %v320_v36 = vadd.f32 0.003408291, %v318_v30  ;;  %v626_v29 = vld [vmem:[%s1679_s9 + $0x18] sm:$0xff] }
 0x1fa   :  { %v335_v34 = vadd.f32 2.3547966e-05, %v333_v31  ;;  %v319_v39 = vadd.f32 0.003408291, %v317_v33  ;;  %v627_v31 = vld [vmem:[%s1679_s9 + $0x20] sm:$0xff] }
 0x1fb   :  { %v338_v35 = vmul.f32 %v336_v32, %v316_v27  ;;  %v322_v42 = vmul.f32 %v320_v36, %v316_v27  ;;  %v628_v32 = vld [vmem:[%s1679_s9 + $0x28] sm:$0xff] }
 0x1fc   :  { %v337_v37 = vmul.f32 %v335_v34, %v315_v28  ;;  %v321_v45 = vmul.f32 %v319_v39, %v315_v28  ;;  %v1289_v33 = vpack.c.bf16 %v628_v32, %v627_v31  ;;  %v629_v34 = vld [vmem:[%s1679_s9 + $0x30] sm:$0xff] }
 0x1fd   :  { %v340_v38 = vadd.f32 0.0010179626, %v338_v35  ;;  %v324_v48 = vadd.f32 0.050955694, %v322_v42  ;;  %v630_v35 = vld [vmem:[%s1679_s9 + $0x38] sm:$0xff] }
 0x1fe   :  { %v339_v41 = vadd.f32 0.0010179626, %v337_v37  ;;  %v323_v51 = vadd.f32 0.050955694, %v321_v45  ;;  %v1293_v36 = vpack.c.bf16 %v630_v35, %v629_v34  ;;  %v910_v37 = vld [vmem:[%s1680_s8] ss:$0 sm:$0xff] }
 0x1ff   :  { %v342_v40 = vmul.f32 %v340_v38, %v316_v27  ;;  %v326_v54 = vmul.f32 %v324_v48, %v316_v27 }
 0x200   :  { %v341_v43 = vmul.f32 %v339_v41, %v315_v28  ;;  %v325_v57 = vmul.f32 %v323_v51, %v315_v28 }
 0x201   :  { %v344_v44 = vadd.f32 0.01407047, %v342_v40  ;;  %v328_v60 = vadd.f32 0.18520832, %v326_v54 }
 0x202   :  { %v343_v46 = vadd.f32 0.01407047, %v341_v43  ;;  %v327_v63 = vadd.f32 0.18520832, %v325_v57 }
 0x203   :  { %v346_v47 = vmul.f32 %v344_v44, %v316_v27  ;;  %v330_v1 = vmul.f32 %v328_v60, %v316_v27 }
 0x204   :  { %v345_v49 = vmul.f32 %v343_v46, %v315_v28  ;;  %v329_v2 = vmul.f32 %v327_v63, %v315_v28 }
 0x205   :  { %v348_v50 = vadd.f32 0.11098505, %v346_v47  ;;  %v332_v3 = vadd.f32 1.1283791, %v330_v1 }
 0x206   :  { %v347_v52 = vadd.f32 0.11098505, %v345_v49  ;;  %v331_v4 = vadd.f32 1.1283791, %v329_v2 }
 0x207   :  { %v350_v53 = vmul.f32 %v348_v50, %v316_v27  ;;  %v358_v5 = vmul.f32 %v908_v25, %v332_v3  ;;  %v623_v25 = vld [vmem:[%s1679_s9] sm:$0xff] }
 0x208   :  { %v349_v55 = vmul.f32 %v347_v52, %v315_v28  ;;  %v357_v7 = vmul.f32 %v907_v26, %v331_v4  ;;  %v624_v26 = vld [vmem:[%s1679_s9 + $0x8] sm:$0xff] }
 0x209   :  { %v352_v56 = vadd.f32 0.49746925, %v350_v53 }
 0x20a   :  { %v351_v58 = vadd.f32 0.49746925, %v349_v55 }
 0x20b   :  { %v354_v59 = vmul.f32 %v352_v56, %v316_v27  ;;  %v1281_v27 = vpack.c.bf16 %v624_v26, %v623_v25 }
 0x20c   :  { %v353_v61 = vmul.f32 %v351_v58, %v315_v28  ;;  %v625_v28 = vld [vmem:[%s1679_s9 + $0x10] sm:$0xff] }
 0x20d   :  { %v356_v62 = vadd.f32 1.0, %v354_v59  ;;  %1282 = vmatprep.subr.bf16.mxu0 %v1281_v27  ;;  %v1285_v30 = vpack.c.bf16 %v626_v29, %v625_v28 }
 0x20e   :  { %v355_v0 = vadd.f32 1.0, %v353_v61 }
 0x20f   :  { %1317 = vrcp.f32 %v356_v62 }
 0x210   :  { %1319 = vrcp.f32 %v355_v0 }
 0x219   :  { %v1318_v6 = vpop.eup %1317 }
 0x21a   :  { %v1320_v8 = vpop.eup %1319  ;;  %v362_v9 = vmul.f32 %v1318_v6, %v358_v5 }
 0x21b   :  { %v361_v10 = vmul.f32 %v1320_v8, %v357_v7 }
 0x21c   :  { %v364_v11 = vadd.f32 1.0, %v362_v9 }
 0x21d   :  { %v363_v13 = vadd.f32 1.0, %v361_v10 }
 0x21e   :  { %v366_v16 = vmul.f32 %v364_v11, %v308_v14 }
 0x21f   :  { %v365_v15 = vmul.f32 %v363_v13, %v307_v12 }
 0x221   :  { %1093 = vmatprep.mubr.f32.mxu0 %v365_v15 }
 0x222   :  { %1094 = vmatmul.mubr.f32.vlgmr.msra.gmra.mrb[2].mxu0 %v366_v16 }
 0x223   :  { %1284 = vmatpush3.bf16.msra.mxu0 %v1281_v27 }
 0x224   :  { %1286 = vmatprep.subr.bf16.mxu0 %v1285_v30 }
 0x227   :  { %1288 = vmatpush3.bf16.msra.mxu0 %v1285_v30 }
 0x228   :  { %1290 = vmatprep.subr.bf16.mxu0 %v1289_v33 }
 0x22b   :  { %1292 = vmatpush3.bf16.msra.mxu0 %v1289_v33 }
 0x22c   :  { %1294 = vmatprep.subr.bf16.mxu0 %v1293_v36 }
 0x22f   :  { %1296 = vmatpush3.bf16.msra.mxu0 %v1293_v36  ;;  %v779_v36 = vld [vmem:[%s1681_s11] sm:$0xff] }
 0x2f5   :  { %v1095_v20 = vpop.f32.mrb[2].mxu0 }
 0x2f6   :  { %v456_v22 = vpop.f32.mrb[3].mxu0  ;;  %v462_v24 = vadd.f32 %v1095_v20, %v909_v21 }
 0x2f7   :  { %v457_v23 = vadd.f32 %v909_v21, %v456_v22 }
 0x2f9   :  { %1128 = vmatprep.mubr.f32.mxu1 %v457_v23 }
 0x2fa   :  { %1129 = vmatmul.mubr.f32.vlgmr.msra.gmra.mrb[2].mxu1 %v462_v24 }
 0x3cd   :  { %v1130_v38 = vpop.f32.mrb[2].mxu1 }
 0x3ce   :  { %v560_v39 = vadd.f32 %v1130_v38, %v910_v37  ;;  %v554_v41 = vpop.f32.mrb[3].mxu1 }
 0x3cf   :  { %v555_v40 = vadd.f32 %v910_v37, %v554_v41  ;;  %v780_v37 = vld [vmem:[%s1681_s11 + $0x8] sm:$0xff]  ;;  %v782_v41 = vld [vmem:[%s1681_s11 + $0x18] sm:$0xff] }
 0x3d0   :  { %v566_v42 = vmul.f32 0.70710677, %v560_v39  ;;  %v564_v33 = vmul.f32 0.5, %v560_v39  ;;  %v1297_v38 = vpack.c.bf16 %v780_v37, %v779_v36  ;;  %v781_v39 = vld [vmem:[%s1681_s11 + $0x10] sm:$0xff] }
 0x3d1   :  { %v565_v43 = vmul.f32 0.70710677, %v555_v40  ;;  %v563_v31 = vmul.f32 0.5, %v555_v40  ;;  %v1301_v40 = vpack.c.bf16 %v782_v41, %v781_v39 }
 0x3d2   :  { %v912_v44 = vclamps-f32 %v566_v42, 4.0  ;;  %1298 = vmatprep.subr.bf16.mxu0 %v1297_v38  ;;  %v783_v42 = vld [vmem:[%s1681_s11 + $0x20] sm:$0xff] }
 0x3d3   :  { %v911_v45 = vclamps-f32 %v565_v43, 4.0  ;;  %v784_v43 = vld [vmem:[%s1681_s11 + $0x28] sm:$0xff] }
 0x3d4   :  { %v572_v46 = vmul.f32 %v912_v44, %v912_v44 }
 0x3d5   :  { %v571_v47 = vmul.f32 %v911_v45, %v911_v45 }
 0x3d6   :  { %v590_v48 = vmul.f32 -1.1791603e-07, %v572_v46  ;;  %v574_v49 = vmul.f32 0.00022905065, %v572_v46 }
 0x3d7   :  { %v589_v50 = vmul.f32 -1.1791603e-07, %v571_v47  ;;  %v573_v52 = vmul.f32 0.00022905065, %v571_v47 }
 0x3d8   :  { %v592_v51 = vadd.f32 2.3547966e-05, %v590_v48  ;;  %v576_v55 = vadd.f32 0.003408291, %v574_v49  ;;  %v913_v48 = vld [vmem:[%s1682_s10] ss:$0 sm:$0xff] }
 0x3d9   :  { %v591_v53 = vadd.f32 2.3547966e-05, %v589_v50  ;;  %v575_v58 = vadd.f32 0.003408291, %v573_v52 }
 0x3da   :  { %v594_v54 = vmul.f32 %v592_v51, %v572_v46  ;;  %v578_v61 = vmul.f32 %v576_v55, %v572_v46 }
 0x3db   :  { %v593_v56 = vmul.f32 %v591_v53, %v571_v47  ;;  %v577_v0 = vmul.f32 %v575_v58, %v571_v47 }
 0x3dc   :  { %v596_v57 = vadd.f32 0.0010179626, %v594_v54  ;;  %v580_v3 = vadd.f32 0.050955694, %v578_v61 }
 0x3dd   :  { %v595_v59 = vadd.f32 0.0010179626, %v593_v56  ;;  %v579_v6 = vadd.f32 0.050955694, %v577_v0 }
 0x3de   :  { %v598_v60 = vmul.f32 %v596_v57, %v572_v46  ;;  %v582_v9 = vmul.f32 %v580_v3, %v572_v46 }
 0x3df   :  { %v597_v62 = vmul.f32 %v595_v59, %v571_v47  ;;  %v581_v12 = vmul.f32 %v579_v6, %v571_v47 }
 0x3e0   :  { %v600_v63 = vadd.f32 0.01407047, %v598_v60  ;;  %v584_v15 = vadd.f32 0.18520832, %v582_v9 }
 0x3e1   :  { %v599_v1 = vadd.f32 0.01407047, %v597_v62  ;;  %v583_v18 = vadd.f32 0.18520832, %v581_v12 }
 0x3e2   :  { %v602_v2 = vmul.f32 %v600_v63, %v572_v46  ;;  %v586_v21 = vmul.f32 %v584_v15, %v572_v46 }
 0x3e3   :  { %v601_v4 = vmul.f32 %v599_v1, %v571_v47  ;;  %v585_v20 = vmul.f32 %v583_v18, %v571_v47 }
 0x3e4   :  { %v604_v5 = vadd.f32 0.11098505, %v602_v2  ;;  %v588_v22 = vadd.f32 1.1283791, %v586_v21 }
 0x3e5   :  { %v603_v7 = vadd.f32 0.11098505, %v601_v4  ;;  %v587_v23 = vadd.f32 1.1283791, %v585_v20 }
 0x3e6   :  { %v606_v8 = vmul.f32 %v604_v5, %v572_v46  ;;  %v614_v24 = vmul.f32 %v912_v44, %v588_v22  ;;  %v1305_v44 = vpack.c.bf16 %v784_v43, %v783_v42 }
 0x3e7   :  { %v605_v10 = vmul.f32 %v603_v7, %v571_v47  ;;  %v613_v26 = vmul.f32 %v911_v45, %v587_v23  ;;  %v785_v45 = vld [vmem:[%s1681_s11 + $0x30] sm:$0xff] }
 0x3e8   :  { %v608_v11 = vadd.f32 0.49746925, %v606_v8 }
 0x3e9   :  { %v607_v13 = vadd.f32 0.49746925, %v605_v10 }
 0x3ea   :  { %v610_v14 = vmul.f32 %v608_v11, %v572_v46  ;;  %v786_v46 = vld [vmem:[%s1681_s11 + $0x38] sm:$0xff] }
 0x3eb   :  { %v609_v16 = vmul.f32 %v607_v13, %v571_v47  ;;  %v1309_v47 = vpack.c.bf16 %v786_v46, %v785_v45 }
 0x3ec   :  { %v612_v17 = vadd.f32 1.0, %v610_v14 }
 0x3ed   :  { %v611_v19 = vadd.f32 1.0, %v609_v16 }
 0x3ee   :  { %1321 = vrcp.f32 %v612_v17 }
 0x3ef   :  { %1323 = vrcp.f32 %v611_v19 }
 0x3f8   :  { %v1322_v25 = vpop.eup %1321 }
 0x3f9   :  { %v1324_v27 = vpop.eup %1323  ;;  %v618_v28 = vmul.f32 %v1322_v25, %v614_v24 }
 0x3fa   :  { %v617_v29 = vmul.f32 %v1324_v27, %v613_v26 }
 0x3fb   :  { %v620_v30 = vadd.f32 1.0, %v618_v28 }
 0x3fc   :  { %v619_v32 = vadd.f32 1.0, %v617_v29 }
 0x3fd   :  { %v622_v35 = vmul.f32 %v620_v30, %v564_v33 }
 0x3fe   :  { %v621_v34 = vmul.f32 %v619_v32, %v563_v31 }
 0x400   :  { %1147 = vmatprep.mubr.msk.f32.mxu0 %vm67_vm0, %v621_v34 }
 0x401   :  { %1148 = vmatmul.mubr.msk.f32.vlgmr.msra.gmra.mrb[4].mxu0 %vm67_vm0, %v622_v35 }
 0x402   :  { %1300 = vmatpush3.bf16.msra.mxu0 %v1297_v38 }
 0x403   :  { %1302 = vmatprep.subr.bf16.mxu0 %v1301_v40 }
 0x406   :  { %1304 = vmatpush3.bf16.msra.mxu0 %v1301_v40 }
 0x407   :  { %1306 = vmatprep.subr.bf16.mxu0 %v1305_v44 }
 0x40a   :  { %1308 = vmatpush3.bf16.msra.mxu0 %v1305_v44 }
 0x40b   :  { %1310 = vmatprep.subr.bf16.mxu0 %v1309_v47 }
 0x40e   :  { %1312 = vmatpush3.bf16.msra.mxu0 %v1309_v47  ;;  %v918_v47 = vld [vmem:[%s1683_s12] ss:$0 sm:$0xff] }
 0x4d4   :  { %v1149_v49 = vpop.f32.mrb[4].mxu0 }
 0x4d5   :  { %v716_v50 = vadd.f32 %v1149_v49, %v913_v48  ;;  %v710_v51 = vpop.f32.mrb[5].mxu0 }
 0x4d6   :  { %v711_v52 = vadd.f32 %v913_v48, %v710_v51 }
 0x4d7   :  { %v722_v53 = vmul.f32 0.70710677, %v716_v50  ;;  %v720_v44 = vmul.f32 0.5, %v716_v50  ;;  %v921_v50 = vld [vmem:[%s1684_s13] ss:$0 sm:$0xff] }
 0x4d8   :  { %v721_v54 = vmul.f32 0.70710677, %v711_v52  ;;  %v719_v42 = vmul.f32 0.5, %v711_v52 }
 0x4d9   :  { %v917_v55 = vclamps-f32 %v722_v53, 4.0 }
 0x4da   :  { %v916_v56 = vclamps-f32 %v721_v54, 4.0  ;;  %v922_v54 = vld [vmem:[%s1685_s14] ss:$0 sm:$0xff] }
 0x4db   :  { %v728_v57 = vmul.f32 %v917_v55, %v917_v55 }
 0x4dc   :  { %v727_v58 = vmul.f32 %v916_v56, %v916_v56 }
 0x4dd   :  { %v746_v59 = vmul.f32 -1.1791603e-07, %v728_v57  ;;  %v730_v60 = vmul.f32 0.00022905065, %v728_v57 }
 0x4de   :  { %v745_v61 = vmul.f32 -1.1791603e-07, %v727_v58  ;;  %v729_v63 = vmul.f32 0.00022905065, %v727_v58 }
 0x4df   :  { %v748_v62 = vadd.f32 2.3547966e-05, %v746_v59  ;;  %v732_v2 = vadd.f32 0.003408291, %v730_v60 }
 0x4e0   :  { %v747_v0 = vadd.f32 2.3547966e-05, %v745_v61  ;;  %v731_v5 = vadd.f32 0.003408291, %v729_v63 }
 0x4e1   :  { %v750_v1 = vmul.f32 %v748_v62, %v728_v57  ;;  %v734_v8 = vmul.f32 %v732_v2, %v728_v57 }
 0x4e2   :  { %v749_v3 = vmul.f32 %v747_v0, %v727_v58  ;;  %v733_v11 = vmul.f32 %v731_v5, %v727_v58 }
 0x4e3   :  { %v752_v4 = vadd.f32 0.0010179626, %v750_v1  ;;  %v736_v14 = vadd.f32 0.050955694, %v734_v8 }
 0x4e4   :  { %v751_v6 = vadd.f32 0.0010179626, %v749_v3  ;;  %v735_v17 = vadd.f32 0.050955694, %v733_v11 }
 0x4e5   :  { %v754_v7 = vmul.f32 %v752_v4, %v728_v57  ;;  %v738_v21 = vmul.f32 %v736_v14, %v728_v57 }
 0x4e6   :  { %v753_v9 = vmul.f32 %v751_v6, %v727_v58  ;;  %v737_v23 = vmul.f32 %v735_v17, %v727_v58 }
 0x4e7   :  { %v756_v10 = vadd.f32 0.01407047, %v754_v7  ;;  %v740_v26 = vadd.f32 0.18520832, %v738_v21 }
 0x4e8   :  { %v755_v12 = vadd.f32 0.01407047, %v753_v9  ;;  %v739_v29 = vadd.f32 0.18520832, %v737_v23 }
 0x4e9   :  { %v758_v13 = vmul.f32 %v756_v10, %v728_v57  ;;  %v742_v31 = vmul.f32 %v740_v26, %v728_v57 }
 0x4ea   :  { %v757_v15 = vmul.f32 %v755_v12, %v727_v58  ;;  %v741_v32 = vmul.f32 %v739_v29, %v727_v58 }
 0x4eb   :  { %v760_v16 = vadd.f32 0.11098505, %v758_v13  ;;  %v744_v33 = vadd.f32 1.1283791, %v742_v31 }
 0x4ec   :  { %v759_v18 = vadd.f32 0.11098505, %v757_v15  ;;  %v743_v34 = vadd.f32 1.1283791, %v741_v32 }
 0x4ed   :  { %v762_v19 = vmul.f32 %v760_v16, %v728_v57  ;;  %v770_v35 = vmul.f32 %v917_v55, %v744_v33 }
 0x4ee   :  { %v761_v20 = vmul.f32 %v759_v18, %v727_v58  ;;  %v769_v37 = vmul.f32 %v916_v56, %v743_v34 }
 0x4ef   :  { %v764_v22 = vadd.f32 0.49746925, %v762_v19 }
 0x4f0   :  { %v763_v24 = vadd.f32 0.49746925, %v761_v20 }
 0x4f1   :  { %v766_v25 = vmul.f32 %v764_v22, %v728_v57 }
 0x4f2   :  { %v765_v27 = vmul.f32 %v763_v24, %v727_v58 }
 0x4f3   :  { %v768_v28 = vadd.f32 1.0, %v766_v25 }
 0x4f4   :  { %v767_v30 = vadd.f32 1.0, %v765_v27 }
 0x4f5   :  { %1325 = vrcp.f32 %v768_v28 }
 0x4f6   :  { %1327 = vrcp.f32 %v767_v30 }
 0x4ff   :  { %v1326_v36 = vpop.eup %1325 }
 0x500   :  { %v1328_v38 = vpop.eup %1327  ;;  %v774_v39 = vmul.f32 %v1326_v36, %v770_v35 }
 0x501   :  { %v773_v41 = vmul.f32 %v1328_v38, %v769_v37 }
 0x502   :  { %v776_v40 = vadd.f32 1.0, %v774_v39 }
 0x503   :  { %v775_v43 = vadd.f32 1.0, %v773_v41 }
 0x504   :  { %v778_v46 = vmul.f32 %v776_v40, %v720_v44 }
 0x505   :  { %v777_v45 = vmul.f32 %v775_v43, %v719_v42 }
 0x507   :  { %1166 = vmatprep.mubr.msk.f32.mxu0 %vm67_vm0, %v777_v45 }
 0x508   :  { %1167 = vmatmul.mubr.msk.f32.vlgmr.msra.gmra.mrb[6].mxu0 %vm67_vm0, %v778_v46 }
 0x5db   :  { %v1168_v48 = vpop.f32.mrb[6].mxu0 }
 0x5dc   :  { %v872_v49 = vadd.f32 %v1168_v48, %v918_v47  ;;  %v866_v51 = vpop.f32.mrb[7].mxu0 }
 0x5dd   :  { %v867_v53 = vadd.f32 %v918_v47, %v866_v51 }
 0x5de   :  { %1329 = vtanh.f32 %v872_v49 }
 0x5df   :  { %1331 = vtanh.f32 %v867_v53 }
 0x5e8   :  { %v1330_v52 = vpop.eup %1329 }
 0x5e9   :  { %v1332_v55 = vpop.eup %1331  ;;  %v885_v56 = vmul.f32 %v1330_v52, %v921_v50 }
 0x5ea   :  { %v884_v57 = vmul.f32 %v1332_v55, %v921_v50 }
 0x5eb   :  { %v894_v58 = vadd.f32 %v922_v54, %v885_v56 }
 0x5ec   :  { %v893_v59 = vadd.f32 %v922_v54, %v884_v57 }
 0x5ed   :  { %896 = vst [vmem:[%s1686_s15 + $0x8] sm:$0xff] %v894_v58 }
 0x5ee   :  { %895 = vst [vmem:[%s1686_s15] sm:$0xff] %v893_v59 }

// kernel: forward.8
= control target key start
LH: loop header
LB: loop body
LE: loop exit
PB: predicated region body
PF: predicated region fallthrough
CT: control target
= control target key end

     0   :  { %vm225_vm0 = vcmask 523264   ;;  %vm630_vm1 = vcmask 261120   ;;  %s1476_s1 = inlined_call_operand.vmem [shape: f32[128,64], index: 1, kind: input, shape index: {}]   ;;  %s1477_s0 = inlined_call_operand.vmem [shape: f32[16,128], index: 0, kind: input, shape index: {}]   ;;  %s1478_s3 = inlined_call_operand.vmem [shape: f32[64,64], index: 3, kind: input, shape index: {}]   ;;  %s1479_s2 = inlined_call_operand.vmem [shape: f32[1,64], index: 2, kind: input, shape index: {}]   ;;  %s1480_s5 = inlined_call_operand.vmem [shape: f32[64,64], index: 5, kind: input, shape index: {}]   ;;  %s1481_s7 = inlined_call_operand.vmem [shape: f32[64,32], index: 7, kind: input, shape index: {}]   ;;  %s1482_s4 = inlined_call_operand.vmem [shape: f32[1,64], index: 4, kind: input, shape index: {}]   ;;  %s1483_s6 = inlined_call_operand.vmem [shape: f32[1,64], index: 6, kind: input, shape index: {}]   ;;  %s1484_s9 = inlined_call_operand.vmem [shape: f32[32,32], index: 9, kind: input, shape index: {}]   ;;  %s1485_s8 = inlined_call_operand.vmem [shape: f32[1,32], index: 8, kind: input, shape index: {}]   ;;  %s1486_s11 = inlined_call_operand.vmem [shape: f32[32,128], index: 11, kind: input, shape index: {}]   ;;  %s1487_s10 = inlined_call_operand.vmem [shape: f32[1,32], index: 10, kind: input, shape index: {}]   ;;  %s1488_s12 = inlined_call_operand.vmem [shape: f32[1,128], index: 12, kind: input, shape index: {}]   ;;  %s1489_s13 = inlined_call_operand.vmem [shape: f32[1,128], index: 13, kind: input, shape index: {}]   ;;  %s1490_s14 = inlined_call_operand.vmem [shape: f32[1,128], index: 14, kind: input, shape index: {}]   ;;  %s1491_s15 = inlined_call_operand.vmem [shape: f32[16,128], index: 15, kind: output, shape index: {}]  }
   0x1   :  { %v52_v0 = vld [vmem:[%s1476_s1] sm:$0xff]  ;;  %v53_v1 = vld [vmem:[%s1476_s1 + $0x8] sm:$0xff]  ;;  %v54_v2 = vld [vmem:[%s1476_s1 + $0x10] sm:$0xff] }
   0x2   :  { %v1090_v3 = vpack.c.bf16 %v53_v1, %v52_v0  ;;  %v55_v4 = vld [vmem:[%s1476_s1 + $0x18] sm:$0xff]  ;;  %v56_v6 = vld [vmem:[%s1476_s1 + $0x20] sm:$0xff]  ;;  %v57_v7 = vld [vmem:[%s1476_s1 + $0x28] sm:$0xff] }
   0x3   :  { %v1094_v5 = vpack.c.bf16 %v55_v4, %v54_v2  ;;  %v1098_v8 = vpack.c.bf16 %v57_v7, %v56_v6  ;;  %v50_v9 = vld [vmem:[%s1477_s0] sm:$0xff]  ;;  %v58_v10 = vld [vmem:[%s1476_s1 + $0x30] sm:$0xff]  ;;  %v59_v11 = vld [vmem:[%s1476_s1 + $0x38] sm:$0xff] }
   0x4   :  { %1091 = vmatprep.subr.bf16.mxu0 %v1090_v3  ;;  %1008 = vmatprep.mubr.f32.mxu0 %v50_v9  ;;  %v1102_v12 = vpack.c.bf16 %v59_v11, %v58_v10  ;;  %v60_v13 = vld [vmem:[%s1476_s1 + $0x40] sm:$0xff]  ;;  %v61_v14 = vld [vmem:[%s1476_s1 + $0x48] sm:$0xff]  ;;  %v62_v16 = vld [vmem:[%s1476_s1 + $0x50] sm:$0xff] }
   0x5   :  { %1093 = vmatpush3.bf16.msra.mxu0 %v1090_v3  ;;  %v1106_v15 = vpack.c.bf16 %v61_v14, %v60_v13  ;;  %v63_v17 = vld [vmem:[%s1476_s1 + $0x58] sm:$0xff]  ;;  %v64_v19 = vld [vmem:[%s1476_s1 + $0x60] sm:$0xff]  ;;  %v65_v20 = vld [vmem:[%s1476_s1 + $0x68] sm:$0xff] }
   0x6   :  { %1095 = vmatprep.subr.bf16.mxu0 %v1094_v5  ;;  %v1110_v18 = vpack.c.bf16 %v63_v17, %v62_v16  ;;  %v1114_v21 = vpack.c.bf16 %v65_v20, %v64_v19  ;;  %v66_v22 = vld [vmem:[%s1476_s1 + $0x70] sm:$0xff]  ;;  %v67_v23 = vld [vmem:[%s1476_s1 + $0x78] sm:$0xff]  ;;  %v51_v25 = vld [vmem:[%s1477_s0 + $0x8] sm:$0xff] }
   0x7   :  { %v1118_v24 = vpack.c.bf16 %v67_v23, %v66_v22  ;;  %v210_v26 = vld [vmem:[%s1478_s3] sm:$0xff]  ;;  %v211_v27 = vld [vmem:[%s1478_s3 + $0x8] sm:$0xff]  ;;  %v212_v29 = vld [vmem:[%s1478_s3 + $0x10] sm:$0xff] }
   0x8   :  { %v1122_v28 = vpack.c.bf16 %v211_v27, %v210_v26  ;;  %v213_v30 = vld [vmem:[%s1478_s3 + $0x18] sm:$0xff]  ;;  %v214_v32 = vld [vmem:[%s1478_s3 + $0x20] sm:$0xff]  ;;  %v215_v33 = vld [vmem:[%s1478_s3 + $0x28] sm:$0xff] }
   0x9   :  { %1097 = vmatpush3.bf16.msra.mxu0 %v1094_v5  ;;  %v1126_v31 = vpack.c.bf16 %v213_v30, %v212_v29  ;;  %v1130_v34 = vpack.c.bf16 %v215_v33, %v214_v32  ;;  %v216_v35 = vld [vmem:[%s1478_s3 + $0x30] sm:$0xff]  ;;  %v217_v36 = vld [vmem:[%s1478_s3 + $0x38] sm:$0xff]  ;;  %v890_v38 = vld [vmem:[%s1479_s2] ss:$0 sm:$0xff] }
   0xa   :  { %1099 = vmatprep.subr.bf16.mxu0 %v1098_v8  ;;  %1123 = vmatprep.subr.bf16.mxu1 %v1122_v28  ;;  %v1134_v37 = vpack.c.bf16 %v217_v36, %v216_v35 }
   0xb   :  { %1125 = vmatpush3.bf16.msra.mxu1 %v1122_v28 }
   0xc   :  { %1127 = vmatprep.subr.bf16.mxu1 %v1126_v31 }
   0xd   :  { %1101 = vmatpush3.bf16.msra.mxu0 %v1098_v8 }
   0xe   :  { %1103 = vmatprep.subr.bf16.mxu0 %v1102_v12 }
   0xf   :  { %1129 = vmatpush3.bf16.msra.mxu1 %v1126_v31 }
  0x10   :  { %1131 = vmatprep.subr.bf16.mxu1 %v1130_v34 }
  0x11   :  { %1105 = vmatpush3.bf16.msra.mxu0 %v1102_v12 }
  0x12   :  { %1107 = vmatprep.subr.bf16.mxu0 %v1106_v15 }
  0x13   :  { %1133 = vmatpush3.bf16.msra.mxu1 %v1130_v34 }
  0x14   :  { %1135 = vmatprep.subr.bf16.mxu1 %v1134_v37 }
  0x15   :  { %1109 = vmatpush3.bf16.msra.mxu0 %v1106_v15 }
  0x16   :  { %1111 = vmatprep.subr.bf16.mxu0 %v1110_v18 }
  0x17   :  { %1137 = vmatpush3.bf16.msra.mxu1 %v1134_v37  ;;  %v367_v37 = vld [vmem:[%s1480_s5] sm:$0xff] }
  0x19   :  { %1113 = vmatpush3.bf16.msra.mxu0 %v1110_v18 }
  0x1a   :  { %1115 = vmatprep.subr.bf16.mxu0 %v1114_v21 }
  0x1d   :  { %1117 = vmatpush3.bf16.msra.mxu0 %v1114_v21 }
  0x1e   :  { %1119 = vmatprep.subr.bf16.mxu0 %v1118_v24 }
  0x21   :  { %1121 = vmatpush3.bf16.msra.mxu0 %v1118_v24 }
  0x24   :  { %1009 = vmatmul.mubr.f32.vlgmr.msra.gmra.mrb[0].mxu0 %v51_v25 }
  0xf7   :  { %v1010_v39 = vpop.f32.mrb[0].mxu0 }
  0xf8   :  { %v147_v40 = vadd.f32 %v1010_v39, %v890_v38  ;;  %v141_v41 = vpop.f32.mrb[1].mxu0 }
  0xf9   :  { %v142_v42 = vadd.f32 %v890_v38, %v141_v41  ;;  %v368_v38 = vld [vmem:[%s1480_s5 + $0x8] sm:$0xff]  ;;  %v370_v41 = vld [vmem:[%s1480_s5 + $0x18] sm:$0xff] }
  0xfa   :  { %v153_v43 = vmul.f32 0.70710677, %v147_v40  ;;  %v151_v34 = vmul.f32 0.5, %v147_v40  ;;  %v1138_v39 = vpack.c.bf16 %v368_v38, %v367_v37  ;;  %v369_v40 = vld [vmem:[%s1480_s5 + $0x10] sm:$0xff] }
  0xfb   :  { %v152_v44 = vmul.f32 0.70710677, %v142_v42  ;;  %v150_v32 = vmul.f32 0.5, %v142_v42  ;;  %v1142_v42 = vpack.c.bf16 %v370_v41, %v369_v40 }
  0xfc   :  { %v892_v45 = vclamps-f32 %v153_v43, 4.0  ;;  %1139 = vmatprep.subr.bf16.mxu1 %v1138_v39  ;;  %v371_v43 = vld [vmem:[%s1480_s5 + $0x20] sm:$0xff] }
  0xfd   :  { %v891_v46 = vclamps-f32 %v152_v44, 4.0  ;;  %v372_v44 = vld [vmem:[%s1480_s5 + $0x28] sm:$0xff] }
  0xfe   :  { %v159_v47 = vmul.f32 %v892_v45, %v892_v45 }
  0xff   :  { %v158_v48 = vmul.f32 %v891_v46, %v891_v46 }
 0x100   :  { %v177_v49 = vmul.f32 -1.1791603e-07, %v159_v47  ;;  %v161_v50 = vmul.f32 0.00022905065, %v159_v47 }
 0x101   :  { %v176_v51 = vmul.f32 -1.1791603e-07, %v158_v48  ;;  %v160_v53 = vmul.f32 0.00022905065, %v158_v48 }
 0x102   :  { %v179_v52 = vadd.f32 2.3547966e-05, %v177_v49  ;;  %v163_v56 = vadd.f32 0.003408291, %v161_v50  ;;  %v463_v49 = vld [vmem:[%s1481_s7] sm:$0xff]  ;;  %v464_v50 = vld [vmem:[%s1481_s7 + $0x8] sm:$0xff] }
 0x103   :  { %v178_v54 = vadd.f32 2.3547966e-05, %v176_v51  ;;  %v162_v59 = vadd.f32 0.003408291, %v160_v53  ;;  %v465_v51 = vld [vmem:[%s1481_s7 + $0x10] sm:$0xff]  ;;  %v466_v53 = vld [vmem:[%s1481_s7 + $0x18] sm:$0xff] }
 0x104   :  { %v181_v55 = vmul.f32 %v179_v52, %v159_v47  ;;  %v165_v62 = vmul.f32 %v163_v56, %v159_v47  ;;  %v1154_v52 = vpack.c.bf16 %v464_v50, %v463_v49  ;;  %v468_v56 = vld [vmem:[%s1481_s7 + $0x28] sm:$0xff] }
 0x105   :  { %v180_v57 = vmul.f32 %v178_v54, %v158_v48  ;;  %v164_v1 = vmul.f32 %v162_v59, %v158_v48  ;;  %v1158_v54 = vpack.c.bf16 %v466_v53, %v465_v51 }
 0x106   :  { %v183_v58 = vadd.f32 0.0010179626, %v181_v55  ;;  %v167_v4 = vadd.f32 0.050955694, %v165_v62  ;;  %v467_v55 = vld [vmem:[%s1481_s7 + $0x20] sm:$0xff]  ;;  %1155 = vmatprep.subr.bf16.mxu0 %v1154_v52 }
 0x107   :  { %v182_v60 = vadd.f32 0.0010179626, %v180_v57  ;;  %v166_v7 = vadd.f32 0.050955694, %v164_v1  ;;  %1157 = vmatpush3.bf16.msra.mxu0 %v1154_v52  ;;  %v1162_v57 = vpack.c.bf16 %v468_v56, %v467_v55 }
 0x108   :  { %v185_v61 = vmul.f32 %v183_v58, %v159_v47  ;;  %v169_v10 = vmul.f32 %v167_v4, %v159_v47  ;;  %1159 = vmatprep.subr.bf16.mxu0 %v1158_v54  ;;  %v893_v58 = vld [vmem:[%s1482_s4] ss:$0 sm:$0xff] }
 0x109   :  { %v184_v63 = vmul.f32 %v182_v60, %v158_v48  ;;  %v168_v13 = vmul.f32 %v166_v7, %v158_v48 }
 0x10a   :  { %v187_v0 = vadd.f32 0.01407047, %v185_v61  ;;  %v171_v16 = vadd.f32 0.18520832, %v169_v10 }
 0x10b   :  { %v186_v2 = vadd.f32 0.01407047, %v184_v63  ;;  %v170_v19 = vadd.f32 0.18520832, %v168_v13  ;;  %1161 = vmatpush3.bf16.msra.mxu0 %v1158_v54 }
 0x10c   :  { %v189_v3 = vmul.f32 %v187_v0, %v159_v47  ;;  %v173_v21 = vmul.f32 %v171_v16, %v159_v47  ;;  %1163 = vmatprep.subr.bf16.mxu0 %v1162_v57 }
 0x10d   :  { %v188_v5 = vmul.f32 %v186_v2, %v158_v48  ;;  %v172_v22 = vmul.f32 %v170_v19, %v158_v48 }
 0x10e   :  { %v191_v6 = vadd.f32 0.11098505, %v189_v3  ;;  %v175_v23 = vadd.f32 1.1283791, %v173_v21 }
 0x10f   :  { %v190_v8 = vadd.f32 0.11098505, %v188_v5  ;;  %v174_v24 = vadd.f32 1.1283791, %v172_v22  ;;  %1165 = vmatpush3.bf16.msra.mxu0 %v1162_v57  ;;  %v469_v57 = vld [vmem:[%s1481_s7 + $0x30] sm:$0xff] }
 0x110   :  { %v193_v9 = vmul.f32 %v191_v6, %v159_v47  ;;  %v201_v25 = vmul.f32 %v892_v45, %v175_v23  ;;  %v1146_v45 = vpack.c.bf16 %v372_v44, %v371_v43 }
 0x111   :  { %v192_v11 = vmul.f32 %v190_v8, %v158_v48  ;;  %v200_v27 = vmul.f32 %v891_v46, %v174_v24  ;;  %v373_v46 = vld [vmem:[%s1480_s5 + $0x30] sm:$0xff] }
 0x112   :  { %v195_v12 = vadd.f32 0.49746925, %v193_v9 }
 0x113   :  { %v194_v14 = vadd.f32 0.49746925, %v192_v11 }
 0x114   :  { %v197_v15 = vmul.f32 %v195_v12, %v159_v47  ;;  %v374_v47 = vld [vmem:[%s1480_s5 + $0x38] sm:$0xff] }
 0x115   :  { %v196_v17 = vmul.f32 %v194_v14, %v158_v48  ;;  %v1150_v48 = vpack.c.bf16 %v374_v47, %v373_v46 }
 0x116   :  { %v199_v18 = vadd.f32 1.0, %v197_v15 }
 0x117   :  { %v198_v20 = vadd.f32 1.0, %v196_v17 }
 0x118   :  { %1186 = vrcp.f32 %v199_v18 }
 0x119   :  { %1188 = vrcp.f32 %v198_v20 }
 0x122   :  { %v1187_v26 = vpop.eup %1186 }
 0x123   :  { %v1189_v28 = vpop.eup %1188  ;;  %v205_v29 = vmul.f32 %v1187_v26, %v201_v25 }
 0x124   :  { %v204_v30 = vmul.f32 %v1189_v28, %v200_v27 }
 0x125   :  { %v207_v31 = vadd.f32 1.0, %v205_v29 }
 0x126   :  { %v206_v33 = vadd.f32 1.0, %v204_v30 }
 0x127   :  { %v209_v36 = vmul.f32 %v207_v31, %v151_v34 }
 0x128   :  { %v208_v35 = vmul.f32 %v206_v33, %v150_v32 }
 0x12a   :  { %1027 = vmatprep.mubr.msk.f32.mxu1 %vm225_vm0, %v208_v35 }
 0x12b   :  { %1028 = vmatmul.mubr.msk.f32.vlgmr.msra.gmra.mrb[0].mxu1 %vm225_vm0, %v209_v36 }
 0x12c   :  { %1141 = vmatpush3.bf16.msra.mxu1 %v1138_v39 }
 0x12d   :  { %1143 = vmatprep.subr.bf16.mxu1 %v1142_v42 }
 0x130   :  { %1145 = vmatpush3.bf16.msra.mxu1 %v1142_v42 }
 0x131   :  { %1147 = vmatprep.subr.bf16.mxu1 %v1146_v45 }
 0x134   :  { %1149 = vmatpush3.bf16.msra.mxu1 %v1146_v45 }
 0x135   :  { %1151 = vmatprep.subr.bf16.mxu1 %v1150_v48 }
 0x138   :  { %1153 = vmatpush3.bf16.msra.mxu1 %v1150_v48 }
 0x1fe   :  { %v1029_v59 = vpop.f32.mrb[0].mxu1 }
 0x1ff   :  { %v304_v60 = vadd.f32 %v1029_v59, %v893_v58  ;;  %v298_v61 = vpop.f32.mrb[1].mxu1 }
 0x200   :  { %v299_v62 = vadd.f32 %v893_v58, %v298_v61  ;;  %v470_v58 = vld [vmem:[%s1481_s7 + $0x38] sm:$0xff] }
 0x201   :  { %v310_v63 = vmul.f32 0.70710677, %v304_v60  ;;  %v308_v54 = vmul.f32 0.5, %v304_v60  ;;  %v1166_v59 = vpack.c.bf16 %v470_v58, %v469_v57  ;;  %v898_v60 = vld [vmem:[%s1483_s6] ss:$0 sm:$0xff] }
 0x202   :  { %v309_v0 = vmul.f32 0.70710677, %v299_v62  ;;  %v307_v52 = vmul.f32 0.5, %v299_v62 }
 0x203   :  { %v897_v1 = vclamps-f32 %v310_v63, 4.0  ;;  %1167 = vmatprep.subr.bf16.mxu0 %v1166_v59 }
 0x204   :  { %v896_v2 = vclamps-f32 %v309_v0, 4.0  ;;  %1169 = vmatpush3.bf16.msra.mxu0 %v1166_v59 }
 0x205   :  { %v316_v3 = vmul.f32 %v897_v1, %v897_v1 }
 0x206   :  { %v315_v4 = vmul.f32 %v896_v2, %v896_v2 }
 0x207   :  { %v334_v5 = vmul.f32 -1.1791603e-07, %v316_v3  ;;  %v318_v6 = vmul.f32 0.00022905065, %v316_v3 }
 0x208   :  { %v333_v7 = vmul.f32 -1.1791603e-07, %v315_v4  ;;  %v317_v9 = vmul.f32 0.00022905065, %v315_v4 }
 0x209   :  { %v336_v8 = vadd.f32 2.3547966e-05, %v334_v5  ;;  %v320_v12 = vadd.f32 0.003408291, %v318_v6  ;;  %v622_v5 = vld [vmem:[%s1484_s9 + $0x18] sm:$0xff] }
 0x20a   :  { %v335_v10 = vadd.f32 2.3547966e-05, %v333_v7  ;;  %v319_v15 = vadd.f32 0.003408291, %v317_v9  ;;  %v901_v7 = vld [vmem:[%s1485_s8] ss:$0 sm:$0xff] }
 0x20b   :  { %v338_v11 = vmul.f32 %v336_v8, %v316_v3  ;;  %v322_v18 = vmul.f32 %v320_v12, %v316_v3 }
 0x20c   :  { %v337_v13 = vmul.f32 %v335_v10, %v315_v4  ;;  %v321_v21 = vmul.f32 %v319_v15, %v315_v4 }
 0x20d   :  { %v340_v14 = vadd.f32 0.0010179626, %v338_v11  ;;  %v324_v24 = vadd.f32 0.050955694, %v322_v18 }
 0x20e   :  { %v339_v16 = vadd.f32 0.0010179626, %v337_v13  ;;  %v323_v27 = vadd.f32 0.050955694, %v321_v21 }
 0x20f   :  { %v342_v17 = vmul.f32 %v340_v14, %v316_v3  ;;  %v326_v30 = vmul.f32 %v324_v24, %v316_v3 }
 0x210   :  { %v341_v19 = vmul.f32 %v339_v16, %v315_v4  ;;  %v325_v33 = vmul.f32 %v323_v27, %v315_v4 }
 0x211   :  { %v344_v20 = vadd.f32 0.01407047, %v342_v17  ;;  %v328_v36 = vadd.f32 0.18520832, %v326_v30 }
 0x212   :  { %v343_v22 = vadd.f32 0.01407047, %v341_v19  ;;  %v327_v39 = vadd.f32 0.18520832, %v325_v33 }
 0x213   :  { %v346_v23 = vmul.f32 %v344_v20, %v316_v3  ;;  %v330_v41 = vmul.f32 %v328_v36, %v316_v3 }
 0x214   :  { %v345_v25 = vmul.f32 %v343_v22, %v315_v4  ;;  %v329_v42 = vmul.f32 %v327_v39, %v315_v4 }
 0x215   :  { %v348_v26 = vadd.f32 0.11098505, %v346_v23  ;;  %v332_v43 = vadd.f32 1.1283791, %v330_v41 }
 0x216   :  { %v347_v28 = vadd.f32 0.11098505, %v345_v25  ;;  %v331_v44 = vadd.f32 1.1283791, %v329_v42 }
 0x217   :  { %v350_v29 = vmul.f32 %v348_v26, %v316_v3  ;;  %v358_v45 = vmul.f32 %v897_v1, %v332_v43  ;;  %v619_v1 = vld [vmem:[%s1484_s9] sm:$0xff] }
 0x218   :  { %v349_v31 = vmul.f32 %v347_v28, %v315_v4  ;;  %v357_v47 = vmul.f32 %v896_v2, %v331_v44  ;;  %v620_v2 = vld [vmem:[%s1484_s9 + $0x8] sm:$0xff] }
 0x219   :  { %v352_v32 = vadd.f32 0.49746925, %v350_v29 }
 0x21a   :  { %v351_v34 = vadd.f32 0.49746925, %v349_v31 }
 0x21b   :  { %v354_v35 = vmul.f32 %v352_v32, %v316_v3  ;;  %v1170_v3 = vpack.c.bf16 %v620_v2, %v619_v1 }
 0x21c   :  { %v353_v37 = vmul.f32 %v351_v34, %v315_v4  ;;  %v621_v4 = vld [vmem:[%s1484_s9 + $0x10] sm:$0xff] }
 0x21d   :  { %v356_v38 = vadd.f32 1.0, %v354_v35  ;;  %1171 = vmatprep.subr.bf16.mxu1 %v1170_v3  ;;  %v1174_v6 = vpack.c.bf16 %v622_v5, %v621_v4 }
 0x21e   :  { %v355_v40 = vadd.f32 1.0, %v353_v37 }
 0x21f   :  { %1190 = vrcp.f32 %v356_v38 }
 0x220   :  { %1192 = vrcp.f32 %v355_v40 }
 0x229   :  { %v1191_v46 = vpop.eup %1190 }
 0x22a   :  { %v1193_v48 = vpop.eup %1192  ;;  %v362_v49 = vmul.f32 %v1191_v46, %v358_v45 }
 0x22b   :  { %v361_v50 = vmul.f32 %v1193_v48, %v357_v47 }
 0x22c   :  { %v364_v51 = vadd.f32 1.0, %v362_v49 }
 0x22d   :  { %v363_v53 = vadd.f32 1.0, %v361_v50 }
 0x22e   :  { %v366_v56 = vmul.f32 %v364_v51, %v308_v54 }
 0x22f   :  { %v365_v55 = vmul.f32 %v363_v53, %v307_v52 }
 0x231   :  { %1046 = vmatprep.mubr.msk.f32.mxu1 %vm225_vm0, %v365_v55 }
 0x232   :  { %1047 = vmatmul.mubr.msk.f32.vlgmr.msra.gmra.mrb[2].mxu1 %vm225_vm0, %v366_v56 }
 0x233   :  { %1173 = vmatpush3.bf16.msra.mxu1 %v1170_v3 }
 0x234   :  { %1175 = vmatprep.subr.bf16.mxu1 %v1174_v6 }
 0x237   :  { %1177 = vmatpush3.bf16.msra.mxu1 %v1174_v6  ;;  %v772_v6 = vld [vmem:[%s1486_s11] sm:$0xff] }
 0x305   :  { %v1048_v61 = vpop.f32.mrb[2].mxu1 }
 0x306   :  { %v454_v62 = vpop.f32.mrb[3].mxu1  ;;  %v460_v0 = vadd.f32 %v1048_v61, %v898_v60 }
 0x307   :  { %v455_v63 = vadd.f32 %v898_v60, %v454_v62 }
 0x309   :  { %1065 = vmatprep.mubr.msk.f32.mxu0 %vm225_vm0, %v455_v63 }
 0x30a   :  { %1066 = vmatmul.mubr.msk.f32.vlgmr.msra.gmra.mrb[2].mxu0 %vm225_vm0, %v460_v0 }
 0x3dd   :  { %v1067_v8 = vpop.f32.mrb[2].mxu0 }
 0x3de   :  { %v556_v9 = vadd.f32 %v1067_v8, %v901_v7  ;;  %v550_v10 = vpop.f32.mrb[3].mxu0 }
 0x3df   :  { %v551_v11 = vadd.f32 %v901_v7, %v550_v10  ;;  %v773_v7 = vld [vmem:[%s1486_s11 + $0x8] sm:$0xff]  ;;  %v775_v10 = vld [vmem:[%s1486_s11 + $0x18] sm:$0xff] }
 0x3e0   :  { %v562_v12 = vmul.f32 0.70710677, %v556_v9  ;;  %v560_v3 = vmul.f32 0.5, %v556_v9  ;;  %v1178_v8 = vpack.c.bf16 %v773_v7, %v772_v6  ;;  %v774_v9 = vld [vmem:[%s1486_s11 + $0x10] sm:$0xff] }
 0x3e1   :  { %v561_v13 = vmul.f32 0.70710677, %v551_v11  ;;  %v559_v1 = vmul.f32 0.5, %v551_v11  ;;  %v1182_v11 = vpack.c.bf16 %v775_v10, %v774_v9 }
 0x3e2   :  { %v905_v14 = vclamps-f32 %v562_v12, 4.0  ;;  %1179 = vmatprep.subr.bf16.mxu1 %v1178_v8  ;;  %v906_v12 = vld [vmem:[%s1487_s10] ss:$0 sm:$0xff] }
 0x3e3   :  { %v904_v15 = vclamps-f32 %v561_v13, 4.0 }
 0x3e4   :  { %v568_v16 = vmul.f32 %v905_v14, %v905_v14 }
 0x3e5   :  { %v567_v17 = vmul.f32 %v904_v15, %v904_v15 }
 0x3e6   :  { %v586_v18 = vmul.f32 -1.1791603e-07, %v568_v16  ;;  %v570_v19 = vmul.f32 0.00022905065, %v568_v16 }
 0x3e7   :  { %v585_v20 = vmul.f32 -1.1791603e-07, %v567_v17  ;;  %v569_v22 = vmul.f32 0.00022905065, %v567_v17 }
 0x3e8   :  { %v588_v21 = vadd.f32 2.3547966e-05, %v586_v18  ;;  %v572_v25 = vadd.f32 0.003408291, %v570_v19 }
 0x3e9   :  { %v587_v23 = vadd.f32 2.3547966e-05, %v585_v20  ;;  %v571_v28 = vadd.f32 0.003408291, %v569_v22 }
 0x3ea   :  { %v590_v24 = vmul.f32 %v588_v21, %v568_v16  ;;  %v574_v31 = vmul.f32 %v572_v25, %v568_v16 }
 0x3eb   :  { %v589_v26 = vmul.f32 %v587_v23, %v567_v17  ;;  %v573_v34 = vmul.f32 %v571_v28, %v567_v17 }
 0x3ec   :  { %v592_v27 = vadd.f32 0.0010179626, %v590_v24  ;;  %v576_v37 = vadd.f32 0.050955694, %v574_v31 }
 0x3ed   :  { %v591_v29 = vadd.f32 0.0010179626, %v589_v26  ;;  %v575_v40 = vadd.f32 0.050955694, %v573_v34 }
 0x3ee   :  { %v594_v30 = vmul.f32 %v592_v27, %v568_v16  ;;  %v578_v43 = vmul.f32 %v576_v37, %v568_v16 }
 0x3ef   :  { %v593_v32 = vmul.f32 %v591_v29, %v567_v17  ;;  %v577_v46 = vmul.f32 %v575_v40, %v567_v17 }
 0x3f0   :  { %v596_v33 = vadd.f32 0.01407047, %v594_v30  ;;  %v580_v49 = vadd.f32 0.18520832, %v578_v43 }
 0x3f1   :  { %v595_v35 = vadd.f32 0.01407047, %v593_v32  ;;  %v579_v52 = vadd.f32 0.18520832, %v577_v46 }
 0x3f2   :  { %v598_v36 = vmul.f32 %v596_v33, %v568_v16  ;;  %v582_v54 = vmul.f32 %v580_v49, %v568_v16 }
 0x3f3   :  { %v597_v38 = vmul.f32 %v595_v35, %v567_v17  ;;  %v581_v55 = vmul.f32 %v579_v52, %v567_v17 }
 0x3f4   :  { %v600_v39 = vadd.f32 0.11098505, %v598_v36  ;;  %v584_v56 = vadd.f32 1.1283791, %v582_v54 }
 0x3f5   :  { %v599_v41 = vadd.f32 0.11098505, %v597_v38  ;;  %v583_v57 = vadd.f32 1.1283791, %v581_v55 }
 0x3f6   :  { %v602_v42 = vmul.f32 %v600_v39, %v568_v16  ;;  %v610_v58 = vmul.f32 %v905_v14, %v584_v56 }
 0x3f7   :  { %v601_v44 = vmul.f32 %v599_v41, %v567_v17  ;;  %v609_v60 = vmul.f32 %v904_v15, %v583_v57 }
 0x3f8   :  { %v604_v45 = vadd.f32 0.49746925, %v602_v42 }
 0x3f9   :  { %v603_v47 = vadd.f32 0.49746925, %v601_v44 }
 0x3fa   :  { %v606_v48 = vmul.f32 %v604_v45, %v568_v16 }
 0x3fb   :  { %v605_v50 = vmul.f32 %v603_v47, %v567_v17 }
 0x3fc   :  { %v608_v51 = vadd.f32 1.0, %v606_v48 }
 0x3fd   :  { %v607_v53 = vadd.f32 1.0, %v605_v50 }
 0x3fe   :  { %1194 = vrcp.f32 %v608_v51 }
 0x3ff   :  { %1196 = vrcp.f32 %v607_v53 }
 0x408   :  { %v1195_v59 = vpop.eup %1194 }
 0x409   :  { %v1197_v61 = vpop.eup %1196  ;;  %v614_v62 = vmul.f32 %v1195_v59, %v610_v58 }
 0x40a   :  { %v613_v63 = vmul.f32 %v1197_v61, %v609_v60 }
 0x40b   :  { %v616_v0 = vadd.f32 1.0, %v614_v62 }
 0x40c   :  { %v615_v2 = vadd.f32 1.0, %v613_v63 }
 0x40d   :  { %v618_v5 = vmul.f32 %v616_v0, %v560_v3 }
 0x40e   :  { %v617_v4 = vmul.f32 %v615_v2, %v559_v1 }
 0x410   :  { %1076 = vmatprep.mubr.msk.f32.mxu1 %vm630_vm1, %v617_v4 }
 0x411   :  { %1077 = vmatmul.mubr.msk.f32.vlgmr.msra.gmra.mrb[4].mxu1 %vm630_vm1, %v618_v5 }
 0x412   :  { %1181 = vmatpush3.bf16.msra.mxu1 %v1178_v8 }
 0x413   :  { %1183 = vmatprep.subr.bf16.mxu1 %v1182_v11 }
 0x416   :  { %1185 = vmatpush3.bf16.msra.mxu1 %v1182_v11  ;;  %v911_v11 = vld [vmem:[%s1488_s12] ss:$0 sm:$0xff] }
 0x4e4   :  { %v1078_v13 = vpop.f32.mrb[4].mxu1 }
 0x4e5   :  { %v709_v14 = vadd.f32 %v1078_v13, %v906_v12  ;;  %v703_v15 = vpop.f32.mrb[5].mxu1 }
 0x4e6   :  { %v704_v16 = vadd.f32 %v906_v12, %v703_v15 }
 0x4e7   :  { %v715_v17 = vmul.f32 0.70710677, %v709_v14  ;;  %v713_v8 = vmul.f32 0.5, %v709_v14  ;;  %v914_v14 = vld [vmem:[%s1489_s13] ss:$0 sm:$0xff] }
 0x4e8   :  { %v714_v18 = vmul.f32 0.70710677, %v704_v16  ;;  %v712_v6 = vmul.f32 0.5, %v704_v16 }
 0x4e9   :  { %v910_v19 = vclamps-f32 %v715_v17, 4.0 }
 0x4ea   :  { %v909_v20 = vclamps-f32 %v714_v18, 4.0  ;;  %v915_v18 = vld [vmem:[%s1490_s14] ss:$0 sm:$0xff] }
 0x4eb   :  { %v721_v21 = vmul.f32 %v910_v19, %v910_v19 }
 0x4ec   :  { %v720_v22 = vmul.f32 %v909_v20, %v909_v20 }
 0x4ed   :  { %v739_v23 = vmul.f32 -1.1791603e-07, %v721_v21  ;;  %v723_v24 = vmul.f32 0.00022905065, %v721_v21 }
 0x4ee   :  { %v738_v25 = vmul.f32 -1.1791603e-07, %v720_v22  ;;  %v722_v27 = vmul.f32 0.00022905065, %v720_v22 }
 0x4ef   :  { %v741_v26 = vadd.f32 2.3547966e-05, %v739_v23  ;;  %v725_v30 = vadd.f32 0.003408291, %v723_v24 }
 0x4f0   :  { %v740_v28 = vadd.f32 2.3547966e-05, %v738_v25  ;;  %v724_v33 = vadd.f32 0.003408291, %v722_v27 }
 0x4f1   :  { %v743_v29 = vmul.f32 %v741_v26, %v721_v21  ;;  %v727_v36 = vmul.f32 %v725_v30, %v721_v21 }
 0x4f2   :  { %v742_v31 = vmul.f32 %v740_v28, %v720_v22  ;;  %v726_v39 = vmul.f32 %v724_v33, %v720_v22 }
 0x4f3   :  { %v745_v32 = vadd.f32 0.0010179626, %v743_v29  ;;  %v729_v42 = vadd.f32 0.050955694, %v727_v36 }
 0x4f4   :  { %v744_v34 = vadd.f32 0.0010179626, %v742_v31  ;;  %v728_v45 = vadd.f32 0.050955694, %v726_v39 }
 0x4f5   :  { %v747_v35 = vmul.f32 %v745_v32, %v721_v21  ;;  %v731_v48 = vmul.f32 %v729_v42, %v721_v21 }
 0x4f6   :  { %v746_v37 = vmul.f32 %v744_v34, %v720_v22  ;;  %v730_v51 = vmul.f32 %v728_v45, %v720_v22 }
 0x4f7   :  { %v749_v38 = vadd.f32 0.01407047, %v747_v35  ;;  %v733_v54 = vadd.f32 0.18520832, %v731_v48 }
 0x4f8   :  { %v748_v40 = vadd.f32 0.01407047, %v746_v37  ;;  %v732_v57 = vadd.f32 0.18520832, %v730_v51 }
 0x4f9   :  { %v751_v41 = vmul.f32 %v749_v38, %v721_v21  ;;  %v735_v59 = vmul.f32 %v733_v54, %v721_v21 }
 0x4fa   :  { %v750_v43 = vmul.f32 %v748_v40, %v720_v22  ;;  %v734_v60 = vmul.f32 %v732_v57, %v720_v22 }
 0x4fb   :  { %v753_v44 = vadd.f32 0.11098505, %v751_v41  ;;  %v737_v61 = vadd.f32 1.1283791, %v735_v59 }
 0x4fc   :  { %v752_v46 = vadd.f32 0.11098505, %v750_v43  ;;  %v736_v62 = vadd.f32 1.1283791, %v734_v60 }
 0x4fd   :  { %v755_v47 = vmul.f32 %v753_v44, %v721_v21  ;;  %v763_v63 = vmul.f32 %v910_v19, %v737_v61 }
 0x4fe   :  { %v754_v49 = vmul.f32 %v752_v46, %v720_v22  ;;  %v762_v1 = vmul.f32 %v909_v20, %v736_v62 }
 0x4ff   :  { %v757_v50 = vadd.f32 0.49746925, %v755_v47 }
 0x500   :  { %v756_v52 = vadd.f32 0.49746925, %v754_v49 }
 0x501   :  { %v759_v53 = vmul.f32 %v757_v50, %v721_v21 }
 0x502   :  { %v758_v55 = vmul.f32 %v756_v52, %v720_v22 }
 0x503   :  { %v761_v56 = vadd.f32 1.0, %v759_v53 }
 0x504   :  { %v760_v58 = vadd.f32 1.0, %v758_v55 }
 0x505   :  { %1198 = vrcp.f32 %v761_v56 }
 0x506   :  { %1200 = vrcp.f32 %v760_v58 }
 0x50f   :  { %v1199_v0 = vpop.eup %1198 }
 0x510   :  { %v1201_v2 = vpop.eup %1200  ;;  %v767_v3 = vmul.f32 %v1199_v0, %v763_v63 }
 0x511   :  { %v766_v4 = vmul.f32 %v1201_v2, %v762_v1 }
 0x512   :  { %v769_v5 = vadd.f32 1.0, %v767_v3 }
 0x513   :  { %v768_v7 = vadd.f32 1.0, %v766_v4 }
 0x514   :  { %v771_v10 = vmul.f32 %v769_v5, %v713_v8 }
 0x515   :  { %v770_v9 = vmul.f32 %v768_v7, %v712_v6 }
 0x517   :  { %1087 = vmatprep.mubr.msk.f32.mxu1 %vm630_vm1, %v770_v9 }
 0x518   :  { %1088 = vmatmul.mubr.msk.f32.vlgmr.msra.gmra.mrb[6].mxu1 %vm630_vm1, %v771_v10 }
 0x5eb   :  { %v1089_v12 = vpop.f32.mrb[6].mxu1 }
 0x5ec   :  { %v861_v13 = vadd.f32 %v1089_v12, %v911_v11  ;;  %v855_v15 = vpop.f32.mrb[7].mxu1 }
 0x5ed   :  { %v856_v17 = vadd.f32 %v911_v11, %v855_v15 }
 0x5ee   :  { %1202 = vtanh.f32 %v861_v13 }
 0x5ef   :  { %1204 = vtanh.f32 %v856_v17 }
 0x5f8   :  { %v1203_v16 = vpop.eup %1202 }
 0x5f9   :  { %v1205_v19 = vpop.eup %1204  ;;  %v874_v20 = vmul.f32 %v1203_v16, %v914_v14 }
 0x5fa   :  { %v873_v21 = vmul.f32 %v1205_v19, %v914_v14 }
 0x5fb   :  { %v883_v22 = vadd.f32 %v915_v18, %v874_v20 }
 0x5fc   :  { %v882_v23 = vadd.f32 %v915_v18, %v873_v21 }
 0x5fd   :  { %885 = vst [vmem:[%s1491_s15 + $0x8] sm:$0xff] %v883_v22 }
 0x5fe   :  { %884 = vst [vmem:[%s1491_s15] sm:$0xff] %v882_v23 }

// kernel: forward.9
= control target key start
LH: loop header
LB: loop body
LE: loop exit
PB: predicated region body
PF: predicated region fallthrough
CT: control target
= control target key end

     0   :  { %v1056_v0 = vmov 0.0|0.0   ;;  %vm1057_vm0 = vmmov 0   ;;  %v1058_v4 = vmov 0.0   ;;  %vm193_vm1 = vcmask 785408   ;;  %s1396_s1 = inlined_call_operand.vmem [shape: f32[128,96], index: 1, kind: input, shape index: {}]   ;;  %s1397_s0 = inlined_call_operand.vmem [shape: f32[8,128], index: 0, kind: input, shape index: {}]   ;;  %s1398_s3 = inlined_call_operand.vmem [shape: f32[96,96], index: 3, kind: input, shape index: {}]   ;;  %s1399_s2 = inlined_call_operand.vmem [shape: f32[1,96], index: 2, kind: input, shape index: {}]   ;;  %s1400_s5 = inlined_call_operand.vmem [shape: f32[96,96], index: 5, kind: input, shape index: {}]   ;;  %s1401_s7 = inlined_call_operand.vmem [shape: f32[96,32], index: 7, kind: input, shape index: {}]   ;;  %s1402_s4 = inlined_call_operand.vmem [shape: f32[1,96], index: 4, kind: input, shape index: {}]   ;;  %s1403_s6 = inlined_call_operand.vmem [shape: f32[1,96], index: 6, kind: input, shape index: {}]   ;;  %s1404_s9 = inlined_call_operand.vmem [shape: f32[32,32], index: 9, kind: input, shape index: {}]   ;;  %s1405_s8 = inlined_call_operand.vmem [shape: f32[1,32], index: 8, kind: input, shape index: {}]   ;;  %s1406_s11 = inlined_call_operand.vmem [shape: f32[32,128], index: 11, kind: input, shape index: {}]   ;;  %s1407_s10 = inlined_call_operand.vmem [shape: f32[1,32], index: 10, kind: input, shape index: {}]   ;;  %s1408_s12 = inlined_call_operand.vmem [shape: f32[1,128], index: 12, kind: input, shape index: {}]   ;;  %s1409_s13 = inlined_call_operand.vmem [shape: f32[1,128], index: 13, kind: input, shape index: {}]   ;;  %s1410_s14 = inlined_call_operand.vmem [shape: f32[1,128], index: 14, kind: input, shape index: {}]   ;;  %s1411_s15 = inlined_call_operand.vmem [shape: f32[8,128], index: 15, kind: output, shape index: {}]  }
   0x1   :  { %953 = vmatprep.subr.bf16.mxu0 %v1056_v0  ;;  %v51_v1 = vld [vmem:[%s1396_s1] sm:$0xff]  ;;  %v52_v2 = vld [vmem:[%s1396_s1 + $0x8] sm:$0xff]  ;;  %v53_v3 = vld [vmem:[%s1396_s1 + $0x10] sm:$0xff]  ;;  %847 = vmatprep.mubr.msk.f32.mxu0 %vm1057_vm0, %v1058_v4  ;;  %vm522_vm2 = vcmask 261120  }
   0x2   :  { %v954_v5 = vpack.c.bf16 %v52_v2, %v51_v1  ;;  %v54_v6 = vld [vmem:[%s1396_s1 + $0x18] sm:$0xff]  ;;  %977 = vmatprep.subr.bf16.mxu1 %v1056_v0  ;;  %874 = vmatprep.mubr.msk.f32.mxu1 %vm1057_vm0, %v1058_v4  ;;  %v55_v8 = vld [vmem:[%s1396_s1 + $0x20] sm:$0xff]  ;;  %v56_v9 = vld [vmem:[%s1396_s1 + $0x28] sm:$0xff] }
   0x3   :  { %v957_v7 = vpack.c.bf16 %v54_v6, %v53_v3  ;;  %v960_v10 = vpack.c.bf16 %v56_v9, %v55_v8  ;;  %v57_v11 = vld [vmem:[%s1396_s1 + $0x30] sm:$0xff]  ;;  %v58_v12 = vld [vmem:[%s1396_s1 + $0x38] sm:$0xff]  ;;  %v59_v14 = vld [vmem:[%s1396_s1 + $0x40] sm:$0xff] }
   0x4   :  { %955 = vmatpush3.bf16.msra.mxu0 %v954_v5  ;;  %v963_v13 = vpack.c.bf16 %v58_v12, %v57_v11  ;;  %v60_v15 = vld [vmem:[%s1396_s1 + $0x48] sm:$0xff]  ;;  %v61_v17 = vld [vmem:[%s1396_s1 + $0x50] sm:$0xff]  ;;  %v62_v18 = vld [vmem:[%s1396_s1 + $0x58] sm:$0xff] }
   0x5   :  { %956 = vmatprep.subr.bf16.mxu0 %v1056_v0  ;;  %v966_v16 = vpack.c.bf16 %v60_v15, %v59_v14  ;;  %v969_v19 = vpack.c.bf16 %v62_v18, %v61_v17  ;;  %v63_v20 = vld [vmem:[%s1396_s1 + $0x60] sm:$0xff]  ;;  %v64_v21 = vld [vmem:[%s1396_s1 + $0x68] sm:$0xff]  ;;  %v65_v23 = vld [vmem:[%s1396_s1 + $0x70] sm:$0xff] }
   0x6   :  { %v972_v22 = vpack.c.bf16 %v64_v21, %v63_v20  ;;  %v66_v24 = vld [vmem:[%s1396_s1 + $0x78] sm:$0xff]  ;;  %v50_v26 = vld [vmem:[%s1397_s0] sm:$0xff]  ;;  %v175_v28 = vld [vmem:[%s1398_s3 + $0x8] sm:$0xff] }
   0x7   :  { %v975_v25 = vpack.c.bf16 %v66_v24, %v65_v23  ;;  %v174_v27 = vld [vmem:[%s1398_s3] sm:$0xff]  ;;  %v176_v30 = vld [vmem:[%s1398_s3 + $0x10] sm:$0xff]  ;;  %v177_v31 = vld [vmem:[%s1398_s3 + $0x18] sm:$0xff] }
   0x8   :  { %958 = vmatpush3.bf16.msra.mxu0 %v957_v7  ;;  %v978_v29 = vpack.c.bf16 %v175_v28, %v174_v27  ;;  %v981_v32 = vpack.c.bf16 %v177_v31, %v176_v30  ;;  %v178_v33 = vld [vmem:[%s1398_s3 + $0x20] sm:$0xff]  ;;  %v179_v34 = vld [vmem:[%s1398_s3 + $0x28] sm:$0xff]  ;;  %v180_v36 = vld [vmem:[%s1398_s3 + $0x30] sm:$0xff] }
   0x9   :  { %959 = vmatprep.subr.bf16.mxu0 %v1056_v0  ;;  %v984_v35 = vpack.c.bf16 %v179_v34, %v178_v33  ;;  %v181_v37 = vld [vmem:[%s1398_s3 + $0x38] sm:$0xff]  ;;  %v182_v39 = vld [vmem:[%s1398_s3 + $0x40] sm:$0xff]  ;;  %v183_v40 = vld [vmem:[%s1398_s3 + $0x48] sm:$0xff] }
   0xa   :  { %979 = vmatpush3.bf16.msra.mxu1 %v978_v29  ;;  %v987_v38 = vpack.c.bf16 %v181_v37, %v180_v36  ;;  %v990_v41 = vpack.c.bf16 %v183_v40, %v182_v39  ;;  %v184_v42 = vld [vmem:[%s1398_s3 + $0x50] sm:$0xff]  ;;  %v185_v43 = vld [vmem:[%s1398_s3 + $0x58] sm:$0xff]  ;;  %v732_v45 = vld [vmem:[%s1399_s2] ss:$0 sm:$0xff] }
   0xb   :  { %980 = vmatprep.subr.bf16.mxu1 %v1056_v0  ;;  %v993_v44 = vpack.c.bf16 %v185_v43, %v184_v42  ;;  %v298_v17 = vld [vmem:[%s1400_s5 + $0x8] sm:$0xff]  ;;  %v300_v20 = vld [vmem:[%s1400_s5 + $0x18] sm:$0xff]  ;;  %v305_v28 = vld [vmem:[%s1400_s5 + $0x40] sm:$0xff] }
   0xc   :  { %961 = vmatpush3.bf16.msra.mxu0 %v960_v10  ;;  %v302_v23 = vld [vmem:[%s1400_s5 + $0x28] sm:$0xff]  ;;  %v307_v31 = vld [vmem:[%s1400_s5 + $0x50] sm:$0xff]  ;;  %v389_v34 = vld [vmem:[%s1401_s7] sm:$0xff] }
   0xd   :  { %962 = vmatprep.subr.bf16.mxu0 %v1056_v0  ;;  %v306_v29 = vld [vmem:[%s1400_s5 + $0x48] sm:$0xff]  ;;  %v391_v36 = vld [vmem:[%s1401_s7 + $0x10] sm:$0xff]  ;;  %v393_v40 = vld [vmem:[%s1401_s7 + $0x20] sm:$0xff] }
   0xe   :  { %982 = vmatpush3.bf16.msra.mxu1 %v981_v32  ;;  %v1008_v30 = vpack.c.bf16 %v306_v29, %v305_v28  ;;  %v308_v32 = vld [vmem:[%s1400_s5 + $0x58] sm:$0xff]  ;;  %v395_v43 = vld [vmem:[%s1401_s7 + $0x30] sm:$0xff]  ;;  %v512_v28 = vld [vmem:[%s1404_s9 + $0x8] sm:$0xff] }
   0xf   :  { %983 = vmatprep.subr.bf16.mxu1 %v1056_v0  ;;  %v1011_v33 = vpack.c.bf16 %v308_v32, %v307_v31  ;;  %v739_v32 = vld [vmem:[%s1405_s8] ss:$0 sm:$0xff] }
  0x10   :  { %964 = vmatpush3.bf16.msra.mxu0 %v963_v13 }
  0x11   :  { %965 = vmatprep.subr.bf16.mxu0 %v1056_v0 }
  0x12   :  { %985 = vmatpush3.bf16.msra.mxu1 %v984_v35  ;;  %v390_v35 = vld [vmem:[%s1401_s7 + $0x8] sm:$0xff] }
  0x13   :  { %986 = vmatprep.subr.bf16.mxu1 %v1056_v0  ;;  %v1014_v37 = vpack.c.bf16 %v390_v35, %v389_v34 }
  0x14   :  { %967 = vmatpush3.bf16.msra.mxu0 %v966_v16  ;;  %v297_v16 = vld [vmem:[%s1400_s5] sm:$0xff] }
  0x15   :  { %968 = vmatprep.subr.bf16.mxu0 %v1056_v0  ;;  %v996_v18 = vpack.c.bf16 %v298_v17, %v297_v16 }
  0x16   :  { %988 = vmatpush3.bf16.msra.mxu1 %v987_v38  ;;  %v392_v38 = vld [vmem:[%s1401_s7 + $0x18] sm:$0xff] }
  0x17   :  { %989 = vmatprep.subr.bf16.mxu1 %v1056_v0  ;;  %v1017_v39 = vpack.c.bf16 %v392_v38, %v391_v36 }
  0x18   :  { %970 = vmatpush3.bf16.msra.mxu0 %v969_v19  ;;  %v299_v19 = vld [vmem:[%s1400_s5 + $0x10] sm:$0xff] }
  0x19   :  { %971 = vmatprep.subr.bf16.mxu0 %v1056_v0  ;;  %v999_v21 = vpack.c.bf16 %v300_v20, %v299_v19  ;;  %v399_v20 = vld [vmem:[%s1401_s7 + $0x50] sm:$0xff] }
  0x1a   :  { %991 = vmatpush3.bf16.msra.mxu1 %v990_v41  ;;  %v394_v41 = vld [vmem:[%s1401_s7 + $0x28] sm:$0xff] }
  0x1b   :  { %992 = vmatprep.subr.bf16.mxu1 %v1056_v0  ;;  %v1020_v42 = vpack.c.bf16 %v394_v41, %v393_v40 }
  0x1c   :  { %973 = vmatpush3.bf16.msra.mxu0 %v972_v22  ;;  %v301_v22 = vld [vmem:[%s1400_s5 + $0x20] sm:$0xff] }
  0x1d   :  { %974 = vmatprep.subr.bf16.mxu0 %v1056_v0  ;;  %v1002_v24 = vpack.c.bf16 %v302_v23, %v301_v22  ;;  %v737_v23 = vld [vmem:[%s1403_s6] ss:$0 sm:$0xff] }
  0x1e   :  { %994 = vmatpush3.bf16.msra.mxu1 %v993_v44  ;;  %v396_v44 = vld [vmem:[%s1401_s7 + $0x38] sm:$0xff] }
  0x1f   :  { %995 = vmatprep.subr.bf16.mxu1 %v1056_v0 }
  0x20   :  { %976 = vmatpush3.bf16.msra.mxu0 %v975_v25  ;;  %v303_v25 = vld [vmem:[%s1400_s5 + $0x30] sm:$0xff] }
  0x21   :  { %1013 = vmatprep.subr.bf16.mxu0 %v1056_v0 }
  0x23   :  { %848 = vmatmul.mubr.f32.vlgmr.msra.gmra.mrb[0].mxu0 %v50_v26  ;;  %v304_v26 = vld [vmem:[%s1400_s5 + $0x38] sm:$0xff] }
  0x24   :  { %928 = vmatprep.mubr.msk.f32.mxu0 %vm1057_vm0, %v1058_v4  ;;  %v1005_v27 = vpack.c.bf16 %v304_v26, %v303_v25  ;;  %1015 = vmatpush3.bf16.msra.mxu0 %v1014_v37 }
  0x25   :  { %1016 = vmatprep.subr.bf16.mxu0 %v1056_v0 }
  0x28   :  { %1018 = vmatpush3.bf16.msra.mxu0 %v1017_v39 }
  0x29   :  { %1019 = vmatprep.subr.bf16.mxu0 %v1056_v0 }
  0x2c   :  { %1021 = vmatpush3.bf16.msra.mxu0 %v1020_v42 }
  0x2d   :  { %1022 = vmatprep.subr.bf16.mxu0 %v1056_v0 }
  0xf6   :  { %v140_v46 = vpop.f32.mrb[0].mxu0 }
  0xf7   :  { %v141_v47 = vadd.f32 %v732_v45, %v140_v46  ;;  %v849_v48 = vpop.f32.mrb[1].mxu0  ;;  %v1023_v45 = vpack.c.bf16 %v396_v44, %v395_v43  ;;  %v397_v46 = vld [vmem:[%s1401_s7 + $0x40] sm:$0xff] }
  0xf9   :  { %v145_v49 = vmul.f32 0.70710677, %v141_v47  ;;  %v144_v13 = vmul.f32 0.5, %v141_v47  ;;  %v398_v47 = vld [vmem:[%s1401_s7 + $0x48] sm:$0xff]  ;;  %1024 = vmatpush3.bf16.msra.mxu0 %v1023_v45 }
  0xfa   :  { %v1026_v48 = vpack.c.bf16 %v398_v47, %v397_v46  ;;  %1025 = vmatprep.subr.bf16.mxu0 %v1056_v0 }
  0xfb   :  { %v733_v50 = vclamps-f32 %v145_v49, 4.0  ;;  %v734_v49 = vld [vmem:[%s1402_s4] ss:$0 sm:$0xff] }
  0xfd   :  { %v148_v51 = vmul.f32 %v733_v50, %v733_v50  ;;  %1027 = vmatpush3.bf16.msra.mxu0 %v1026_v48 }
  0xfe   :  { %1028 = vmatprep.subr.bf16.mxu0 %v1056_v0 }
  0xff   :  { %v157_v52 = vmul.f32 -1.1791603e-07, %v148_v51  ;;  %v149_v53 = vmul.f32 0.00022905065, %v148_v51 }
 0x101   :  { %v158_v54 = vadd.f32 2.3547966e-05, %v157_v52  ;;  %v150_v56 = vadd.f32 0.003408291, %v149_v53 }
 0x103   :  { %v159_v55 = vmul.f32 %v158_v54, %v148_v51  ;;  %v151_v59 = vmul.f32 %v150_v56, %v148_v51 }
 0x105   :  { %v160_v57 = vadd.f32 0.0010179626, %v159_v55  ;;  %v152_v62 = vadd.f32 0.050955694, %v151_v59 }
 0x107   :  { %v161_v58 = vmul.f32 %v160_v57, %v148_v51  ;;  %v153_v2 = vmul.f32 %v152_v62, %v148_v51 }
 0x109   :  { %v162_v60 = vadd.f32 0.01407047, %v161_v58  ;;  %v154_v6 = vadd.f32 0.18520832, %v153_v2 }
 0x10b   :  { %v163_v61 = vmul.f32 %v162_v60, %v148_v51  ;;  %v155_v8 = vmul.f32 %v154_v6, %v148_v51 }
 0x10d   :  { %v164_v63 = vadd.f32 0.11098505, %v163_v61  ;;  %v156_v9 = vadd.f32 1.1283791, %v155_v8 }
 0x10f   :  { %v165_v1 = vmul.f32 %v164_v63, %v148_v51  ;;  %v169_v10 = vmul.f32 %v733_v50, %v156_v9 }
 0x111   :  { %v166_v3 = vadd.f32 0.49746925, %v165_v1 }
 0x113   :  { %v167_v5 = vmul.f32 %v166_v3, %v148_v51 }
 0x115   :  { %v168_v7 = vadd.f32 1.0, %v167_v5 }
 0x117   :  { %1046 = vrcp.f32 %v168_v7 }
 0x121   :  { %v1047_v11 = vpop.eup %1046 }
 0x122   :  { %v171_v12 = vmul.f32 %v1047_v11, %v169_v10 }
 0x124   :  { %v172_v14 = vadd.f32 1.0, %v171_v12 }
 0x126   :  { %v173_v15 = vmul.f32 %v172_v14, %v144_v13 }
 0x128   :  { %875 = vmatmul.mubr.msk.f32.vlgmr.msra.gmra.mrb[0].mxu1 %vm193_vm1, %v173_v15 }
 0x129   :  { %901 = vmatprep.mubr.msk.f32.mxu1 %vm1057_vm0, %v1058_v4  ;;  %997 = vmatpush3.bf16.msra.mxu1 %v996_v18 }
 0x12a   :  { %998 = vmatprep.subr.bf16.mxu1 %v1056_v0 }
 0x12d   :  { %1000 = vmatpush3.bf16.msra.mxu1 %v999_v21  ;;  %v400_v21 = vld [vmem:[%s1401_s7 + $0x58] sm:$0xff] }
 0x12e   :  { %1001 = vmatprep.subr.bf16.mxu1 %v1056_v0  ;;  %v1029_v22 = vpack.c.bf16 %v400_v21, %v399_v20 }
 0x130   :  { %1030 = vmatpush3.bf16.msra.mxu0 %v1029_v22 }
 0x131   :  { %1003 = vmatpush3.bf16.msra.mxu1 %v1002_v24  ;;  %1037 = vmatprep.subr.bf16.mxu0 %v1056_v0 }
 0x132   :  { %1004 = vmatprep.subr.bf16.mxu1 %v1056_v0 }
 0x135   :  { %1006 = vmatpush3.bf16.msra.mxu1 %v1005_v27  ;;  %v511_v27 = vld [vmem:[%s1404_s9] sm:$0xff] }
 0x136   :  { %1007 = vmatprep.subr.bf16.mxu1 %v1056_v0  ;;  %v1032_v29 = vpack.c.bf16 %v512_v28, %v511_v27 }
 0x139   :  { %1009 = vmatpush3.bf16.msra.mxu1 %v1008_v30  ;;  %v513_v30 = vld [vmem:[%s1404_s9 + $0x10] sm:$0xff] }
 0x13a   :  { %1010 = vmatprep.subr.bf16.mxu1 %v1056_v0 }
 0x13d   :  { %1012 = vmatpush3.bf16.msra.mxu1 %v1011_v33 }
 0x13e   :  { %1031 = vmatprep.subr.bf16.mxu1 %v1056_v0 }
 0x1fb   :  { %v263_v50 = vpop.f32.mrb[0].mxu1 }
 0x1fc   :  { %v264_v51 = vadd.f32 %v734_v49, %v263_v50  ;;  %v876_v52 = vpop.f32.mrb[1].mxu1 }
 0x1fe   :  { %v268_v53 = vmul.f32 0.70710677, %v264_v51  ;;  %v267_v17 = vmul.f32 0.5, %v264_v51 }
 0x200   :  { %v736_v54 = vclamps-f32 %v268_v53, 4.0 }
 0x202   :  { %v271_v55 = vmul.f32 %v736_v54, %v736_v54 }
 0x204   :  { %v280_v56 = vmul.f32 -1.1791603e-07, %v271_v55  ;;  %v272_v57 = vmul.f32 0.00022905065, %v271_v55 }
 0x206   :  { %v281_v58 = vadd.f32 2.3547966e-05, %v280_v56  ;;  %v273_v60 = vadd.f32 0.003408291, %v272_v57 }
 0x208   :  { %v282_v59 = vmul.f32 %v281_v58, %v271_v55  ;;  %v274_v63 = vmul.f32 %v273_v60, %v271_v55 }
 0x20a   :  { %v283_v61 = vadd.f32 0.0010179626, %v282_v59  ;;  %v275_v3 = vadd.f32 0.050955694, %v274_v63 }
 0x20c   :  { %v284_v62 = vmul.f32 %v283_v61, %v271_v55  ;;  %v276_v7 = vmul.f32 %v275_v3, %v271_v55  ;;  %v627_v3 = vld [vmem:[%s1406_s11 + $0x8] sm:$0xff] }
 0x20e   :  { %v285_v1 = vadd.f32 0.01407047, %v284_v62  ;;  %v277_v10 = vadd.f32 0.18520832, %v276_v7  ;;  %v629_v7 = vld [vmem:[%s1406_s11 + $0x18] sm:$0xff] }
 0x210   :  { %v286_v2 = vmul.f32 %v285_v1, %v271_v55  ;;  %v278_v12 = vmul.f32 %v277_v10, %v271_v55 }
 0x212   :  { %v287_v5 = vadd.f32 0.11098505, %v286_v2  ;;  %v279_v13 = vadd.f32 1.1283791, %v278_v12  ;;  %v626_v2 = vld [vmem:[%s1406_s11] sm:$0xff] }
 0x214   :  { %v288_v6 = vmul.f32 %v287_v5, %v271_v55  ;;  %v292_v14 = vmul.f32 %v736_v54, %v279_v13  ;;  %v1038_v5 = vpack.c.bf16 %v627_v3, %v626_v2 }
 0x216   :  { %v289_v8 = vadd.f32 0.49746925, %v288_v6  ;;  %v628_v6 = vld [vmem:[%s1406_s11 + $0x10] sm:$0xff] }
 0x218   :  { %v290_v9 = vmul.f32 %v289_v8, %v271_v55  ;;  %v1041_v8 = vpack.c.bf16 %v629_v7, %v628_v6 }
 0x21a   :  { %v291_v11 = vadd.f32 1.0, %v290_v9  ;;  %v742_v9 = vld [vmem:[%s1407_s10] ss:$0 sm:$0xff] }
 0x21c   :  { %1048 = vrcp.f32 %v291_v11 }
 0x226   :  { %v1049_v15 = vpop.eup %1048 }
 0x227   :  { %v294_v16 = vmul.f32 %v1049_v15, %v292_v14 }
 0x229   :  { %v295_v18 = vadd.f32 1.0, %v294_v16 }
 0x22b   :  { %v296_v19 = vmul.f32 %v295_v18, %v267_v17 }
 0x22d   :  { %902 = vmatmul.mubr.msk.f32.vlgmr.msra.gmra.mrb[2].mxu1 %vm193_vm1, %v296_v19 }
 0x22e   :  { %939 = vmatprep.mubr.msk.f32.mxu1 %vm1057_vm0, %v1058_v4  ;;  %1033 = vmatpush3.bf16.msra.mxu1 %v1032_v29 }
 0x22f   :  { %1034 = vmatprep.subr.bf16.mxu1 %v1056_v0 }
 0x300   :  { %v385_v24 = vpop.f32.mrb[2].mxu1 }
 0x301   :  { %v386_v25 = vadd.f32 %v737_v23, %v385_v24  ;;  %v903_v26 = vpop.f32.mrb[3].mxu1 }
 0x303   :  { %929 = vmatmul.mubr.msk.f32.vlgmr.msra.gmra.mrb[2].mxu0 %vm193_vm1, %v386_v25 }
 0x304   :  { %950 = vmatprep.mubr.msk.f32.mxu0 %vm1057_vm0, %v1058_v4  ;;  %v514_v4 = vld [vmem:[%s1404_s9 + $0x18] sm:$0xff]  ;;  %1039 = vmatpush3.bf16.msra.mxu0 %v1038_v5 }
 0x305   :  { %v1035_v31 = vpack.c.bf16 %v514_v4, %v513_v30  ;;  %1040 = vmatprep.subr.bf16.mxu0 %v1056_v0 }
 0x307   :  { %1036 = vmatpush3.bf16.msra.mxu1 %v1035_v31 }
 0x308   :  { %1042 = vmatpush3.bf16.msra.mxu0 %v1041_v8 }
 0x3d6   :  { %v477_v33 = vpop.f32.mrb[2].mxu0 }
 0x3d7   :  { %v478_v34 = vadd.f32 %v739_v32, %v477_v33  ;;  %v930_v35 = vpop.f32.mrb[3].mxu0 }
 0x3d9   :  { %v482_v36 = vmul.f32 0.70710677, %v478_v34  ;;  %v481_v62 = vmul.f32 0.5, %v478_v34 }
 0x3db   :  { %v741_v37 = vclamps-f32 %v482_v36, 4.0 }
 0x3dd   :  { %v485_v38 = vmul.f32 %v741_v37, %v741_v37 }
 0x3df   :  { %v494_v39 = vmul.f32 -1.1791603e-07, %v485_v38  ;;  %v486_v40 = vmul.f32 0.00022905065, %v485_v38 }
 0x3e1   :  { %v495_v41 = vadd.f32 2.3547966e-05, %v494_v39  ;;  %v487_v43 = vadd.f32 0.003408291, %v486_v40  ;;  %v745_v40 = vld [vmem:[%s1408_s12] ss:$0 sm:$0xff] }
 0x3e3   :  { %v496_v42 = vmul.f32 %v495_v41, %v485_v38  ;;  %v488_v46 = vmul.f32 %v487_v43, %v485_v38 }
 0x3e5   :  { %v497_v44 = vadd.f32 0.0010179626, %v496_v42  ;;  %v489_v49 = vadd.f32 0.050955694, %v488_v46  ;;  %v748_v46 = vld [vmem:[%s1410_s14] ss:$0 sm:$0xff] }
 0x3e7   :  { %v498_v45 = vmul.f32 %v497_v44, %v485_v38  ;;  %v490_v52 = vmul.f32 %v489_v49, %v485_v38  ;;  %v747_v44 = vld [vmem:[%s1409_s13] ss:$0 sm:$0xff] }
 0x3e9   :  { %v499_v47 = vadd.f32 0.01407047, %v498_v45  ;;  %v491_v55 = vadd.f32 0.18520832, %v490_v52 }
 0x3eb   :  { %v500_v48 = vmul.f32 %v499_v47, %v485_v38  ;;  %v492_v57 = vmul.f32 %v491_v55, %v485_v38 }
 0x3ed   :  { %v501_v50 = vadd.f32 0.11098505, %v500_v48  ;;  %v493_v58 = vadd.f32 1.1283791, %v492_v57 }
 0x3ef   :  { %v502_v51 = vmul.f32 %v501_v50, %v485_v38  ;;  %v506_v59 = vmul.f32 %v741_v37, %v493_v58 }
 0x3f1   :  { %v503_v53 = vadd.f32 0.49746925, %v502_v51 }
 0x3f3   :  { %v504_v54 = vmul.f32 %v503_v53, %v485_v38 }
 0x3f5   :  { %v505_v56 = vadd.f32 1.0, %v504_v54 }
 0x3f7   :  { %1050 = vrcp.f32 %v505_v56 }
 0x401   :  { %v1051_v60 = vpop.eup %1050 }
 0x402   :  { %v508_v61 = vmul.f32 %v1051_v60, %v506_v59 }
 0x404   :  { %v509_v63 = vadd.f32 1.0, %v508_v61 }
 0x406   :  { %v510_v1 = vmul.f32 %v509_v63, %v481_v62 }
 0x408   :  { %940 = vmatmul.mubr.msk.f32.vlgmr.msra.gmra.mrb[4].mxu1 %vm522_vm2, %v510_v1 }
 0x4db   :  { %v592_v10 = vpop.f32.mrb[4].mxu1 }
 0x4dc   :  { %v593_v11 = vadd.f32 %v742_v9, %v592_v10  ;;  %v941_v12 = vpop.f32.mrb[5].mxu1 }
 0x4de   :  { %v597_v13 = vmul.f32 0.70710677, %v593_v11  ;;  %v596_v37 = vmul.f32 0.5, %v593_v11 }
 0x4e0   :  { %v744_v14 = vclamps-f32 %v597_v13, 4.0 }
 0x4e2   :  { %v600_v0 = vmul.f32 %v744_v14, %v744_v14 }
 0x4e4   :  { %v609_v15 = vmul.f32 -1.1791603e-07, %v600_v0  ;;  %v601_v16 = vmul.f32 0.00022905065, %v600_v0 }
 0x4e6   :  { %v610_v17 = vadd.f32 2.3547966e-05, %v609_v15  ;;  %v602_v19 = vadd.f32 0.003408291, %v601_v16 }
 0x4e8   :  { %v611_v18 = vmul.f32 %v610_v17, %v600_v0  ;;  %v603_v22 = vmul.f32 %v602_v19, %v600_v0 }
 0x4ea   :  { %v612_v20 = vadd.f32 0.0010179626, %v611_v18  ;;  %v604_v25 = vadd.f32 0.050955694, %v603_v22 }
 0x4ec   :  { %v613_v21 = vmul.f32 %v612_v20, %v600_v0  ;;  %v605_v28 = vmul.f32 %v604_v25, %v600_v0 }
 0x4ee   :  { %v614_v23 = vadd.f32 0.01407047, %v613_v21  ;;  %v606_v4 = vadd.f32 0.18520832, %v605_v28 }
 0x4f0   :  { %v615_v24 = vmul.f32 %v614_v23, %v600_v0  ;;  %v607_v32 = vmul.f32 %v606_v4, %v600_v0 }
 0x4f2   :  { %v616_v26 = vadd.f32 0.11098505, %v615_v24  ;;  %v608_v33 = vadd.f32 1.1283791, %v607_v32 }
 0x4f4   :  { %v617_v27 = vmul.f32 %v616_v26, %v600_v0  ;;  %v621_v34 = vmul.f32 %v744_v14, %v608_v33 }
 0x4f6   :  { %v618_v29 = vadd.f32 0.49746925, %v617_v27 }
 0x4f8   :  { %v619_v30 = vmul.f32 %v618_v29, %v600_v0 }
 0x4fa   :  { %v620_v31 = vadd.f32 1.0, %v619_v30 }
 0x4fc   :  { %1052 = vrcp.f32 %v620_v31 }
 0x506   :  { %v1053_v35 = vpop.eup %1052 }
 0x507   :  { %v623_v36 = vmul.f32 %v1053_v35, %v621_v34 }
 0x509   :  { %v624_v38 = vadd.f32 1.0, %v623_v36 }
 0x50b   :  { %v625_v39 = vmul.f32 %v624_v38, %v596_v37 }
 0x50d   :  { %951 = vmatmul.mubr.msk.f32.vlgmr.msra.gmra.mrb[4].mxu0 %vm522_vm2, %v625_v39 }
 0x5e0   :  { %v706_v41 = vpop.f32.mrb[4].mxu0 }
 0x5e1   :  { %v707_v42 = vadd.f32 %v745_v40, %v706_v41  ;;  %v952_v43 = vpop.f32.mrb[5].mxu0 }
 0x5e3   :  { %1054 = vtanh.f32 %v707_v42 }
 0x5ed   :  { %v1055_v45 = vpop.eup %1054 }
 0x5ee   :  { %v718_v47 = vmul.f32 %v1055_v45, %v747_v44 }
 0x5f0   :  { %v726_v48 = vadd.f32 %v748_v46, %v718_v47 }
 0x5f2   :  { %727 = vst [vmem:[%s1411_s15] sm:$0xff] %v726_v48 }

</bundles_post_ra>
